<compile_context>
chip_gen: v7x
topology: tpu7x:2x2x1
jax: 0.10.0
libtpu: 0.0.40
codegen_flags: <defaults>
</compile_context>

<pallas_src>
import functools
import math

import jax
import jax.numpy as jnp
from jax import lax
from jax.experimental import pallas as pl
from jax.experimental.pallas import tpu as pltpu


# --------------------------------------------------------------------------
# Shared in-kernel helper: fused bidirectional GRU + self-attention over time
# --------------------------------------------------------------------------
def _bigru_attend(x_ref, wih_ref, bih_ref, whh_ref, bhhn_ref,
                  watt_ref, batt_ref, gi_ref, hs_ref, *, hidden):
    """x_ref: (T, Nb, D) time-major input block (bf16).

    wih_ref : (D, 6H)   fused input weights, cols [r_f r_b | z_f z_b | n_f n_b]
    bih_ref : (1, 6H)   b_ih with b_hh(r,z) folded in
    whh_ref : (2H, 6H)  block-diagonal fused hidden weights (same column order)
    bhhn_ref: (1, 2H)   b_hh of the n gate only (stays inside r*(gh_n + b_hn))
    gi_ref  : (T, Nb, 6H) bf16 scratch — direction-merged input projections
    hs_ref  : (T, Nb, 2H) f32 scratch — per-step hidden states, then ys
    returns : (Nb, 2H)  attention-weighted context (f32)
    """
    H = hidden
    H2, H4, H6 = 2 * H, 4 * H, 6 * H
    T, Nb, D = x_ref.shape

    # --- input projections: one MXU matmul for all timesteps & directions ----
    x = x_ref[...]                                                  # bf16
    gi = jnp.dot(x.reshape(T * Nb, D), wih_ref[...],
                 preferred_element_type=jnp.float32)
    gi = (gi + bih_ref[...]).reshape(T, Nb, H6)

    # Merge the two directions once: column c is forward iff (c mod 2H) < H;
    # backward columns take the time-reversed projection so the recurrence
    # reads a single gi_ref[i] per step.
    fwd_col = (lax.broadcasted_iota(jnp.int32, (1, H6), 1) % H2) < H
    for t in range(T):                          # static; T is small
        gi_ref[t] = jnp.where(fwd_col, gi[t], gi[T - 1 - t]).astype(jnp.bfloat16)

    # --- fused bidirectional recurrence --------------------------------------
    whh_bf = whh_ref[...].astype(jnp.bfloat16)                      # hoisted
    bhh_n = jnp.broadcast_to(bhhn_ref[...], (Nb, H2))               # hoisted

    def step(i, h):                             # h: (Nb, 2H) = [h_fwd | h_bwd]
        gi_t = gi_ref[i].astype(jnp.float32)                        # (Nb, 6H)
        gh = jnp.dot(h.astype(jnp.bfloat16), whh_bf,
                     preferred_element_type=jnp.float32)            # (Nb, 6H)
        rz = jax.nn.sigmoid(gi_t[:, :H4] + gh[:, :H4])              # r & z
        r, z = rz[:, :H2], rz[:, H2:]
        n = jnp.tanh(gi_t[:, H4:] + r * (gh[:, H4:] + bhh_n))
        h_new = (1.0 - z) * n + z * h
        hs_ref[i] = h_new                       # one full-width unmasked store
        return h_new

    lax.fori_loop(0, T, step, jnp.zeros((Nb, H2), jnp.float32), unroll=True)

    # --- time-align the two directions in one post-loop pass -----------------
    # fwd half of hs[i] belongs at t=i, bwd half at t=T-1-i -> pairwise swap of
    # the bwd halves (full-width selected stores; no per-step masked stores).
    lane_fwd = lax.broadcasted_iota(jnp.int32, (1, H2), 1) < H
    for u in range(T // 2):
        v = T - 1 - u
        a, b = hs_ref[u], hs_ref[v]
        hs_ref[u] = jnp.where(lane_fwd, a, b)
        hs_ref[v] = jnp.where(lane_fwd, b, a)
    ys = hs_ref[...]                            # (T, Nb, 2H) time-aligned

    # --- self-attention over time (Nb stays on sublanes throughout) ----------
    w = watt_ref[...].reshape(1, 1, H2)
    s = jnp.tanh(jnp.sum(ys * w, axis=-1, keepdims=True) + batt_ref[...])
    s = s - jnp.max(s, axis=0, keepdims=True)
    e = jnp.exp(s)
    a = e * pl.reciprocal(jnp.sum(e, axis=0, keepdims=True), approx=True)
    return jnp.sum(ys * a, axis=0)              # (Nb, 2H)


def _chunk_kernel(x_ref, wih_ref, bih_ref, whh_ref, bhhn_ref, watt_ref,
                  batt_ref, out_ref, gi_ref, hs_ref, *, hidden):
    ctx = _bigru_attend(x_ref, wih_ref, bih_ref, whh_ref, bhhn_ref,
                        watt_ref, batt_ref, gi_ref, hs_ref, hidden=hidden)
    out_ref[...] = ctx.astype(out_ref.dtype)


def _seq_kernel(x_ref, wih_ref, bih_ref, whh_ref, bhhn_ref, watt_ref, batt_ref,
                w1_ref, b1_ref, w2_ref, b2_ref, out_ref, gi_ref, hs_ref,
                *, hidden):
    ctx = _bigru_attend(x_ref, wih_ref, bih_ref, whh_ref, bhhn_ref,
                        watt_ref, batt_ref, gi_ref, hs_ref, hidden=hidden)
    h1 = jnp.dot(ctx, w1_ref[...], preferred_element_type=jnp.float32) + b1_ref[...]
    h1 = jnp.maximum(h1, 0.0)
    # final Linear(dense_output, 1) as a VPU reduce (no width-1 MXU matmul)
    o = jnp.sum(h1 * w2_ref[...], axis=-1, keepdims=True) + b2_ref[...]
    out_ref[...] = o.astype(out_ref.dtype)


# --------------------------------------------------------------------------
# pallas_call wrappers
# --------------------------------------------------------------------------
def _const_spec(shape):
    return pl.BlockSpec(shape, lambda i: (0,) * len(shape))


def _pick_block_n(N, T, D, H, budget_bytes=16 << 20, max_block=512):
    """Largest batch tile whose explicit per-block VMEM footprint fits budget.

    Budget is conservative (fits v7x's 32 MiB default scoped VMEM with room for
    compiler temporaries); block_n is a multiple of 8 (sublane constraint).
    """
    H2, H6 = 2 * H, 6 * H
    per_row = (2 * T * D * 2        # x block (bf16), double-buffered
               + 2 * H2 * 4         # out block (f32), double-buffered
               + T * H6 * 2         # gi scratch (bf16)
               + T * H2 * 4)        # hs scratch (f32)
    cap = max(8, min(max_block, budget_bytes // max(per_row, 1)))
    cap = (cap // 8) * 8
    if N <= cap:
        return max(8, -(-N // 8) * 8)           # one block over (padded) N
    return cap                                  # >= 2 grid steps (megacore)


def bigru_attention(x_tm, gru_fused, att):
    """x_tm: (T, N, D) time-major -> (N, 2H) attention context (f32)."""
    wih, bih, whh, bhh_n = gru_fused
    watt, batt = att
    T, N, D = x_tm.shape
    H2, H6 = whh.shape
    H = H2 // 2

    block_n = _pick_block_n(N, T, D, H)
    n_pad = -(-N // block_n) * block_n
    if n_pad != N:                              # pad (never whole-batch block)
        x_tm = jnp.pad(x_tm, ((0, 0), (0, n_pad - N), (0, 0)))
    grid = (n_pad // block_n,)

    kernel = functools.partial(_chunk_kernel, hidden=H)
    out = pl.pallas_call(
        kernel,
        out_shape=jax.ShapeDtypeStruct((n_pad, H2), jnp.float32),
        grid=grid,
        in_specs=[
            pl.BlockSpec((T, block_n, D), lambda i: (0, i, 0)),
            _const_spec((D, H6)),
            _const_spec((1, H6)),
            _const_spec((H2, H6)),
            _const_spec((1, H2)),
            _const_spec((1, H2)),
            _const_spec((1, 1)),
        ],
        out_specs=pl.BlockSpec((block_n, H2), lambda i: (i, 0)),
        scratch_shapes=[pltpu.VMEM((T, block_n, H6), jnp.bfloat16),
                        pltpu.VMEM((T, block_n, H2), jnp.float32)],
        compiler_params=pltpu.CompilerParams(
            dimension_semantics=("parallel",),
            vmem_limit_bytes=48 * 1024 * 1024),
    )(x_tm, wih.astype(jnp.bfloat16), bih, whh.astype(jnp.bfloat16),
      bhh_n, watt, batt)
    return out[:N] if n_pad != N else out


def bigru_attention_classify(x_tm, gru_fused, att, cls):
    """x_tm: (S, B, F) time-major -> (B, 1): BiGRU + attention + Linear/ReLU/Linear."""
    wih, bih, whh, bhh_n = gru_fused
    watt, batt = att
    w1, b1, w2, b2 = cls                        # w1 pre-transposed: (F_in, Dd)
    S, B, F = x_tm.shape
    H2, H6 = whh.shape
    H = H2 // 2
    Dd = w1.shape[1]

    kernel = functools.partial(_seq_kernel, hidden=H)
    return pl.pallas_call(
        kernel,
        out_shape=jax.ShapeDtypeStruct((B, 1), jnp.float32),
        grid=(1,),
        in_specs=[
            pl.BlockSpec((S, B, F), lambda i: (0, 0, 0)),
            _const_spec((F, H6)),
            _const_spec((1, H6)),
            _const_spec((H2, H6)),
            _const_spec((1, H2)),
            _const_spec((1, H2)),
            _const_spec((1, 1)),
            _const_spec((H2, Dd)),
            _const_spec((1, Dd)),
            _const_spec((1, Dd)),
            _const_spec((1, 1)),
        ],
        out_specs=pl.BlockSpec((B, 1), lambda i: (0, 0)),
        scratch_shapes=[pltpu.VMEM((S, B, H6), jnp.bfloat16),
                        pltpu.VMEM((S, B, H2), jnp.float32)],
        compiler_params=pltpu.CompilerParams(
            dimension_semantics=("arbitrary",),
            vmem_limit_bytes=48 * 1024 * 1024),
    )(x_tm, wih.astype(jnp.bfloat16), bih, whh.astype(jnp.bfloat16),
      bhh_n, watt, batt, w1, b1, w2, b2)


# --------------------------------------------------------------------------
# Full forward pass (mirrors HierarchicalAttentionGru.forward, pool_size=0)
# --------------------------------------------------------------------------
def hierarchical_attention_gru(x, params, cfg):
    B = x.shape[0]
    C = cfg["chunk_len"]
    D = x.shape[-1]
    # (B, S*C, D) -> (C, B*S, D): one wrapper-side transpose so the kernels
    # never do an in-kernel relayout; bf16 halves the streamed input bytes.
    x_tm = jnp.transpose(x.reshape(-1, C, D), (1, 0, 2)).astype(jnp.bfloat16)
    c = bigru_attention(x_tm, params["chunk_gru"], params["chunk_att"])
    # (B*S, 2H0) -> (S, B, 2H0) time-major sequence batch
    c_tm = jnp.transpose(c.reshape(B, -1, c.shape[-1]), (1, 0, 2)).astype(jnp.bfloat16)
    return bigru_attention_classify(c_tm, params["seq_gru"], params["seq_att"],
                                    params["classify"])              # (B, 1)


# --------------------------------------------------------------------------
# Parameter construction (PyTorch layout) + one-time fusion to kernel layout
# --------------------------------------------------------------------------
def _uniform(key, shape, scale):
    return jax.random.uniform(key, shape, jnp.float32, -scale, scale)


def make_gru_params(key, input_size, hidden_size):
    """nn.GRU(bidirectional=True) parameter layout (gate order r, z, n)."""
    scale = 1.0 / math.sqrt(hidden_size)
    ks = jax.random.split(key, 8)
    return (
        _uniform(ks[0], (3 * hidden_size, input_size), scale),   # W_ih fwd
        _uniform(ks[1], (3 * hidden_size, hidden_size), scale),  # W_hh fwd
        _uniform(ks[2], (1, 3 * hidden_size), scale),            # b_ih fwd
        _uniform(ks[3], (1, 3 * hidden_size), scale),            # b_hh fwd
        _uniform(ks[4], (3 * hidden_size, input_size), scale),   # W_ih bwd
        _uniform(ks[5], (3 * hidden_size, hidden_size), scale),  # W_hh bwd
        _uniform(ks[6], (1, 3 * hidden_size), scale),            # b_ih bwd
        _uniform(ks[7], (1, 3 * hidden_size), scale),            # b_hh bwd
    )


def fuse_gru_params(p):
    """Fuse fwd/bwd GRU weights into the kernel layout.

    Gate-column order [r_f r_b | z_f z_b | n_f n_b] so the fused hidden state
    (N, 2H) = [h_f | h_b] only needs elementwise gate math.  b_hh of the r/z
    gates is folded into b_ih; only the n-gate hidden bias stays separate.
    """
    wih_f, whh_f, bih_f, bhh_f, wih_b, whh_b, bih_b, bhh_b = p
    H = whh_f.shape[1]
    H2 = 2 * H

    def gates(m):             # (3H, K) -> 3 x (K, H), pre-transposed per gate
        return [m[g * H:(g + 1) * H, :].T for g in range(3)]

    gi_f, gi_b = gates(wih_f), gates(wih_b)
    wih = jnp.concatenate([jnp.concatenate([gi_f[g], gi_b[g]], axis=1)
                           for g in range(3)], axis=1)               # (D, 6H)

    gh_f, gh_b = gates(whh_f), gates(whh_b)
    zz = jnp.zeros((H, H), jnp.float32)
    whh = jnp.concatenate(
        [jnp.concatenate([jnp.concatenate([gh_f[g], zz], axis=0),    # fwd cols
                          jnp.concatenate([zz, gh_b[g]], axis=0)],   # bwd cols
                         axis=1)
         for g in range(3)], axis=1)                                  # (2H, 6H)

    def interleave(bf, bb):   # (1,3H) pair -> (1,6H) in [g_f g_b] gate order
        return jnp.stack([bf.reshape(3, H), bb.reshape(3, H)],
                         axis=1).reshape(1, 6 * H)

    bih = interleave(bih_f, bih_b)
    bhh = interleave(bhh_f, bhh_b)
    bih_fused = bih.at[:, :2 * H2].add(bhh[:, :2 * H2])   # fold b_hh for r, z
    bhh_n = bhh[:, 2 * H2:]                               # (1, 2H), n gate only
    return wih, bih_fused, whh, bhh_n


def make_attention_params(key, input_feature):
    # xavier_uniform for Linear(input_feature, 1); bias zero.
    scale = math.sqrt(6.0 / (input_feature + 1))
    w = _uniform(key, (1, input_feature), scale)
    b = jnp.zeros((1, 1), jnp.float32)
    return (w, b)


def make_classify_params(key, in_features, dense_output):
    k1, k2, k3, k4 = jax.random.split(key, 4)
    s1 = 1.0 / math.sqrt(in_features)
    s2 = 1.0 / math.sqrt(dense_output)
    return (
        _uniform(k1, (dense_output, in_features), s1),   # W1 (PyTorch layout)
        _uniform(k2, (1, dense_output), s1),             # b1
        _uniform(k3, (1, dense_output), s2),             # W2
        _uniform(k4, (1, 1), s2),                        # b2
    )


def prepare_classify_params(p):
    w1, b1, w2, b2 = p
    return (w1.T, b1, w2, b2)   # pre-transpose W1 so the kernel never does .T


if __name__ == "__main__":
    # HierarchicalGruParams (attention_type='self', pool_size=0, num_layers=1)
    cfg = dict(seq_len=8, chunk_len=8, input_size=16,
               hidden_sizes=(32, 32), dense_output=32)
    B = 2
    H0, H1 = cfg["hidden_sizes"]

    key = jax.random.PRNGKey(0)
    kx, k1, k2, k3, k4, k5 = jax.random.split(key, 6)

    params = {
        "chunk_gru": fuse_gru_params(make_gru_params(k1, cfg["input_size"], H0)),
        "chunk_att": make_attention_params(k2, 2 * H0),
        "seq_gru": fuse_gru_params(make_gru_params(k3, 2 * H0, H1)),
        "seq_att": make_attention_params(k4, 2 * H1),
        "classify": prepare_classify_params(
            make_classify_params(k5, 2 * H1, cfg["dense_output"])),
    }

    # input: (B, seq_len * chunk_len, input_size)
    x = jax.random.normal(kx, (B, cfg["seq_len"] * cfg["chunk_len"],
                               cfg["input_size"]), jnp.float32)

    fwd = jax.jit(functools.partial(hierarchical_attention_gru, cfg=cfg))
    out = jax.block_until_ready(fwd(x, params))
    assert out.shape == (B, 1), out.shape
    assert bool(jnp.all(jnp.isfinite(out)))
    print("KERNEL_OK")
</pallas_src>

<mosaic_0001>
module attributes {stable_mosaic.version = 11 : i64} {
  func.func @_seq_kernel(%arg0: i32, %arg1: memref<8x2x64xbf16, #tpu.memory_space<vmem>>, %arg2: memref<64x192xbf16, #tpu.memory_space<vmem>>, %arg3: memref<1x192xf32, #tpu.memory_space<vmem>>, %arg4: memref<64x192xbf16, #tpu.memory_space<vmem>>, %arg5: memref<1x64xf32, #tpu.memory_space<vmem>>, %arg6: memref<1x64xf32, #tpu.memory_space<vmem>>, %arg7: memref<1x1xf32, #tpu.memory_space<vmem>>, %arg8: memref<64x32xf32, #tpu.memory_space<vmem>>, %arg9: memref<1x32xf32, #tpu.memory_space<vmem>>, %arg10: memref<1x32xf32, #tpu.memory_space<vmem>>, %arg11: memref<1x1xf32, #tpu.memory_space<vmem>>, %arg12: memref<2x1xf32, #tpu.memory_space<vmem>>, %arg13: memref<8x2x192xbf16, #tpu.memory_space<vmem>>, %arg14: memref<8x2x64xf32, #tpu.memory_space<vmem>>) attributes {dimension_semantics = [#tpu.dimension_semantics<arbitrary>], iteration_bounds = array<i64: 1>, scalar_prefetch = 0 : i64, scratch_operands = 2 : i64, tpu.core_type = #tpu.core_type<tc>, window_params = [{pipeline_mode = #tpu.pipeline_mode<synchronous>, transform_indices = @transform_0, window_bounds = array<i64: 8, 2, 64>}, {pipeline_mode = #tpu.pipeline_mode<synchronous>, transform_indices = @transform_1, window_bounds = array<i64: 64, 192>}, {pipeline_mode = #tpu.pipeline_mode<synchronous>, transform_indices = @transform_2, window_bounds = array<i64: 1, 192>}, {pipeline_mode = #tpu.pipeline_mode<synchronous>, transform_indices = @transform_3, window_bounds = array<i64: 64, 192>}, {pipeline_mode = #tpu.pipeline_mode<synchronous>, transform_indices = @transform_4, window_bounds = array<i64: 1, 64>}, {pipeline_mode = #tpu.pipeline_mode<synchronous>, transform_indices = @transform_5, window_bounds = array<i64: 1, 64>}, {pipeline_mode = #tpu.pipeline_mode<synchronous>, transform_indices = @transform_6, window_bounds = array<i64: 1, 1>}, {pipeline_mode = #tpu.pipeline_mode<synchronous>, transform_indices = @transform_7, window_bounds = array<i64: 64, 32>}, {pipeline_mode = #tpu.pipeline_mode<synchronous>, transform_indices = @transform_8, window_bounds = array<i64: 1, 32>}, {pipeline_mode = #tpu.pipeline_mode<synchronous>, transform_indices = @transform_9, window_bounds = array<i64: 1, 32>}, {pipeline_mode = #tpu.pipeline_mode<synchronous>, transform_indices = @transform_10, window_bounds = array<i64: 1, 1>}, {pipeline_mode = #tpu.pipeline_mode<synchronous>, transform_indices = @transform_11, window_bounds = array<i64: 2, 1>}]} {
    %c0 = arith.constant 0 : index
    %c0_0 = arith.constant 0 : index
    %c0_1 = arith.constant 0 : index
    %0 = vector.load %arg1[%c0, %c0_0, %c0_1] : memref<8x2x64xbf16, #tpu.memory_space<vmem>>, vector<8x2x64xbf16>
    %1 = vector.shape_cast %0 : vector<8x2x64xbf16> to vector<16x64xbf16>
    %c0_2 = arith.constant 0 : index
    %c0_3 = arith.constant 0 : index
    %2 = vector.load %arg2[%c0_2, %c0_3] : memref<64x192xbf16, #tpu.memory_space<vmem>>, vector<64x192xbf16>
    %cst = arith.constant dense<0.000000e+00> : vector<16x192xf32>
    %3 = tpu.matmul %1, %2, %cst {dimension_numbers = #tpu.dot_dimension_numbers<[1], [0], [0], [1], [0, 0, 1, 1], [], []>} : vector<16x64xbf16>, vector<64x192xbf16>, vector<16x192xf32> -> vector<16x192xf32>
    %c0_4 = arith.constant 0 : index
    %c0_5 = arith.constant 0 : index
    %4 = vector.load %arg3[%c0_4, %c0_5] : memref<1x192xf32, #tpu.memory_space<vmem>>, vector<1x192xf32>
    %5 = vector.broadcast %4 : vector<1x192xf32> to vector<16x192xf32>
    %6 = arith.addf %3, %5 : vector<16x192xf32>
    %7 = vector.shape_cast %6 : vector<16x192xf32> to vector<8x2x192xf32>
    %8 = tpu.iota {dimensions = array<i32: 1>} : vector<1x192xi32>
    %c64_i32 = arith.constant 64 : i32
    %c0_i32 = arith.constant 0 : i32
    %9 = arith.cmpi eq, %c64_i32, %c0_i32 : i32
    %c1_i32 = arith.constant 1 : i32
    %10 = arith.select %9, %c1_i32, %c64_i32 : i32
    %11 = vector.broadcast %10 : i32 to vector<1x192xi32>
    %12 = arith.remsi %8, %11 : vector<1x192xi32>
    %c0_i32_6 = arith.constant 0 : i32
    %13 = vector.broadcast %c0_i32_6 : i32 to vector<1x192xi32>
    %14 = arith.cmpi ne, %12, %13 : vector<1x192xi32>
    %c0_i32_7 = arith.constant 0 : i32
    %15 = vector.broadcast %c0_i32_7 : i32 to vector<1x192xi32>
    %16 = arith.cmpi slt, %12, %15 : vector<1x192xi32>
    %c0_i32_8 = arith.constant 0 : i32
    %17 = arith.cmpi slt, %10, %c0_i32_8 : i32
    %18 = vector.broadcast %17 : i1 to vector<1x192xi1>
    %19 = vector.broadcast %18 : vector<1x192xi1> to vector<1x192xi1>
    %20 = arith.xori %16, %19 : vector<1x192xi1>
    %21 = arith.andi %20, %14 : vector<1x192xi1>
    %22 = vector.broadcast %10 : i32 to vector<1x192xi32>
    %23 = arith.addi %12, %22 : vector<1x192xi32>
    %24 = arith.select %21, %23, %12 : vector<1x192xi1>, vector<1x192xi32>
    %c32_i32 = arith.constant 32 : i32
    %25 = vector.broadcast %c32_i32 : i32 to vector<1x192xi32>
    %26 = arith.cmpi slt, %24, %25 : vector<1x192xi32>
    %27 = vector.extract_strided_slice %7 {offsets = [0, 0, 0], sizes = [1, 2, 192], strides = [1, 1, 1]} : vector<8x2x192xf32> to vector<1x2x192xf32>
    %28 = vector.shape_cast %27 : vector<1x2x192xf32> to vector<2x192xf32>
    %29 = vector.extract_strided_slice %7 {offsets = [7, 0, 0], sizes = [1, 2, 192], strides = [1, 1, 1]} : vector<8x2x192xf32> to vector<1x2x192xf32>
    %30 = vector.shape_cast %29 : vector<1x2x192xf32> to vector<2x192xf32>
    %31 = vector.shape_cast %26 : vector<1x192xi1> to vector<1x192xi1>
    %32 = vector.broadcast %31 : vector<1x192xi1> to vector<2x192xi1>
    %33 = arith.select %32, %28, %30 : vector<2x192xi1>, vector<2x192xf32>
    %34 = arith.truncf %33 : vector<2x192xf32> to vector<2x192xbf16>
    %c0_9 = arith.constant 0 : index
    %c0_10 = arith.constant 0 : index
    %c0_11 = arith.constant 0 : index
    %35 = vector.load %arg13[%c0_9, %c0_10, %c0_11] : memref<8x2x192xbf16, #tpu.memory_space<vmem>>, vector<1x2x192xbf16>
    %36 = vector.shape_cast %35 : vector<1x2x192xbf16> to vector<2x192xbf16>
    %37 = vector.shape_cast %34 : vector<2x192xbf16> to vector<1x2x192xbf16>
    tpu.vector_store %arg13[%c0_9, %c0_10, %c0_11], %37 {strides = array<i32>} : memref<8x2x192xbf16, #tpu.memory_space<vmem>>, vector<1x2x192xbf16>,
    %38 = vector.extract_strided_slice %7 {offsets = [1, 0, 0], sizes = [1, 2, 192], strides = [1, 1, 1]} : vector<8x2x192xf32> to vector<1x2x192xf32>
    %39 = vector.shape_cast %38 : vector<1x2x192xf32> to vector<2x192xf32>
    %40 = vector.extract_strided_slice %7 {offsets = [6, 0, 0], sizes = [1, 2, 192], strides = [1, 1, 1]} : vector<8x2x192xf32> to vector<1x2x192xf32>
    %41 = vector.shape_cast %40 : vector<1x2x192xf32> to vector<2x192xf32>
    %42 = vector.shape_cast %26 : vector<1x192xi1> to vector<1x192xi1>
    %43 = vector.broadcast %42 : vector<1x192xi1> to vector<2x192xi1>
    %44 = arith.select %43, %39, %41 : vector<2x192xi1>, vector<2x192xf32>
    %45 = arith.truncf %44 : vector<2x192xf32> to vector<2x192xbf16>
    %c1 = arith.constant 1 : index
    %c0_12 = arith.constant 0 : index
    %c0_13 = arith.constant 0 : index
    %46 = vector.load %arg13[%c1, %c0_12, %c0_13] : memref<8x2x192xbf16, #tpu.memory_space<vmem>>, vector<1x2x192xbf16>
    %47 = vector.shape_cast %46 : vector<1x2x192xbf16> to vector<2x192xbf16>
    %48 = vector.shape_cast %45 : vector<2x192xbf16> to vector<1x2x192xbf16>
    tpu.vector_store %arg13[%c1, %c0_12, %c0_13], %48 {strides = array<i32>} : memref<8x2x192xbf16, #tpu.memory_space<vmem>>, vector<1x2x192xbf16>,
    %49 = vector.extract_strided_slice %7 {offsets = [2, 0, 0], sizes = [1, 2, 192], strides = [1, 1, 1]} : vector<8x2x192xf32> to vector<1x2x192xf32>
    %50 = vector.shape_cast %49 : vector<1x2x192xf32> to vector<2x192xf32>
    %51 = vector.extract_strided_slice %7 {offsets = [5, 0, 0], sizes = [1, 2, 192], strides = [1, 1, 1]} : vector<8x2x192xf32> to vector<1x2x192xf32>
    %52 = vector.shape_cast %51 : vector<1x2x192xf32> to vector<2x192xf32>
    %53 = vector.shape_cast %26 : vector<1x192xi1> to vector<1x192xi1>
    %54 = vector.broadcast %53 : vector<1x192xi1> to vector<2x192xi1>
    %55 = arith.select %54, %50, %52 : vector<2x192xi1>, vector<2x192xf32>
    %56 = arith.truncf %55 : vector<2x192xf32> to vector<2x192xbf16>
    %c2 = arith.constant 2 : index
    %c0_14 = arith.constant 0 : index
    %c0_15 = arith.constant 0 : index
    %57 = vector.load %arg13[%c2, %c0_14, %c0_15] : memref<8x2x192xbf16, #tpu.memory_space<vmem>>, vector<1x2x192xbf16>
    %58 = vector.shape_cast %57 : vector<1x2x192xbf16> to vector<2x192xbf16>
    %59 = vector.shape_cast %56 : vector<2x192xbf16> to vector<1x2x192xbf16>
    tpu.vector_store %arg13[%c2, %c0_14, %c0_15], %59 {strides = array<i32>} : memref<8x2x192xbf16, #tpu.memory_space<vmem>>, vector<1x2x192xbf16>,
    %60 = vector.extract_strided_slice %7 {offsets = [3, 0, 0], sizes = [1, 2, 192], strides = [1, 1, 1]} : vector<8x2x192xf32> to vector<1x2x192xf32>
    %61 = vector.shape_cast %60 : vector<1x2x192xf32> to vector<2x192xf32>
    %62 = vector.extract_strided_slice %7 {offsets = [4, 0, 0], sizes = [1, 2, 192], strides = [1, 1, 1]} : vector<8x2x192xf32> to vector<1x2x192xf32>
    %63 = vector.shape_cast %62 : vector<1x2x192xf32> to vector<2x192xf32>
    %64 = vector.shape_cast %26 : vector<1x192xi1> to vector<1x192xi1>
    %65 = vector.broadcast %64 : vector<1x192xi1> to vector<2x192xi1>
    %66 = arith.select %65, %61, %63 : vector<2x192xi1>, vector<2x192xf32>
    %67 = arith.truncf %66 : vector<2x192xf32> to vector<2x192xbf16>
    %c3 = arith.constant 3 : index
    %c0_16 = arith.constant 0 : index
    %c0_17 = arith.constant 0 : index
    %68 = vector.load %arg13[%c3, %c0_16, %c0_17] : memref<8x2x192xbf16, #tpu.memory_space<vmem>>, vector<1x2x192xbf16>
    %69 = vector.shape_cast %68 : vector<1x2x192xbf16> to vector<2x192xbf16>
    %70 = vector.shape_cast %67 : vector<2x192xbf16> to vector<1x2x192xbf16>
    tpu.vector_store %arg13[%c3, %c0_16, %c0_17], %70 {strides = array<i32>} : memref<8x2x192xbf16, #tpu.memory_space<vmem>>, vector<1x2x192xbf16>,
    %71 = vector.extract_strided_slice %7 {offsets = [4, 0, 0], sizes = [1, 2, 192], strides = [1, 1, 1]} : vector<8x2x192xf32> to vector<1x2x192xf32>
    %72 = vector.shape_cast %71 : vector<1x2x192xf32> to vector<2x192xf32>
    %73 = vector.extract_strided_slice %7 {offsets = [3, 0, 0], sizes = [1, 2, 192], strides = [1, 1, 1]} : vector<8x2x192xf32> to vector<1x2x192xf32>
    %74 = vector.shape_cast %73 : vector<1x2x192xf32> to vector<2x192xf32>
    %75 = vector.shape_cast %26 : vector<1x192xi1> to vector<1x192xi1>
    %76 = vector.broadcast %75 : vector<1x192xi1> to vector<2x192xi1>
    %77 = arith.select %76, %72, %74 : vector<2x192xi1>, vector<2x192xf32>
    %78 = arith.truncf %77 : vector<2x192xf32> to vector<2x192xbf16>
    %c4 = arith.constant 4 : index
    %c0_18 = arith.constant 0 : index
    %c0_19 = arith.constant 0 : index
    %79 = vector.load %arg13[%c4, %c0_18, %c0_19] : memref<8x2x192xbf16, #tpu.memory_space<vmem>>, vector<1x2x192xbf16>
    %80 = vector.shape_cast %79 : vector<1x2x192xbf16> to vector<2x192xbf16>
    %81 = vector.shape_cast %78 : vector<2x192xbf16> to vector<1x2x192xbf16>
    tpu.vector_store %arg13[%c4, %c0_18, %c0_19], %81 {strides = array<i32>} : memref<8x2x192xbf16, #tpu.memory_space<vmem>>, vector<1x2x192xbf16>,
    %82 = vector.extract_strided_slice %7 {offsets = [5, 0, 0], sizes = [1, 2, 192], strides = [1, 1, 1]} : vector<8x2x192xf32> to vector<1x2x192xf32>
    %83 = vector.shape_cast %82 : vector<1x2x192xf32> to vector<2x192xf32>
    %84 = vector.extract_strided_slice %7 {offsets = [2, 0, 0], sizes = [1, 2, 192], strides = [1, 1, 1]} : vector<8x2x192xf32> to vector<1x2x192xf32>
    %85 = vector.shape_cast %84 : vector<1x2x192xf32> to vector<2x192xf32>
    %86 = vector.shape_cast %26 : vector<1x192xi1> to vector<1x192xi1>
    %87 = vector.broadcast %86 : vector<1x192xi1> to vector<2x192xi1>
    %88 = arith.select %87, %83, %85 : vector<2x192xi1>, vector<2x192xf32>
    %89 = arith.truncf %88 : vector<2x192xf32> to vector<2x192xbf16>
    %c5 = arith.constant 5 : index
    %c0_20 = arith.constant 0 : index
    %c0_21 = arith.constant 0 : index
    %90 = vector.load %arg13[%c5, %c0_20, %c0_21] : memref<8x2x192xbf16, #tpu.memory_space<vmem>>, vector<1x2x192xbf16>
    %91 = vector.shape_cast %90 : vector<1x2x192xbf16> to vector<2x192xbf16>
    %92 = vector.shape_cast %89 : vector<2x192xbf16> to vector<1x2x192xbf16>
    tpu.vector_store %arg13[%c5, %c0_20, %c0_21], %92 {strides = array<i32>} : memref<8x2x192xbf16, #tpu.memory_space<vmem>>, vector<1x2x192xbf16>,
    %93 = vector.extract_strided_slice %7 {offsets = [6, 0, 0], sizes = [1, 2, 192], strides = [1, 1, 1]} : vector<8x2x192xf32> to vector<1x2x192xf32>
    %94 = vector.shape_cast %93 : vector<1x2x192xf32> to vector<2x192xf32>
    %95 = vector.extract_strided_slice %7 {offsets = [1, 0, 0], sizes = [1, 2, 192], strides = [1, 1, 1]} : vector<8x2x192xf32> to vector<1x2x192xf32>
    %96 = vector.shape_cast %95 : vector<1x2x192xf32> to vector<2x192xf32>
    %97 = vector.shape_cast %26 : vector<1x192xi1> to vector<1x192xi1>
    %98 = vector.broadcast %97 : vector<1x192xi1> to vector<2x192xi1>
    %99 = arith.select %98, %94, %96 : vector<2x192xi1>, vector<2x192xf32>
    %100 = arith.truncf %99 : vector<2x192xf32> to vector<2x192xbf16>
    %c6 = arith.constant 6 : index
    %c0_22 = arith.constant 0 : index
    %c0_23 = arith.constant 0 : index
    %101 = vector.load %arg13[%c6, %c0_22, %c0_23] : memref<8x2x192xbf16, #tpu.memory_space<vmem>>, vector<1x2x192xbf16>
    %102 = vector.shape_cast %101 : vector<1x2x192xbf16> to vector<2x192xbf16>
    %103 = vector.shape_cast %100 : vector<2x192xbf16> to vector<1x2x192xbf16>
    tpu.vector_store %arg13[%c6, %c0_22, %c0_23], %103 {strides = array<i32>} : memref<8x2x192xbf16, #tpu.memory_space<vmem>>, vector<1x2x192xbf16>,
    %104 = vector.extract_strided_slice %7 {offsets = [7, 0, 0], sizes = [1, 2, 192], strides = [1, 1, 1]} : vector<8x2x192xf32> to vector<1x2x192xf32>
    %105 = vector.shape_cast %104 : vector<1x2x192xf32> to vector<2x192xf32>
    %106 = vector.extract_strided_slice %7 {offsets = [0, 0, 0], sizes = [1, 2, 192], strides = [1, 1, 1]} : vector<8x2x192xf32> to vector<1x2x192xf32>
    %107 = vector.shape_cast %106 : vector<1x2x192xf32> to vector<2x192xf32>
    %108 = vector.shape_cast %26 : vector<1x192xi1> to vector<1x192xi1>
    %109 = vector.broadcast %108 : vector<1x192xi1> to vector<2x192xi1>
    %110 = arith.select %109, %105, %107 : vector<2x192xi1>, vector<2x192xf32>
    %111 = arith.truncf %110 : vector<2x192xf32> to vector<2x192xbf16>
    %c7 = arith.constant 7 : index
    %c0_24 = arith.constant 0 : index
    %c0_25 = arith.constant 0 : index
    %112 = vector.load %arg13[%c7, %c0_24, %c0_25] : memref<8x2x192xbf16, #tpu.memory_space<vmem>>, vector<1x2x192xbf16>
    %113 = vector.shape_cast %112 : vector<1x2x192xbf16> to vector<2x192xbf16>
    %114 = vector.shape_cast %111 : vector<2x192xbf16> to vector<1x2x192xbf16>
    tpu.vector_store %arg13[%c7, %c0_24, %c0_25], %114 {strides = array<i32>} : memref<8x2x192xbf16, #tpu.memory_space<vmem>>, vector<1x2x192xbf16>,
    %c0_26 = arith.constant 0 : index
    %c0_27 = arith.constant 0 : index
    %115 = vector.load %arg4[%c0_26, %c0_27] : memref<64x192xbf16, #tpu.memory_space<vmem>>, vector<64x192xbf16>
    %c0_28 = arith.constant 0 : index
    %c0_29 = arith.constant 0 : index
    %116 = vector.load %arg5[%c0_28, %c0_29] : memref<1x64xf32, #tpu.memory_space<vmem>>, vector<1x64xf32>
    %117 = vector.shape_cast %116 : vector<1x64xf32> to vector<1x64xf32>
    %118 = vector.broadcast %117 : vector<1x64xf32> to vector<2x64xf32>
    %cst_30 = arith.constant 0.000000e+00 : f32
    %119 = vector.broadcast %cst_30 : f32 to vector<2x64xf32>
    %c0_i32_31 = arith.constant 0 : i32
    %120 = arith.index_cast %c0_i32_31 : i32 to index
    %c0_32 = arith.constant 0 : index
    %c0_33 = arith.constant 0 : index
    %121 = vector.load %arg13[%120, %c0_32, %c0_33] : memref<8x2x192xbf16, #tpu.memory_space<vmem>>, vector<1x2x192xbf16>
    %122 = vector.shape_cast %121 : vector<1x2x192xbf16> to vector<2x192xbf16>
    %123 = arith.extf %122 : vector<2x192xbf16> to vector<2x192xf32>
    %124 = arith.truncf %119 : vector<2x64xf32> to vector<2x64xbf16>
    %cst_34 = arith.constant dense<0.000000e+00> : vector<2x192xf32>
    %125 = tpu.matmul %124, %115, %cst_34 {dimension_numbers = #tpu.dot_dimension_numbers<[1], [0], [0], [1], [0, 0, 1, 1], [], []>} : vector<2x64xbf16>, vector<64x192xbf16>, vector<2x192xf32> -> vector<2x192xf32>
    %126 = vector.extract_strided_slice %123 {offsets = [0, 0], sizes = [2, 128], strides = [1, 1]} : vector<2x192xf32> to vector<2x128xf32>
    %127 = vector.extract_strided_slice %125 {offsets = [0, 0], sizes = [2, 128], strides = [1, 1]} : vector<2x192xf32> to vector<2x128xf32>
    %128 = arith.addf %126, %127 : vector<2x128xf32>
    %129 = arith.negf %128 : vector<2x128xf32>
    %130 = math.exp %129 : vector<2x128xf32>
    %cst_35 = arith.constant 1.000000e+00 : f32
    %131 = vector.broadcast %cst_35 : f32 to vector<2x128xf32>
    %132 = arith.addf %131, %130 : vector<2x128xf32>
    %133 = arith.divf %131, %132 : vector<2x128xf32>
    %134 = vector.extract_strided_slice %133 {offsets = [0, 0], sizes = [2, 64], strides = [1, 1]} : vector<2x128xf32> to vector<2x64xf32>
    %135 = vector.extract_strided_slice %133 {offsets = [0, 64], sizes = [2, 64], strides = [1, 1]} : vector<2x128xf32> to vector<2x64xf32>
    %136 = vector.extract_strided_slice %123 {offsets = [0, 128], sizes = [2, 64], strides = [1, 1]} : vector<2x192xf32> to vector<2x64xf32>
    %137 = vector.extract_strided_slice %125 {offsets = [0, 128], sizes = [2, 64], strides = [1, 1]} : vector<2x192xf32> to vector<2x64xf32>
    %138 = arith.addf %137, %118 : vector<2x64xf32>
    %139 = arith.mulf %134, %138 : vector<2x64xf32>
    %140 = arith.addf %136, %139 : vector<2x64xf32>
    %141 = math.tanh %140 : vector<2x64xf32>
    %cst_36 = arith.constant 1.000000e+00 : f32
    %142 = vector.broadcast %cst_36 : f32 to vector<2x64xf32>
    %143 = arith.subf %142, %135 : vector<2x64xf32>
    %144 = arith.mulf %143, %141 : vector<2x64xf32>
    %145 = arith.mulf %135, %119 : vector<2x64xf32>
    %146 = arith.addf %144, %145 : vector<2x64xf32>
    %147 = arith.index_cast %c0_i32_31 : i32 to index
    %c0_37 = arith.constant 0 : index
    %c0_38 = arith.constant 0 : index
    %148 = vector.load %arg14[%147, %c0_37, %c0_38] : memref<8x2x64xf32, #tpu.memory_space<vmem>>, vector<1x2x64xf32>
    %149 = vector.shape_cast %148 : vector<1x2x64xf32> to vector<2x64xf32>
    %150 = vector.shape_cast %146 : vector<2x64xf32> to vector<1x2x64xf32>
    tpu.vector_store %arg14[%147, %c0_37, %c0_38], %150 {strides = array<i32>} : memref<8x2x64xf32, #tpu.memory_space<vmem>>, vector<1x2x64xf32>,
    %c1_i32_39 = arith.constant 1 : i32
    %151 = arith.index_cast %c1_i32_39 : i32 to index
    %c0_40 = arith.constant 0 : index
    %c0_41 = arith.constant 0 : index
    %152 = vector.load %arg13[%151, %c0_40, %c0_41] : memref<8x2x192xbf16, #tpu.memory_space<vmem>>, vector<1x2x192xbf16>
    %153 = vector.shape_cast %152 : vector<1x2x192xbf16> to vector<2x192xbf16>
    %154 = arith.extf %153 : vector<2x192xbf16> to vector<2x192xf32>
    %155 = arith.truncf %146 : vector<2x64xf32> to vector<2x64xbf16>
    %cst_42 = arith.constant dense<0.000000e+00> : vector<2x192xf32>
    %156 = tpu.matmul %155, %115, %cst_42 {dimension_numbers = #tpu.dot_dimension_numbers<[1], [0], [0], [1], [0, 0, 1, 1], [], []>} : vector<2x64xbf16>, vector<64x192xbf16>, vector<2x192xf32> -> vector<2x192xf32>
    %157 = vector.extract_strided_slice %154 {offsets = [0, 0], sizes = [2, 128], strides = [1, 1]} : vector<2x192xf32> to vector<2x128xf32>
    %158 = vector.extract_strided_slice %156 {offsets = [0, 0], sizes = [2, 128], strides = [1, 1]} : vector<2x192xf32> to vector<2x128xf32>
    %159 = arith.addf %157, %158 : vector<2x128xf32>
    %160 = arith.negf %159 : vector<2x128xf32>
    %161 = math.exp %160 : vector<2x128xf32>
    %cst_43 = arith.constant 1.000000e+00 : f32
    %162 = vector.broadcast %cst_43 : f32 to vector<2x128xf32>
    %163 = arith.addf %162, %161 : vector<2x128xf32>
    %164 = arith.divf %162, %163 : vector<2x128xf32>
    %165 = vector.extract_strided_slice %164 {offsets = [0, 0], sizes = [2, 64], strides = [1, 1]} : vector<2x128xf32> to vector<2x64xf32>
    %166 = vector.extract_strided_slice %164 {offsets = [0, 64], sizes = [2, 64], strides = [1, 1]} : vector<2x128xf32> to vector<2x64xf32>
    %167 = vector.extract_strided_slice %154 {offsets = [0, 128], sizes = [2, 64], strides = [1, 1]} : vector<2x192xf32> to vector<2x64xf32>
    %168 = vector.extract_strided_slice %156 {offsets = [0, 128], sizes = [2, 64], strides = [1, 1]} : vector<2x192xf32> to vector<2x64xf32>
    %169 = arith.addf %168, %118 : vector<2x64xf32>
    %170 = arith.mulf %165, %169 : vector<2x64xf32>
    %171 = arith.addf %167, %170 : vector<2x64xf32>
    %172 = math.tanh %171 : vector<2x64xf32>
    %cst_44 = arith.constant 1.000000e+00 : f32
    %173 = vector.broadcast %cst_44 : f32 to vector<2x64xf32>
    %174 = arith.subf %173, %166 : vector<2x64xf32>
    %175 = arith.mulf %174, %172 : vector<2x64xf32>
    %176 = arith.mulf %166, %146 : vector<2x64xf32>
    %177 = arith.addf %175, %176 : vector<2x64xf32>
    %178 = arith.index_cast %c1_i32_39 : i32 to index
    %c0_45 = arith.constant 0 : index
    %c0_46 = arith.constant 0 : index
    %179 = vector.load %arg14[%178, %c0_45, %c0_46] : memref<8x2x64xf32, #tpu.memory_space<vmem>>, vector<1x2x64xf32>
    %180 = vector.shape_cast %179 : vector<1x2x64xf32> to vector<2x64xf32>
    %181 = vector.shape_cast %177 : vector<2x64xf32> to vector<1x2x64xf32>
    tpu.vector_store %arg14[%178, %c0_45, %c0_46], %181 {strides = array<i32>} : memref<8x2x64xf32, #tpu.memory_space<vmem>>, vector<1x2x64xf32>,
    %c2_i32 = arith.constant 2 : i32
    %182 = arith.index_cast %c2_i32 : i32 to index
    %c0_47 = arith.constant 0 : index
    %c0_48 = arith.constant 0 : index
    %183 = vector.load %arg13[%182, %c0_47, %c0_48] : memref<8x2x192xbf16, #tpu.memory_space<vmem>>, vector<1x2x192xbf16>
    %184 = vector.shape_cast %183 : vector<1x2x192xbf16> to vector<2x192xbf16>
    %185 = arith.extf %184 : vector<2x192xbf16> to vector<2x192xf32>
    %186 = arith.truncf %177 : vector<2x64xf32> to vector<2x64xbf16>
    %cst_49 = arith.constant dense<0.000000e+00> : vector<2x192xf32>
    %187 = tpu.matmul %186, %115, %cst_49 {dimension_numbers = #tpu.dot_dimension_numbers<[1], [0], [0], [1], [0, 0, 1, 1], [], []>} : vector<2x64xbf16>, vector<64x192xbf16>, vector<2x192xf32> -> vector<2x192xf32>
    %188 = vector.extract_strided_slice %185 {offsets = [0, 0], sizes = [2, 128], strides = [1, 1]} : vector<2x192xf32> to vector<2x128xf32>
    %189 = vector.extract_strided_slice %187 {offsets = [0, 0], sizes = [2, 128], strides = [1, 1]} : vector<2x192xf32> to vector<2x128xf32>
    %190 = arith.addf %188, %189 : vector<2x128xf32>
    %191 = arith.negf %190 : vector<2x128xf32>
    %192 = math.exp %191 : vector<2x128xf32>
    %cst_50 = arith.constant 1.000000e+00 : f32
    %193 = vector.broadcast %cst_50 : f32 to vector<2x128xf32>
    %194 = arith.addf %193, %192 : vector<2x128xf32>
    %195 = arith.divf %193, %194 : vector<2x128xf32>
    %196 = vector.extract_strided_slice %195 {offsets = [0, 0], sizes = [2, 64], strides = [1, 1]} : vector<2x128xf32> to vector<2x64xf32>
    %197 = vector.extract_strided_slice %195 {offsets = [0, 64], sizes = [2, 64], strides = [1, 1]} : vector<2x128xf32> to vector<2x64xf32>
    %198 = vector.extract_strided_slice %185 {offsets = [0, 128], sizes = [2, 64], strides = [1, 1]} : vector<2x192xf32> to vector<2x64xf32>
    %199 = vector.extract_strided_slice %187 {offsets = [0, 128], sizes = [2, 64], strides = [1, 1]} : vector<2x192xf32> to vector<2x64xf32>
    %200 = arith.addf %199, %118 : vector<2x64xf32>
    %201 = arith.mulf %196, %200 : vector<2x64xf32>
    %202 = arith.addf %198, %201 : vector<2x64xf32>
    %203 = math.tanh %202 : vector<2x64xf32>
    %cst_51 = arith.constant 1.000000e+00 : f32
    %204 = vector.broadcast %cst_51 : f32 to vector<2x64xf32>
    %205 = arith.subf %204, %197 : vector<2x64xf32>
    %206 = arith.mulf %205, %203 : vector<2x64xf32>
    %207 = arith.mulf %197, %177 : vector<2x64xf32>
    %208 = arith.addf %206, %207 : vector<2x64xf32>
    %209 = arith.index_cast %c2_i32 : i32 to index
    %c0_52 = arith.constant 0 : index
    %c0_53 = arith.constant 0 : index
    %210 = vector.load %arg14[%209, %c0_52, %c0_53] : memref<8x2x64xf32, #tpu.memory_space<vmem>>, vector<1x2x64xf32>
    %211 = vector.shape_cast %210 : vector<1x2x64xf32> to vector<2x64xf32>
    %212 = vector.shape_cast %208 : vector<2x64xf32> to vector<1x2x64xf32>
    tpu.vector_store %arg14[%209, %c0_52, %c0_53], %212 {strides = array<i32>} : memref<8x2x64xf32, #tpu.memory_space<vmem>>, vector<1x2x64xf32>,
    %c3_i32 = arith.constant 3 : i32
    %213 = arith.index_cast %c3_i32 : i32 to index
    %c0_54 = arith.constant 0 : index
    %c0_55 = arith.constant 0 : index
    %214 = vector.load %arg13[%213, %c0_54, %c0_55] : memref<8x2x192xbf16, #tpu.memory_space<vmem>>, vector<1x2x192xbf16>
    %215 = vector.shape_cast %214 : vector<1x2x192xbf16> to vector<2x192xbf16>
    %216 = arith.extf %215 : vector<2x192xbf16> to vector<2x192xf32>
    %217 = arith.truncf %208 : vector<2x64xf32> to vector<2x64xbf16>
    %cst_56 = arith.constant dense<0.000000e+00> : vector<2x192xf32>
    %218 = tpu.matmul %217, %115, %cst_56 {dimension_numbers = #tpu.dot_dimension_numbers<[1], [0], [0], [1], [0, 0, 1, 1], [], []>} : vector<2x64xbf16>, vector<64x192xbf16>, vector<2x192xf32> -> vector<2x192xf32>
    %219 = vector.extract_strided_slice %216 {offsets = [0, 0], sizes = [2, 128], strides = [1, 1]} : vector<2x192xf32> to vector<2x128xf32>
    %220 = vector.extract_strided_slice %218 {offsets = [0, 0], sizes = [2, 128], strides = [1, 1]} : vector<2x192xf32> to vector<2x128xf32>
    %221 = arith.addf %219, %220 : vector<2x128xf32>
    %222 = arith.negf %221 : vector<2x128xf32>
    %223 = math.exp %222 : vector<2x128xf32>
    %cst_57 = arith.constant 1.000000e+00 : f32
    %224 = vector.broadcast %cst_57 : f32 to vector<2x128xf32>
    %225 = arith.addf %224, %223 : vector<2x128xf32>
    %226 = arith.divf %224, %225 : vector<2x128xf32>
    %227 = vector.extract_strided_slice %226 {offsets = [0, 0], sizes = [2, 64], strides = [1, 1]} : vector<2x128xf32> to vector<2x64xf32>
    %228 = vector.extract_strided_slice %226 {offsets = [0, 64], sizes = [2, 64], strides = [1, 1]} : vector<2x128xf32> to vector<2x64xf32>
    %229 = vector.extract_strided_slice %216 {offsets = [0, 128], sizes = [2, 64], strides = [1, 1]} : vector<2x192xf32> to vector<2x64xf32>
    %230 = vector.extract_strided_slice %218 {offsets = [0, 128], sizes = [2, 64], strides = [1, 1]} : vector<2x192xf32> to vector<2x64xf32>
    %231 = arith.addf %230, %118 : vector<2x64xf32>
    %232 = arith.mulf %227, %231 : vector<2x64xf32>
    %233 = arith.addf %229, %232 : vector<2x64xf32>
    %234 = math.tanh %233 : vector<2x64xf32>
    %cst_58 = arith.constant 1.000000e+00 : f32
    %235 = vector.broadcast %cst_58 : f32 to vector<2x64xf32>
    %236 = arith.subf %235, %228 : vector<2x64xf32>
    %237 = arith.mulf %236, %234 : vector<2x64xf32>
    %238 = arith.mulf %228, %208 : vector<2x64xf32>
    %239 = arith.addf %237, %238 : vector<2x64xf32>
    %240 = arith.index_cast %c3_i32 : i32 to index
    %c0_59 = arith.constant 0 : index
    %c0_60 = arith.constant 0 : index
    %241 = vector.load %arg14[%240, %c0_59, %c0_60] : memref<8x2x64xf32, #tpu.memory_space<vmem>>, vector<1x2x64xf32>
    %242 = vector.shape_cast %241 : vector<1x2x64xf32> to vector<2x64xf32>
    %243 = vector.shape_cast %239 : vector<2x64xf32> to vector<1x2x64xf32>
    tpu.vector_store %arg14[%240, %c0_59, %c0_60], %243 {strides = array<i32>} : memref<8x2x64xf32, #tpu.memory_space<vmem>>, vector<1x2x64xf32>,
    %c4_i32 = arith.constant 4 : i32
    %244 = arith.index_cast %c4_i32 : i32 to index
    %c0_61 = arith.constant 0 : index
    %c0_62 = arith.constant 0 : index
    %245 = vector.load %arg13[%244, %c0_61, %c0_62] : memref<8x2x192xbf16, #tpu.memory_space<vmem>>, vector<1x2x192xbf16>
    %246 = vector.shape_cast %245 : vector<1x2x192xbf16> to vector<2x192xbf16>
    %247 = arith.extf %246 : vector<2x192xbf16> to vector<2x192xf32>
    %248 = arith.truncf %239 : vector<2x64xf32> to vector<2x64xbf16>
    %cst_63 = arith.constant dense<0.000000e+00> : vector<2x192xf32>
    %249 = tpu.matmul %248, %115, %cst_63 {dimension_numbers = #tpu.dot_dimension_numbers<[1], [0], [0], [1], [0, 0, 1, 1], [], []>} : vector<2x64xbf16>, vector<64x192xbf16>, vector<2x192xf32> -> vector<2x192xf32>
    %250 = vector.extract_strided_slice %247 {offsets = [0, 0], sizes = [2, 128], strides = [1, 1]} : vector<2x192xf32> to vector<2x128xf32>
    %251 = vector.extract_strided_slice %249 {offsets = [0, 0], sizes = [2, 128], strides = [1, 1]} : vector<2x192xf32> to vector<2x128xf32>
    %252 = arith.addf %250, %251 : vector<2x128xf32>
    %253 = arith.negf %252 : vector<2x128xf32>
    %254 = math.exp %253 : vector<2x128xf32>
    %cst_64 = arith.constant 1.000000e+00 : f32
    %255 = vector.broadcast %cst_64 : f32 to vector<2x128xf32>
    %256 = arith.addf %255, %254 : vector<2x128xf32>
    %257 = arith.divf %255, %256 : vector<2x128xf32>
    %258 = vector.extract_strided_slice %257 {offsets = [0, 0], sizes = [2, 64], strides = [1, 1]} : vector<2x128xf32> to vector<2x64xf32>
    %259 = vector.extract_strided_slice %257 {offsets = [0, 64], sizes = [2, 64], strides = [1, 1]} : vector<2x128xf32> to vector<2x64xf32>
    %260 = vector.extract_strided_slice %247 {offsets = [0, 128], sizes = [2, 64], strides = [1, 1]} : vector<2x192xf32> to vector<2x64xf32>
    %261 = vector.extract_strided_slice %249 {offsets = [0, 128], sizes = [2, 64], strides = [1, 1]} : vector<2x192xf32> to vector<2x64xf32>
    %262 = arith.addf %261, %118 : vector<2x64xf32>
    %263 = arith.mulf %258, %262 : vector<2x64xf32>
    %264 = arith.addf %260, %263 : vector<2x64xf32>
    %265 = math.tanh %264 : vector<2x64xf32>
    %cst_65 = arith.constant 1.000000e+00 : f32
    %266 = vector.broadcast %cst_65 : f32 to vector<2x64xf32>
    %267 = arith.subf %266, %259 : vector<2x64xf32>
    %268 = arith.mulf %267, %265 : vector<2x64xf32>
    %269 = arith.mulf %259, %239 : vector<2x64xf32>
    %270 = arith.addf %268, %269 : vector<2x64xf32>
    %271 = arith.index_cast %c4_i32 : i32 to index
    %c0_66 = arith.constant 0 : index
    %c0_67 = arith.constant 0 : index
    %272 = vector.load %arg14[%271, %c0_66, %c0_67] : memref<8x2x64xf32, #tpu.memory_space<vmem>>, vector<1x2x64xf32>
    %273 = vector.shape_cast %272 : vector<1x2x64xf32> to vector<2x64xf32>
    %274 = vector.shape_cast %270 : vector<2x64xf32> to vector<1x2x64xf32>
    tpu.vector_store %arg14[%271, %c0_66, %c0_67], %274 {strides = array<i32>} : memref<8x2x64xf32, #tpu.memory_space<vmem>>, vector<1x2x64xf32>,
    %c5_i32 = arith.constant 5 : i32
    %275 = arith.index_cast %c5_i32 : i32 to index
    %c0_68 = arith.constant 0 : index
    %c0_69 = arith.constant 0 : index
    %276 = vector.load %arg13[%275, %c0_68, %c0_69] : memref<8x2x192xbf16, #tpu.memory_space<vmem>>, vector<1x2x192xbf16>
    %277 = vector.shape_cast %276 : vector<1x2x192xbf16> to vector<2x192xbf16>
    %278 = arith.extf %277 : vector<2x192xbf16> to vector<2x192xf32>
    %279 = arith.truncf %270 : vector<2x64xf32> to vector<2x64xbf16>
    %cst_70 = arith.constant dense<0.000000e+00> : vector<2x192xf32>
    %280 = tpu.matmul %279, %115, %cst_70 {dimension_numbers = #tpu.dot_dimension_numbers<[1], [0], [0], [1], [0, 0, 1, 1], [], []>} : vector<2x64xbf16>, vector<64x192xbf16>, vector<2x192xf32> -> vector<2x192xf32>
    %281 = vector.extract_strided_slice %278 {offsets = [0, 0], sizes = [2, 128], strides = [1, 1]} : vector<2x192xf32> to vector<2x128xf32>
    %282 = vector.extract_strided_slice %280 {offsets = [0, 0], sizes = [2, 128], strides = [1, 1]} : vector<2x192xf32> to vector<2x128xf32>
    %283 = arith.addf %281, %282 : vector<2x128xf32>
    %284 = arith.negf %283 : vector<2x128xf32>
    %285 = math.exp %284 : vector<2x128xf32>
    %cst_71 = arith.constant 1.000000e+00 : f32
    %286 = vector.broadcast %cst_71 : f32 to vector<2x128xf32>
    %287 = arith.addf %286, %285 : vector<2x128xf32>
    %288 = arith.divf %286, %287 : vector<2x128xf32>
    %289 = vector.extract_strided_slice %288 {offsets = [0, 0], sizes = [2, 64], strides = [1, 1]} : vector<2x128xf32> to vector<2x64xf32>
    %290 = vector.extract_strided_slice %288 {offsets = [0, 64], sizes = [2, 64], strides = [1, 1]} : vector<2x128xf32> to vector<2x64xf32>
    %291 = vector.extract_strided_slice %278 {offsets = [0, 128], sizes = [2, 64], strides = [1, 1]} : vector<2x192xf32> to vector<2x64xf32>
    %292 = vector.extract_strided_slice %280 {offsets = [0, 128], sizes = [2, 64], strides = [1, 1]} : vector<2x192xf32> to vector<2x64xf32>
    %293 = arith.addf %292, %118 : vector<2x64xf32>
    %294 = arith.mulf %289, %293 : vector<2x64xf32>
    %295 = arith.addf %291, %294 : vector<2x64xf32>
    %296 = math.tanh %295 : vector<2x64xf32>
    %cst_72 = arith.constant 1.000000e+00 : f32
    %297 = vector.broadcast %cst_72 : f32 to vector<2x64xf32>
    %298 = arith.subf %297, %290 : vector<2x64xf32>
    %299 = arith.mulf %298, %296 : vector<2x64xf32>
    %300 = arith.mulf %290, %270 : vector<2x64xf32>
    %301 = arith.addf %299, %300 : vector<2x64xf32>
    %302 = arith.index_cast %c5_i32 : i32 to index
    %c0_73 = arith.constant 0 : index
    %c0_74 = arith.constant 0 : index
    %303 = vector.load %arg14[%302, %c0_73, %c0_74] : memref<8x2x64xf32, #tpu.memory_space<vmem>>, vector<1x2x64xf32>
    %304 = vector.shape_cast %303 : vector<1x2x64xf32> to vector<2x64xf32>
    %305 = vector.shape_cast %301 : vector<2x64xf32> to vector<1x2x64xf32>
    tpu.vector_store %arg14[%302, %c0_73, %c0_74], %305 {strides = array<i32>} : memref<8x2x64xf32, #tpu.memory_space<vmem>>, vector<1x2x64xf32>,
    %c6_i32 = arith.constant 6 : i32
    %306 = arith.index_cast %c6_i32 : i32 to index
    %c0_75 = arith.constant 0 : index
    %c0_76 = arith.constant 0 : index
    %307 = vector.load %arg13[%306, %c0_75, %c0_76] : memref<8x2x192xbf16, #tpu.memory_space<vmem>>, vector<1x2x192xbf16>
    %308 = vector.shape_cast %307 : vector<1x2x192xbf16> to vector<2x192xbf16>
    %309 = arith.extf %308 : vector<2x192xbf16> to vector<2x192xf32>
    %310 = arith.truncf %301 : vector<2x64xf32> to vector<2x64xbf16>
    %cst_77 = arith.constant dense<0.000000e+00> : vector<2x192xf32>
    %311 = tpu.matmul %310, %115, %cst_77 {dimension_numbers = #tpu.dot_dimension_numbers<[1], [0], [0], [1], [0, 0, 1, 1], [], []>} : vector<2x64xbf16>, vector<64x192xbf16>, vector<2x192xf32> -> vector<2x192xf32>
    %312 = vector.extract_strided_slice %309 {offsets = [0, 0], sizes = [2, 128], strides = [1, 1]} : vector<2x192xf32> to vector<2x128xf32>
    %313 = vector.extract_strided_slice %311 {offsets = [0, 0], sizes = [2, 128], strides = [1, 1]} : vector<2x192xf32> to vector<2x128xf32>
    %314 = arith.addf %312, %313 : vector<2x128xf32>
    %315 = arith.negf %314 : vector<2x128xf32>
    %316 = math.exp %315 : vector<2x128xf32>
    %cst_78 = arith.constant 1.000000e+00 : f32
    %317 = vector.broadcast %cst_78 : f32 to vector<2x128xf32>
    %318 = arith.addf %317, %316 : vector<2x128xf32>
    %319 = arith.divf %317, %318 : vector<2x128xf32>
    %320 = vector.extract_strided_slice %319 {offsets = [0, 0], sizes = [2, 64], strides = [1, 1]} : vector<2x128xf32> to vector<2x64xf32>
    %321 = vector.extract_strided_slice %319 {offsets = [0, 64], sizes = [2, 64], strides = [1, 1]} : vector<2x128xf32> to vector<2x64xf32>
    %322 = vector.extract_strided_slice %309 {offsets = [0, 128], sizes = [2, 64], strides = [1, 1]} : vector<2x192xf32> to vector<2x64xf32>
    %323 = vector.extract_strided_slice %311 {offsets = [0, 128], sizes = [2, 64], strides = [1, 1]} : vector<2x192xf32> to vector<2x64xf32>
    %324 = arith.addf %323, %118 : vector<2x64xf32>
    %325 = arith.mulf %320, %324 : vector<2x64xf32>
    %326 = arith.addf %322, %325 : vector<2x64xf32>
    %327 = math.tanh %326 : vector<2x64xf32>
    %cst_79 = arith.constant 1.000000e+00 : f32
    %328 = vector.broadcast %cst_79 : f32 to vector<2x64xf32>
    %329 = arith.subf %328, %321 : vector<2x64xf32>
    %330 = arith.mulf %329, %327 : vector<2x64xf32>
    %331 = arith.mulf %321, %301 : vector<2x64xf32>
    %332 = arith.addf %330, %331 : vector<2x64xf32>
    %333 = arith.index_cast %c6_i32 : i32 to index
    %c0_80 = arith.constant 0 : index
    %c0_81 = arith.constant 0 : index
    %334 = vector.load %arg14[%333, %c0_80, %c0_81] : memref<8x2x64xf32, #tpu.memory_space<vmem>>, vector<1x2x64xf32>
    %335 = vector.shape_cast %334 : vector<1x2x64xf32> to vector<2x64xf32>
    %336 = vector.shape_cast %332 : vector<2x64xf32> to vector<1x2x64xf32>
    tpu.vector_store %arg14[%333, %c0_80, %c0_81], %336 {strides = array<i32>} : memref<8x2x64xf32, #tpu.memory_space<vmem>>, vector<1x2x64xf32>,
    %c7_i32 = arith.constant 7 : i32
    %337 = arith.index_cast %c7_i32 : i32 to index
    %c0_82 = arith.constant 0 : index
    %c0_83 = arith.constant 0 : index
    %338 = vector.load %arg13[%337, %c0_82, %c0_83] : memref<8x2x192xbf16, #tpu.memory_space<vmem>>, vector<1x2x192xbf16>
    %339 = vector.shape_cast %338 : vector<1x2x192xbf16> to vector<2x192xbf16>
    %340 = arith.extf %339 : vector<2x192xbf16> to vector<2x192xf32>
    %341 = arith.truncf %332 : vector<2x64xf32> to vector<2x64xbf16>
    %cst_84 = arith.constant dense<0.000000e+00> : vector<2x192xf32>
    %342 = tpu.matmul %341, %115, %cst_84 {dimension_numbers = #tpu.dot_dimension_numbers<[1], [0], [0], [1], [0, 0, 1, 1], [], []>} : vector<2x64xbf16>, vector<64x192xbf16>, vector<2x192xf32> -> vector<2x192xf32>
    %343 = vector.extract_strided_slice %340 {offsets = [0, 0], sizes = [2, 128], strides = [1, 1]} : vector<2x192xf32> to vector<2x128xf32>
    %344 = vector.extract_strided_slice %342 {offsets = [0, 0], sizes = [2, 128], strides = [1, 1]} : vector<2x192xf32> to vector<2x128xf32>
    %345 = arith.addf %343, %344 : vector<2x128xf32>
    %346 = arith.negf %345 : vector<2x128xf32>
    %347 = math.exp %346 : vector<2x128xf32>
    %cst_85 = arith.constant 1.000000e+00 : f32
    %348 = vector.broadcast %cst_85 : f32 to vector<2x128xf32>
    %349 = arith.addf %348, %347 : vector<2x128xf32>
    %350 = arith.divf %348, %349 : vector<2x128xf32>
    %351 = vector.extract_strided_slice %350 {offsets = [0, 0], sizes = [2, 64], strides = [1, 1]} : vector<2x128xf32> to vector<2x64xf32>
    %352 = vector.extract_strided_slice %350 {offsets = [0, 64], sizes = [2, 64], strides = [1, 1]} : vector<2x128xf32> to vector<2x64xf32>
    %353 = vector.extract_strided_slice %340 {offsets = [0, 128], sizes = [2, 64], strides = [1, 1]} : vector<2x192xf32> to vector<2x64xf32>
    %354 = vector.extract_strided_slice %342 {offsets = [0, 128], sizes = [2, 64], strides = [1, 1]} : vector<2x192xf32> to vector<2x64xf32>
    %355 = arith.addf %354, %118 : vector<2x64xf32>
    %356 = arith.mulf %351, %355 : vector<2x64xf32>
    %357 = arith.addf %353, %356 : vector<2x64xf32>
    %358 = math.tanh %357 : vector<2x64xf32>
    %cst_86 = arith.constant 1.000000e+00 : f32
    %359 = vector.broadcast %cst_86 : f32 to vector<2x64xf32>
    %360 = arith.subf %359, %352 : vector<2x64xf32>
    %361 = arith.mulf %360, %358 : vector<2x64xf32>
    %362 = arith.mulf %352, %332 : vector<2x64xf32>
    %363 = arith.addf %361, %362 : vector<2x64xf32>
    %364 = arith.index_cast %c7_i32 : i32 to index
    %c0_87 = arith.constant 0 : index
    %c0_88 = arith.constant 0 : index
    %365 = vector.load %arg14[%364, %c0_87, %c0_88] : memref<8x2x64xf32, #tpu.memory_space<vmem>>, vector<1x2x64xf32>
    %366 = vector.shape_cast %365 : vector<1x2x64xf32> to vector<2x64xf32>
    %367 = vector.shape_cast %363 : vector<2x64xf32> to vector<1x2x64xf32>
    tpu.vector_store %arg14[%364, %c0_87, %c0_88], %367 {strides = array<i32>} : memref<8x2x64xf32, #tpu.memory_space<vmem>>, vector<1x2x64xf32>,
    %c8_i32 = arith.constant 8 : i32
    %368 = tpu.iota {dimensions = array<i32: 1>} : vector<1x64xi32>
    %c32_i32_89 = arith.constant 32 : i32
    %369 = vector.broadcast %c32_i32_89 : i32 to vector<1x64xi32>
    %370 = arith.cmpi slt, %368, %369 : vector<1x64xi32>
    %c0_90 = arith.constant 0 : index
    %c0_91 = arith.constant 0 : index
    %c0_92 = arith.constant 0 : index
    %371 = vector.load %arg14[%c0_90, %c0_91, %c0_92] : memref<8x2x64xf32, #tpu.memory_space<vmem>>, vector<1x2x64xf32>
    %372 = vector.shape_cast %371 : vector<1x2x64xf32> to vector<2x64xf32>
    %c7_93 = arith.constant 7 : index
    %c0_94 = arith.constant 0 : index
    %c0_95 = arith.constant 0 : index
    %373 = vector.load %arg14[%c7_93, %c0_94, %c0_95] : memref<8x2x64xf32, #tpu.memory_space<vmem>>, vector<1x2x64xf32>
    %374 = vector.shape_cast %373 : vector<1x2x64xf32> to vector<2x64xf32>
    %375 = vector.shape_cast %370 : vector<1x64xi1> to vector<1x64xi1>
    %376 = vector.broadcast %375 : vector<1x64xi1> to vector<2x64xi1>
    %377 = arith.select %376, %372, %374 : vector<2x64xi1>, vector<2x64xf32>
    %c0_96 = arith.constant 0 : index
    %c0_97 = arith.constant 0 : index
    %c0_98 = arith.constant 0 : index
    %378 = vector.load %arg14[%c0_96, %c0_97, %c0_98] : memref<8x2x64xf32, #tpu.memory_space<vmem>>, vector<1x2x64xf32>
    %379 = vector.shape_cast %378 : vector<1x2x64xf32> to vector<2x64xf32>
    %380 = vector.shape_cast %377 : vector<2x64xf32> to vector<1x2x64xf32>
    tpu.vector_store %arg14[%c0_96, %c0_97, %c0_98], %380 {strides = array<i32>} : memref<8x2x64xf32, #tpu.memory_space<vmem>>, vector<1x2x64xf32>,
    %381 = vector.shape_cast %370 : vector<1x64xi1> to vector<1x64xi1>
    %382 = vector.broadcast %381 : vector<1x64xi1> to vector<2x64xi1>
    %383 = arith.select %382, %374, %372 : vector<2x64xi1>, vector<2x64xf32>
    %c7_99 = arith.constant 7 : index
    %c0_100 = arith.constant 0 : index
    %c0_101 = arith.constant 0 : index
    %384 = vector.load %arg14[%c7_99, %c0_100, %c0_101] : memref<8x2x64xf32, #tpu.memory_space<vmem>>, vector<1x2x64xf32>
    %385 = vector.shape_cast %384 : vector<1x2x64xf32> to vector<2x64xf32>
    %386 = vector.shape_cast %383 : vector<2x64xf32> to vector<1x2x64xf32>
    tpu.vector_store %arg14[%c7_99, %c0_100, %c0_101], %386 {strides = array<i32>} : memref<8x2x64xf32, #tpu.memory_space<vmem>>, vector<1x2x64xf32>,
    %c1_102 = arith.constant 1 : index
    %c0_103 = arith.constant 0 : index
    %c0_104 = arith.constant 0 : index
    %387 = vector.load %arg14[%c1_102, %c0_103, %c0_104] : memref<8x2x64xf32, #tpu.memory_space<vmem>>, vector<1x2x64xf32>
    %388 = vector.shape_cast %387 : vector<1x2x64xf32> to vector<2x64xf32>
    %c6_105 = arith.constant 6 : index
    %c0_106 = arith.constant 0 : index
    %c0_107 = arith.constant 0 : index
    %389 = vector.load %arg14[%c6_105, %c0_106, %c0_107] : memref<8x2x64xf32, #tpu.memory_space<vmem>>, vector<1x2x64xf32>
    %390 = vector.shape_cast %389 : vector<1x2x64xf32> to vector<2x64xf32>
    %391 = vector.shape_cast %370 : vector<1x64xi1> to vector<1x64xi1>
    %392 = vector.broadcast %391 : vector<1x64xi1> to vector<2x64xi1>
    %393 = arith.select %392, %388, %390 : vector<2x64xi1>, vector<2x64xf32>
    %c1_108 = arith.constant 1 : index
    %c0_109 = arith.constant 0 : index
    %c0_110 = arith.constant 0 : index
    %394 = vector.load %arg14[%c1_108, %c0_109, %c0_110] : memref<8x2x64xf32, #tpu.memory_space<vmem>>, vector<1x2x64xf32>
    %395 = vector.shape_cast %394 : vector<1x2x64xf32> to vector<2x64xf32>
    %396 = vector.shape_cast %393 : vector<2x64xf32> to vector<1x2x64xf32>
    tpu.vector_store %arg14[%c1_108, %c0_109, %c0_110], %396 {strides = array<i32>} : memref<8x2x64xf32, #tpu.memory_space<vmem>>, vector<1x2x64xf32>,
    %397 = vector.shape_cast %370 : vector<1x64xi1> to vector<1x64xi1>
    %398 = vector.broadcast %397 : vector<1x64xi1> to vector<2x64xi1>
    %399 = arith.select %398, %390, %388 : vector<2x64xi1>, vector<2x64xf32>
    %c6_111 = arith.constant 6 : index
    %c0_112 = arith.constant 0 : index
    %c0_113 = arith.constant 0 : index
    %400 = vector.load %arg14[%c6_111, %c0_112, %c0_113] : memref<8x2x64xf32, #tpu.memory_space<vmem>>, vector<1x2x64xf32>
    %401 = vector.shape_cast %400 : vector<1x2x64xf32> to vector<2x64xf32>
    %402 = vector.shape_cast %399 : vector<2x64xf32> to vector<1x2x64xf32>
    tpu.vector_store %arg14[%c6_111, %c0_112, %c0_113], %402 {strides = array<i32>} : memref<8x2x64xf32, #tpu.memory_space<vmem>>, vector<1x2x64xf32>,
    %c2_114 = arith.constant 2 : index
    %c0_115 = arith.constant 0 : index
    %c0_116 = arith.constant 0 : index
    %403 = vector.load %arg14[%c2_114, %c0_115, %c0_116] : memref<8x2x64xf32, #tpu.memory_space<vmem>>, vector<1x2x64xf32>
    %404 = vector.shape_cast %403 : vector<1x2x64xf32> to vector<2x64xf32>
    %c5_117 = arith.constant 5 : index
    %c0_118 = arith.constant 0 : index
    %c0_119 = arith.constant 0 : index
    %405 = vector.load %arg14[%c5_117, %c0_118, %c0_119] : memref<8x2x64xf32, #tpu.memory_space<vmem>>, vector<1x2x64xf32>
    %406 = vector.shape_cast %405 : vector<1x2x64xf32> to vector<2x64xf32>
    %407 = vector.shape_cast %370 : vector<1x64xi1> to vector<1x64xi1>
    %408 = vector.broadcast %407 : vector<1x64xi1> to vector<2x64xi1>
    %409 = arith.select %408, %404, %406 : vector<2x64xi1>, vector<2x64xf32>
    %c2_120 = arith.constant 2 : index
    %c0_121 = arith.constant 0 : index
    %c0_122 = arith.constant 0 : index
    %410 = vector.load %arg14[%c2_120, %c0_121, %c0_122] : memref<8x2x64xf32, #tpu.memory_space<vmem>>, vector<1x2x64xf32>
    %411 = vector.shape_cast %410 : vector<1x2x64xf32> to vector<2x64xf32>
    %412 = vector.shape_cast %409 : vector<2x64xf32> to vector<1x2x64xf32>
    tpu.vector_store %arg14[%c2_120, %c0_121, %c0_122], %412 {strides = array<i32>} : memref<8x2x64xf32, #tpu.memory_space<vmem>>, vector<1x2x64xf32>,
    %413 = vector.shape_cast %370 : vector<1x64xi1> to vector<1x64xi1>
    %414 = vector.broadcast %413 : vector<1x64xi1> to vector<2x64xi1>
    %415 = arith.select %414, %406, %404 : vector<2x64xi1>, vector<2x64xf32>
    %c5_123 = arith.constant 5 : index
    %c0_124 = arith.constant 0 : index
    %c0_125 = arith.constant 0 : index
    %416 = vector.load %arg14[%c5_123, %c0_124, %c0_125] : memref<8x2x64xf32, #tpu.memory_space<vmem>>, vector<1x2x64xf32>
    %417 = vector.shape_cast %416 : vector<1x2x64xf32> to vector<2x64xf32>
    %418 = vector.shape_cast %415 : vector<2x64xf32> to vector<1x2x64xf32>
    tpu.vector_store %arg14[%c5_123, %c0_124, %c0_125], %418 {strides = array<i32>} : memref<8x2x64xf32, #tpu.memory_space<vmem>>, vector<1x2x64xf32>,
    %c3_126 = arith.constant 3 : index
    %c0_127 = arith.constant 0 : index
    %c0_128 = arith.constant 0 : index
    %419 = vector.load %arg14[%c3_126, %c0_127, %c0_128] : memref<8x2x64xf32, #tpu.memory_space<vmem>>, vector<1x2x64xf32>
    %420 = vector.shape_cast %419 : vector<1x2x64xf32> to vector<2x64xf32>
    %c4_129 = arith.constant 4 : index
    %c0_130 = arith.constant 0 : index
    %c0_131 = arith.constant 0 : index
    %421 = vector.load %arg14[%c4_129, %c0_130, %c0_131] : memref<8x2x64xf32, #tpu.memory_space<vmem>>, vector<1x2x64xf32>
    %422 = vector.shape_cast %421 : vector<1x2x64xf32> to vector<2x64xf32>
    %423 = vector.shape_cast %370 : vector<1x64xi1> to vector<1x64xi1>
    %424 = vector.broadcast %423 : vector<1x64xi1> to vector<2x64xi1>
    %425 = arith.select %424, %420, %422 : vector<2x64xi1>, vector<2x64xf32>
    %c3_132 = arith.constant 3 : index
    %c0_133 = arith.constant 0 : index
    %c0_134 = arith.constant 0 : index
    %426 = vector.load %arg14[%c3_132, %c0_133, %c0_134] : memref<8x2x64xf32, #tpu.memory_space<vmem>>, vector<1x2x64xf32>
    %427 = vector.shape_cast %426 : vector<1x2x64xf32> to vector<2x64xf32>
    %428 = vector.shape_cast %425 : vector<2x64xf32> to vector<1x2x64xf32>
    tpu.vector_store %arg14[%c3_132, %c0_133, %c0_134], %428 {strides = array<i32>} : memref<8x2x64xf32, #tpu.memory_space<vmem>>, vector<1x2x64xf32>,
    %429 = vector.shape_cast %370 : vector<1x64xi1> to vector<1x64xi1>
    %430 = vector.broadcast %429 : vector<1x64xi1> to vector<2x64xi1>
    %431 = arith.select %430, %422, %420 : vector<2x64xi1>, vector<2x64xf32>
    %c4_135 = arith.constant 4 : index
    %c0_136 = arith.constant 0 : index
    %c0_137 = arith.constant 0 : index
    %432 = vector.load %arg14[%c4_135, %c0_136, %c0_137] : memref<8x2x64xf32, #tpu.memory_space<vmem>>, vector<1x2x64xf32>
    %433 = vector.shape_cast %432 : vector<1x2x64xf32> to vector<2x64xf32>
    %434 = vector.shape_cast %431 : vector<2x64xf32> to vector<1x2x64xf32>
    tpu.vector_store %arg14[%c4_135, %c0_136, %c0_137], %434 {strides = array<i32>} : memref<8x2x64xf32, #tpu.memory_space<vmem>>, vector<1x2x64xf32>,
    %c0_138 = arith.constant 0 : index
    %c0_139 = arith.constant 0 : index
    %c0_140 = arith.constant 0 : index
    %435 = vector.load %arg14[%c0_138, %c0_139, %c0_140] : memref<8x2x64xf32, #tpu.memory_space<vmem>>, vector<8x2x64xf32>
    %c0_141 = arith.constant 0 : index
    %c0_142 = arith.constant 0 : index
    %436 = vector.load %arg6[%c0_141, %c0_142] : memref<1x64xf32, #tpu.memory_space<vmem>>, vector<1x64xf32>
    %437 = vector.shape_cast %436 : vector<1x64xf32> to vector<1x1x64xf32>
    %438 = vector.broadcast %437 : vector<1x1x64xf32> to vector<8x2x64xf32>
    %439 = arith.mulf %435, %438 : vector<8x2x64xf32>
    %cst_143 = arith.constant dense<0.000000e+00> : vector<8x2xf32>
    %440 = vector.multi_reduction <add>, %439, %cst_143 [2] : vector<8x2x64xf32> to vector<8x2xf32>
    %441 = vector.shape_cast %440 : vector<8x2xf32> to vector<8x2x1xf32>
    %c0_144 = arith.constant 0 : index
    %c0_145 = arith.constant 0 : index
    %442 = vector.load %arg7[%c0_144, %c0_145] : memref<1x1xf32, #tpu.memory_space<vmem>>, vector<1x1xf32>
    %443 = vector.shape_cast %442 : vector<1x1xf32> to vector<1x1x1xf32>
    %444 = vector.broadcast %443 : vector<1x1x1xf32> to vector<8x2x1xf32>
    %445 = arith.addf %441, %444 : vector<8x2x1xf32>
    %446 = math.tanh %445 : vector<8x2x1xf32>
    %cst_146 = arith.constant dense<0xFF800000> : vector<2x1xf32>
    %447 = vector.multi_reduction <maximumf>, %446, %cst_146 [0] : vector<8x2x1xf32> to vector<2x1xf32>
    %448 = vector.shape_cast %447 : vector<2x1xf32> to vector<1x2x1xf32>
    %449 = vector.broadcast %448 : vector<1x2x1xf32> to vector<8x2x1xf32>
    %450 = arith.subf %446, %449 : vector<8x2x1xf32>
    %451 = math.exp %450 : vector<8x2x1xf32>
    %cst_147 = arith.constant dense<0.000000e+00> : vector<2x1xf32>
    %452 = vector.multi_reduction <add>, %451, %cst_147 [0] : vector<8x2x1xf32> to vector<2x1xf32>
    %453 = vector.shape_cast %452 : vector<2x1xf32> to vector<1x2x1xf32>
    %454 = tpu.reciprocal %453 {approx = true} : vector<1x2x1xf32> -> vector<1x2x1xf32>
    %455 = vector.broadcast %454 : vector<1x2x1xf32> to vector<8x2x1xf32>
    %456 = arith.mulf %451, %455 : vector<8x2x1xf32>
    %457 = vector.broadcast %456 : vector<8x2x1xf32> to vector<8x2x64xf32>
    %458 = arith.mulf %435, %457 : vector<8x2x64xf32>
    %cst_148 = arith.constant dense<0.000000e+00> : vector<2x64xf32>
    %459 = vector.multi_reduction <add>, %458, %cst_148 [0] : vector<8x2x64xf32> to vector<2x64xf32>
    %c0_149 = arith.constant 0 : index
    %c0_150 = arith.constant 0 : index
    %460 = vector.load %arg8[%c0_149, %c0_150] : memref<64x32xf32, #tpu.memory_space<vmem>>, vector<64x32xf32>
    %cst_151 = arith.constant dense<0.000000e+00> : vector<2x32xf32>
    %461 = tpu.matmul %459, %460, %cst_151 {dimension_numbers = #tpu.dot_dimension_numbers<[1], [0], [0], [1], [0, 0, 1, 1], [], []>} : vector<2x64xf32>, vector<64x32xf32>, vector<2x32xf32> -> vector<2x32xf32>
    %c0_152 = arith.constant 0 : index
    %c0_153 = arith.constant 0 : index
    %462 = vector.load %arg9[%c0_152, %c0_153] : memref<1x32xf32, #tpu.memory_space<vmem>>, vector<1x32xf32>
    %463 = vector.broadcast %462 : vector<1x32xf32> to vector<2x32xf32>
    %464 = arith.addf %461, %463 : vector<2x32xf32>
    %cst_154 = arith.constant 0.000000e+00 : f32
    %465 = vector.broadcast %cst_154 : f32 to vector<2x32xf32>
    %466 = arith.maximumf %464, %465 : vector<2x32xf32>
    %c0_155 = arith.constant 0 : index
    %c0_156 = arith.constant 0 : index
    %467 = vector.load %arg10[%c0_155, %c0_156] : memref<1x32xf32, #tpu.memory_space<vmem>>, vector<1x32xf32>
    %468 = vector.broadcast %467 : vector<1x32xf32> to vector<2x32xf32>
    %469 = arith.mulf %466, %468 : vector<2x32xf32>
    %cst_157 = arith.constant dense<0.000000e+00> : vector<2xf32>
    %470 = vector.multi_reduction <add>, %469, %cst_157 [1] : vector<2x32xf32> to vector<2xf32>
    %471 = vector.shape_cast %470 : vector<2xf32> to vector<2x1xf32>
    %c0_158 = arith.constant 0 : index
    %c0_159 = arith.constant 0 : index
    %472 = vector.load %arg11[%c0_158, %c0_159] : memref<1x1xf32, #tpu.memory_space<vmem>>, vector<1x1xf32>
    %473 = vector.broadcast %472 : vector<1x1xf32> to vector<2x1xf32>
    %474 = arith.addf %471, %473 : vector<2x1xf32>
    %c0_160 = arith.constant 0 : index
    %c0_161 = arith.constant 0 : index
    %475 = vector.load %arg12[%c0_160, %c0_161] : memref<2x1xf32, #tpu.memory_space<vmem>>, vector<2x1xf32>
    tpu.vector_store %arg12[%c0_160, %c0_161], %474 {strides = array<i32>} : memref<2x1xf32, #tpu.memory_space<vmem>>, vector<2x1xf32>,
    return
  }
  func.func @transform_0(%arg0: i32) -> (i32, i32, i32) {
    %c0_i32 = arith.constant 0 : i32
    %c0_i32_0 = arith.constant 0 : i32
    %c0_i32_1 = arith.constant 0 : i32
    %c0_i32_2 = arith.constant 0 : i32
    return %c0_i32, %c0_i32_0, %c0_i32_1 : i32, i32, i32
  }
  func.func @transform_1(%arg0: i32) -> (i32, i32) {
    %c0_i32 = arith.constant 0 : i32
    %c0_i32_0 = arith.constant 0 : i32
    %c0_i32_1 = arith.constant 0 : i32
    return %c0_i32, %c0_i32_0 : i32, i32
  }
  func.func @transform_2(%arg0: i32) -> (i32, i32) {
    %c0_i32 = arith.constant 0 : i32
    %c0_i32_0 = arith.constant 0 : i32
    %c0_i32_1 = arith.constant 0 : i32
    return %c0_i32, %c0_i32_0 : i32, i32
  }
  func.func @transform_3(%arg0: i32) -> (i32, i32) {
    %c0_i32 = arith.constant 0 : i32
    %c0_i32_0 = arith.constant 0 : i32
    %c0_i32_1 = arith.constant 0 : i32
    return %c0_i32, %c0_i32_0 : i32, i32
  }
  func.func @transform_4(%arg0: i32) -> (i32, i32) {
    %c0_i32 = arith.constant 0 : i32
    %c0_i32_0 = arith.constant 0 : i32
    %c0_i32_1 = arith.constant 0 : i32
    return %c0_i32, %c0_i32_0 : i32, i32
  }
  func.func @transform_5(%arg0: i32) -> (i32, i32) {
    %c0_i32 = arith.constant 0 : i32
    %c0_i32_0 = arith.constant 0 : i32
    %c0_i32_1 = arith.constant 0 : i32
    return %c0_i32, %c0_i32_0 : i32, i32
  }
  func.func @transform_6(%arg0: i32) -> (i32, i32) {
    %c0_i32 = arith.constant 0 : i32
    %c0_i32_0 = arith.constant 0 : i32
    %c0_i32_1 = arith.constant 0 : i32
    return %c0_i32, %c0_i32_0 : i32, i32
  }
  func.func @transform_7(%arg0: i32) -> (i32, i32) {
    %c0_i32 = arith.constant 0 : i32
    %c0_i32_0 = arith.constant 0 : i32
    %c0_i32_1 = arith.constant 0 : i32
    return %c0_i32, %c0_i32_0 : i32, i32
  }
  func.func @transform_8(%arg0: i32) -> (i32, i32) {
    %c0_i32 = arith.constant 0 : i32
    %c0_i32_0 = arith.constant 0 : i32
    %c0_i32_1 = arith.constant 0 : i32
    return %c0_i32, %c0_i32_0 : i32, i32
  }
  func.func @transform_9(%arg0: i32) -> (i32, i32) {
    %c0_i32 = arith.constant 0 : i32
    %c0_i32_0 = arith.constant 0 : i32
    %c0_i32_1 = arith.constant 0 : i32
    return %c0_i32, %c0_i32_0 : i32, i32
  }
  func.func @transform_10(%arg0: i32) -> (i32, i32) {
    %c0_i32 = arith.constant 0 : i32
    %c0_i32_0 = arith.constant 0 : i32
    %c0_i32_1 = arith.constant 0 : i32
    return %c0_i32, %c0_i32_0 : i32, i32
  }
  func.func @transform_11(%arg0: i32) -> (i32, i32) {
    %c0_i32 = arith.constant 0 : i32
    %c0_i32_0 = arith.constant 0 : i32
    %c0_i32_1 = arith.constant 0 : i32
    return %c0_i32, %c0_i32_0 : i32, i32
  }
}

module attributes {stable_mosaic.version = 11 : i64} {
  func.func @_chunk_kernel(%arg0: i32, %arg1: memref<8x16x16xbf16, #tpu.memory_space<vmem>>, %arg2: memref<16x192xbf16, #tpu.memory_space<vmem>>, %arg3: memref<1x192xf32, #tpu.memory_space<vmem>>, %arg4: memref<64x192xbf16, #tpu.memory_space<vmem>>, %arg5: memref<1x64xf32, #tpu.memory_space<vmem>>, %arg6: memref<1x64xf32, #tpu.memory_space<vmem>>, %arg7: memref<1x1xf32, #tpu.memory_space<vmem>>, %arg8: memref<16x64xf32, #tpu.memory_space<vmem>>, %arg9: memref<8x16x192xbf16, #tpu.memory_space<vmem>>, %arg10: memref<8x16x64xf32, #tpu.memory_space<vmem>>) attributes {dimension_semantics = [#tpu.dimension_semantics<parallel>], iteration_bounds = array<i64: 1>, scalar_prefetch = 0 : i64, scratch_operands = 2 : i64, tpu.core_type = #tpu.core_type<tc>, window_params = [{transform_indices = @transform_0, window_bounds = array<i64: 8, 16, 16>}, {pipeline_mode = #tpu.pipeline_mode<synchronous>, transform_indices = @transform_1, window_bounds = array<i64: 16, 192>}, {pipeline_mode = #tpu.pipeline_mode<synchronous>, transform_indices = @transform_2, window_bounds = array<i64: 1, 192>}, {pipeline_mode = #tpu.pipeline_mode<synchronous>, transform_indices = @transform_3, window_bounds = array<i64: 64, 192>}, {pipeline_mode = #tpu.pipeline_mode<synchronous>, transform_indices = @transform_4, window_bounds = array<i64: 1, 64>}, {pipeline_mode = #tpu.pipeline_mode<synchronous>, transform_indices = @transform_5, window_bounds = array<i64: 1, 64>}, {pipeline_mode = #tpu.pipeline_mode<synchronous>, transform_indices = @transform_6, window_bounds = array<i64: 1, 1>}, {transform_indices = @transform_7, window_bounds = array<i64: 16, 64>}]} {
    %c0 = arith.constant 0 : index
    %c0_0 = arith.constant 0 : index
    %c0_1 = arith.constant 0 : index
    %0 = vector.load %arg1[%c0, %c0_0, %c0_1] : memref<8x16x16xbf16, #tpu.memory_space<vmem>>, vector<8x16x16xbf16>
    %1 = vector.shape_cast %0 : vector<8x16x16xbf16> to vector<128x16xbf16>
    %c0_2 = arith.constant 0 : index
    %c0_3 = arith.constant 0 : index
    %2 = vector.load %arg2[%c0_2, %c0_3] : memref<16x192xbf16, #tpu.memory_space<vmem>>, vector<16x192xbf16>
    %cst = arith.constant dense<0.000000e+00> : vector<128x192xf32>
    %3 = tpu.matmul %1, %2, %cst {dimension_numbers = #tpu.dot_dimension_numbers<[1], [0], [0], [1], [0, 0, 1, 1], [], []>} : vector<128x16xbf16>, vector<16x192xbf16>, vector<128x192xf32> -> vector<128x192xf32>
    %c0_4 = arith.constant 0 : index
    %c0_5 = arith.constant 0 : index
    %4 = vector.load %arg3[%c0_4, %c0_5] : memref<1x192xf32, #tpu.memory_space<vmem>>, vector<1x192xf32>
    %5 = vector.broadcast %4 : vector<1x192xf32> to vector<128x192xf32>
    %6 = arith.addf %3, %5 : vector<128x192xf32>
    %7 = vector.shape_cast %6 : vector<128x192xf32> to vector<8x16x192xf32>
    %8 = tpu.iota {dimensions = array<i32: 1>} : vector<1x192xi32>
    %c64_i32 = arith.constant 64 : i32
    %c0_i32 = arith.constant 0 : i32
    %9 = arith.cmpi eq, %c64_i32, %c0_i32 : i32
    %c1_i32 = arith.constant 1 : i32
    %10 = arith.select %9, %c1_i32, %c64_i32 : i32
    %11 = vector.broadcast %10 : i32 to vector<1x192xi32>
    %12 = arith.remsi %8, %11 : vector<1x192xi32>
    %c0_i32_6 = arith.constant 0 : i32
    %13 = vector.broadcast %c0_i32_6 : i32 to vector<1x192xi32>
    %14 = arith.cmpi ne, %12, %13 : vector<1x192xi32>
    %c0_i32_7 = arith.constant 0 : i32
    %15 = vector.broadcast %c0_i32_7 : i32 to vector<1x192xi32>
    %16 = arith.cmpi slt, %12, %15 : vector<1x192xi32>
    %c0_i32_8 = arith.constant 0 : i32
    %17 = arith.cmpi slt, %10, %c0_i32_8 : i32
    %18 = vector.broadcast %17 : i1 to vector<1x192xi1>
    %19 = vector.broadcast %18 : vector<1x192xi1> to vector<1x192xi1>
    %20 = arith.xori %16, %19 : vector<1x192xi1>
    %21 = arith.andi %20, %14 : vector<1x192xi1>
    %22 = vector.broadcast %10 : i32 to vector<1x192xi32>
    %23 = arith.addi %12, %22 : vector<1x192xi32>
    %24 = arith.select %21, %23, %12 : vector<1x192xi1>, vector<1x192xi32>
    %c32_i32 = arith.constant 32 : i32
    %25 = vector.broadcast %c32_i32 : i32 to vector<1x192xi32>
    %26 = arith.cmpi slt, %24, %25 : vector<1x192xi32>
    %27 = vector.extract_strided_slice %7 {offsets = [0, 0, 0], sizes = [1, 16, 192], strides = [1, 1, 1]} : vector<8x16x192xf32> to vector<1x16x192xf32>
    %28 = vector.shape_cast %27 : vector<1x16x192xf32> to vector<16x192xf32>
    %29 = vector.extract_strided_slice %7 {offsets = [7, 0, 0], sizes = [1, 16, 192], strides = [1, 1, 1]} : vector<8x16x192xf32> to vector<1x16x192xf32>
    %30 = vector.shape_cast %29 : vector<1x16x192xf32> to vector<16x192xf32>
    %31 = vector.shape_cast %26 : vector<1x192xi1> to vector<1x192xi1>
    %32 = vector.broadcast %31 : vector<1x192xi1> to vector<16x192xi1>
    %33 = arith.select %32, %28, %30 : vector<16x192xi1>, vector<16x192xf32>
    %34 = arith.truncf %33 : vector<16x192xf32> to vector<16x192xbf16>
    %c0_9 = arith.constant 0 : index
    %c0_10 = arith.constant 0 : index
    %c0_11 = arith.constant 0 : index
    %35 = vector.load %arg9[%c0_9, %c0_10, %c0_11] : memref<8x16x192xbf16, #tpu.memory_space<vmem>>, vector<1x16x192xbf16>
    %36 = vector.shape_cast %35 : vector<1x16x192xbf16> to vector<16x192xbf16>
    %37 = vector.shape_cast %34 : vector<16x192xbf16> to vector<1x16x192xbf16>
    tpu.vector_store %arg9[%c0_9, %c0_10, %c0_11], %37 {strides = array<i32>} : memref<8x16x192xbf16, #tpu.memory_space<vmem>>, vector<1x16x192xbf16>,
    %38 = vector.extract_strided_slice %7 {offsets = [1, 0, 0], sizes = [1, 16, 192], strides = [1, 1, 1]} : vector<8x16x192xf32> to vector<1x16x192xf32>
    %39 = vector.shape_cast %38 : vector<1x16x192xf32> to vector<16x192xf32>
    %40 = vector.extract_strided_slice %7 {offsets = [6, 0, 0], sizes = [1, 16, 192], strides = [1, 1, 1]} : vector<8x16x192xf32> to vector<1x16x192xf32>
    %41 = vector.shape_cast %40 : vector<1x16x192xf32> to vector<16x192xf32>
    %42 = vector.shape_cast %26 : vector<1x192xi1> to vector<1x192xi1>
    %43 = vector.broadcast %42 : vector<1x192xi1> to vector<16x192xi1>
    %44 = arith.select %43, %39, %41 : vector<16x192xi1>, vector<16x192xf32>
    %45 = arith.truncf %44 : vector<16x192xf32> to vector<16x192xbf16>
    %c1 = arith.constant 1 : index
    %c0_12 = arith.constant 0 : index
    %c0_13 = arith.constant 0 : index
    %46 = vector.load %arg9[%c1, %c0_12, %c0_13] : memref<8x16x192xbf16, #tpu.memory_space<vmem>>, vector<1x16x192xbf16>
    %47 = vector.shape_cast %46 : vector<1x16x192xbf16> to vector<16x192xbf16>
    %48 = vector.shape_cast %45 : vector<16x192xbf16> to vector<1x16x192xbf16>
    tpu.vector_store %arg9[%c1, %c0_12, %c0_13], %48 {strides = array<i32>} : memref<8x16x192xbf16, #tpu.memory_space<vmem>>, vector<1x16x192xbf16>,
    %49 = vector.extract_strided_slice %7 {offsets = [2, 0, 0], sizes = [1, 16, 192], strides = [1, 1, 1]} : vector<8x16x192xf32> to vector<1x16x192xf32>
    %50 = vector.shape_cast %49 : vector<1x16x192xf32> to vector<16x192xf32>
    %51 = vector.extract_strided_slice %7 {offsets = [5, 0, 0], sizes = [1, 16, 192], strides = [1, 1, 1]} : vector<8x16x192xf32> to vector<1x16x192xf32>
    %52 = vector.shape_cast %51 : vector<1x16x192xf32> to vector<16x192xf32>
    %53 = vector.shape_cast %26 : vector<1x192xi1> to vector<1x192xi1>
    %54 = vector.broadcast %53 : vector<1x192xi1> to vector<16x192xi1>
    %55 = arith.select %54, %50, %52 : vector<16x192xi1>, vector<16x192xf32>
    %56 = arith.truncf %55 : vector<16x192xf32> to vector<16x192xbf16>
    %c2 = arith.constant 2 : index
    %c0_14 = arith.constant 0 : index
    %c0_15 = arith.constant 0 : index
    %57 = vector.load %arg9[%c2, %c0_14, %c0_15] : memref<8x16x192xbf16, #tpu.memory_space<vmem>>, vector<1x16x192xbf16>
    %58 = vector.shape_cast %57 : vector<1x16x192xbf16> to vector<16x192xbf16>
    %59 = vector.shape_cast %56 : vector<16x192xbf16> to vector<1x16x192xbf16>
    tpu.vector_store %arg9[%c2, %c0_14, %c0_15], %59 {strides = array<i32>} : memref<8x16x192xbf16, #tpu.memory_space<vmem>>, vector<1x16x192xbf16>,
    %60 = vector.extract_strided_slice %7 {offsets = [3, 0, 0], sizes = [1, 16, 192], strides = [1, 1, 1]} : vector<8x16x192xf32> to vector<1x16x192xf32>
    %61 = vector.shape_cast %60 : vector<1x16x192xf32> to vector<16x192xf32>
    %62 = vector.extract_strided_slice %7 {offsets = [4, 0, 0], sizes = [1, 16, 192], strides = [1, 1, 1]} : vector<8x16x192xf32> to vector<1x16x192xf32>
    %63 = vector.shape_cast %62 : vector<1x16x192xf32> to vector<16x192xf32>
    %64 = vector.shape_cast %26 : vector<1x192xi1> to vector<1x192xi1>
    %65 = vector.broadcast %64 : vector<1x192xi1> to vector<16x192xi1>
    %66 = arith.select %65, %61, %63 : vector<16x192xi1>, vector<16x192xf32>
    %67 = arith.truncf %66 : vector<16x192xf32> to vector<16x192xbf16>
    %c3 = arith.constant 3 : index
    %c0_16 = arith.constant 0 : index
    %c0_17 = arith.constant 0 : index
    %68 = vector.load %arg9[%c3, %c0_16, %c0_17] : memref<8x16x192xbf16, #tpu.memory_space<vmem>>, vector<1x16x192xbf16>
    %69 = vector.shape_cast %68 : vector<1x16x192xbf16> to vector<16x192xbf16>
    %70 = vector.shape_cast %67 : vector<16x192xbf16> to vector<1x16x192xbf16>
    tpu.vector_store %arg9[%c3, %c0_16, %c0_17], %70 {strides = array<i32>} : memref<8x16x192xbf16, #tpu.memory_space<vmem>>, vector<1x16x192xbf16>,
    %71 = vector.extract_strided_slice %7 {offsets = [4, 0, 0], sizes = [1, 16, 192], strides = [1, 1, 1]} : vector<8x16x192xf32> to vector<1x16x192xf32>
    %72 = vector.shape_cast %71 : vector<1x16x192xf32> to vector<16x192xf32>
    %73 = vector.extract_strided_slice %7 {offsets = [3, 0, 0], sizes = [1, 16, 192], strides = [1, 1, 1]} : vector<8x16x192xf32> to vector<1x16x192xf32>
    %74 = vector.shape_cast %73 : vector<1x16x192xf32> to vector<16x192xf32>
    %75 = vector.shape_cast %26 : vector<1x192xi1> to vector<1x192xi1>
    %76 = vector.broadcast %75 : vector<1x192xi1> to vector<16x192xi1>
    %77 = arith.select %76, %72, %74 : vector<16x192xi1>, vector<16x192xf32>
    %78 = arith.truncf %77 : vector<16x192xf32> to vector<16x192xbf16>
    %c4 = arith.constant 4 : index
    %c0_18 = arith.constant 0 : index
    %c0_19 = arith.constant 0 : index
    %79 = vector.load %arg9[%c4, %c0_18, %c0_19] : memref<8x16x192xbf16, #tpu.memory_space<vmem>>, vector<1x16x192xbf16>
    %80 = vector.shape_cast %79 : vector<1x16x192xbf16> to vector<16x192xbf16>
    %81 = vector.shape_cast %78 : vector<16x192xbf16> to vector<1x16x192xbf16>
    tpu.vector_store %arg9[%c4, %c0_18, %c0_19], %81 {strides = array<i32>} : memref<8x16x192xbf16, #tpu.memory_space<vmem>>, vector<1x16x192xbf16>,
    %82 = vector.extract_strided_slice %7 {offsets = [5, 0, 0], sizes = [1, 16, 192], strides = [1, 1, 1]} : vector<8x16x192xf32> to vector<1x16x192xf32>
    %83 = vector.shape_cast %82 : vector<1x16x192xf32> to vector<16x192xf32>
    %84 = vector.extract_strided_slice %7 {offsets = [2, 0, 0], sizes = [1, 16, 192], strides = [1, 1, 1]} : vector<8x16x192xf32> to vector<1x16x192xf32>
    %85 = vector.shape_cast %84 : vector<1x16x192xf32> to vector<16x192xf32>
    %86 = vector.shape_cast %26 : vector<1x192xi1> to vector<1x192xi1>
    %87 = vector.broadcast %86 : vector<1x192xi1> to vector<16x192xi1>
    %88 = arith.select %87, %83, %85 : vector<16x192xi1>, vector<16x192xf32>
    %89 = arith.truncf %88 : vector<16x192xf32> to vector<16x192xbf16>
    %c5 = arith.constant 5 : index
    %c0_20 = arith.constant 0 : index
    %c0_21 = arith.constant 0 : index
    %90 = vector.load %arg9[%c5, %c0_20, %c0_21] : memref<8x16x192xbf16, #tpu.memory_space<vmem>>, vector<1x16x192xbf16>
    %91 = vector.shape_cast %90 : vector<1x16x192xbf16> to vector<16x192xbf16>
    %92 = vector.shape_cast %89 : vector<16x192xbf16> to vector<1x16x192xbf16>
    tpu.vector_store %arg9[%c5, %c0_20, %c0_21], %92 {strides = array<i32>} : memref<8x16x192xbf16, #tpu.memory_space<vmem>>, vector<1x16x192xbf16>,
    %93 = vector.extract_strided_slice %7 {offsets = [6, 0, 0], sizes = [1, 16, 192], strides = [1, 1, 1]} : vector<8x16x192xf32> to vector<1x16x192xf32>
    %94 = vector.shape_cast %93 : vector<1x16x192xf32> to vector<16x192xf32>
    %95 = vector.extract_strided_slice %7 {offsets = [1, 0, 0], sizes = [1, 16, 192], strides = [1, 1, 1]} : vector<8x16x192xf32> to vector<1x16x192xf32>
    %96 = vector.shape_cast %95 : vector<1x16x192xf32> to vector<16x192xf32>
    %97 = vector.shape_cast %26 : vector<1x192xi1> to vector<1x192xi1>
    %98 = vector.broadcast %97 : vector<1x192xi1> to vector<16x192xi1>
    %99 = arith.select %98, %94, %96 : vector<16x192xi1>, vector<16x192xf32>
    %100 = arith.truncf %99 : vector<16x192xf32> to vector<16x192xbf16>
    %c6 = arith.constant 6 : index
    %c0_22 = arith.constant 0 : index
    %c0_23 = arith.constant 0 : index
    %101 = vector.load %arg9[%c6, %c0_22, %c0_23] : memref<8x16x192xbf16, #tpu.memory_space<vmem>>, vector<1x16x192xbf16>
    %102 = vector.shape_cast %101 : vector<1x16x192xbf16> to vector<16x192xbf16>
    %103 = vector.shape_cast %100 : vector<16x192xbf16> to vector<1x16x192xbf16>
    tpu.vector_store %arg9[%c6, %c0_22, %c0_23], %103 {strides = array<i32>} : memref<8x16x192xbf16, #tpu.memory_space<vmem>>, vector<1x16x192xbf16>,
    %104 = vector.extract_strided_slice %7 {offsets = [7, 0, 0], sizes = [1, 16, 192], strides = [1, 1, 1]} : vector<8x16x192xf32> to vector<1x16x192xf32>
    %105 = vector.shape_cast %104 : vector<1x16x192xf32> to vector<16x192xf32>
    %106 = vector.extract_strided_slice %7 {offsets = [0, 0, 0], sizes = [1, 16, 192], strides = [1, 1, 1]} : vector<8x16x192xf32> to vector<1x16x192xf32>
    %107 = vector.shape_cast %106 : vector<1x16x192xf32> to vector<16x192xf32>
    %108 = vector.shape_cast %26 : vector<1x192xi1> to vector<1x192xi1>
    %109 = vector.broadcast %108 : vector<1x192xi1> to vector<16x192xi1>
    %110 = arith.select %109, %105, %107 : vector<16x192xi1>, vector<16x192xf32>
    %111 = arith.truncf %110 : vector<16x192xf32> to vector<16x192xbf16>
    %c7 = arith.constant 7 : index
    %c0_24 = arith.constant 0 : index
    %c0_25 = arith.constant 0 : index
    %112 = vector.load %arg9[%c7, %c0_24, %c0_25] : memref<8x16x192xbf16, #tpu.memory_space<vmem>>, vector<1x16x192xbf16>
    %113 = vector.shape_cast %112 : vector<1x16x192xbf16> to vector<16x192xbf16>
    %114 = vector.shape_cast %111 : vector<16x192xbf16> to vector<1x16x192xbf16>
    tpu.vector_store %arg9[%c7, %c0_24, %c0_25], %114 {strides = array<i32>} : memref<8x16x192xbf16, #tpu.memory_space<vmem>>, vector<1x16x192xbf16>,
    %c0_26 = arith.constant 0 : index
    %c0_27 = arith.constant 0 : index
    %115 = vector.load %arg4[%c0_26, %c0_27] : memref<64x192xbf16, #tpu.memory_space<vmem>>, vector<64x192xbf16>
    %c0_28 = arith.constant 0 : index
    %c0_29 = arith.constant 0 : index
    %116 = vector.load %arg5[%c0_28, %c0_29] : memref<1x64xf32, #tpu.memory_space<vmem>>, vector<1x64xf32>
    %117 = vector.shape_cast %116 : vector<1x64xf32> to vector<1x64xf32>
    %118 = vector.broadcast %117 : vector<1x64xf32> to vector<16x64xf32>
    %cst_30 = arith.constant 0.000000e+00 : f32
    %119 = vector.broadcast %cst_30 : f32 to vector<16x64xf32>
    %c0_i32_31 = arith.constant 0 : i32
    %120 = arith.index_cast %c0_i32_31 : i32 to index
    %c0_32 = arith.constant 0 : index
    %c0_33 = arith.constant 0 : index
    %121 = vector.load %arg9[%120, %c0_32, %c0_33] : memref<8x16x192xbf16, #tpu.memory_space<vmem>>, vector<1x16x192xbf16>
    %122 = vector.shape_cast %121 : vector<1x16x192xbf16> to vector<16x192xbf16>
    %123 = arith.extf %122 : vector<16x192xbf16> to vector<16x192xf32>
    %124 = arith.truncf %119 : vector<16x64xf32> to vector<16x64xbf16>
    %cst_34 = arith.constant dense<0.000000e+00> : vector<16x192xf32>
    %125 = tpu.matmul %124, %115, %cst_34 {dimension_numbers = #tpu.dot_dimension_numbers<[1], [0], [0], [1], [0, 0, 1, 1], [], []>} : vector<16x64xbf16>, vector<64x192xbf16>, vector<16x192xf32> -> vector<16x192xf32>
    %126 = vector.extract_strided_slice %123 {offsets = [0, 0], sizes = [16, 128], strides = [1, 1]} : vector<16x192xf32> to vector<16x128xf32>
    %127 = vector.extract_strided_slice %125 {offsets = [0, 0], sizes = [16, 128], strides = [1, 1]} : vector<16x192xf32> to vector<16x128xf32>
    %128 = arith.addf %126, %127 : vector<16x128xf32>
    %129 = arith.negf %128 : vector<16x128xf32>
    %130 = math.exp %129 : vector<16x128xf32>
    %cst_35 = arith.constant 1.000000e+00 : f32
    %131 = vector.broadcast %cst_35 : f32 to vector<16x128xf32>
    %132 = arith.addf %131, %130 : vector<16x128xf32>
    %133 = arith.divf %131, %132 : vector<16x128xf32>
    %134 = vector.extract_strided_slice %133 {offsets = [0, 0], sizes = [16, 64], strides = [1, 1]} : vector<16x128xf32> to vector<16x64xf32>
    %135 = vector.extract_strided_slice %133 {offsets = [0, 64], sizes = [16, 64], strides = [1, 1]} : vector<16x128xf32> to vector<16x64xf32>
    %136 = vector.extract_strided_slice %123 {offsets = [0, 128], sizes = [16, 64], strides = [1, 1]} : vector<16x192xf32> to vector<16x64xf32>
    %137 = vector.extract_strided_slice %125 {offsets = [0, 128], sizes = [16, 64], strides = [1, 1]} : vector<16x192xf32> to vector<16x64xf32>
    %138 = arith.addf %137, %118 : vector<16x64xf32>
    %139 = arith.mulf %134, %138 : vector<16x64xf32>
    %140 = arith.addf %136, %139 : vector<16x64xf32>
    %141 = math.tanh %140 : vector<16x64xf32>
    %cst_36 = arith.constant 1.000000e+00 : f32
    %142 = vector.broadcast %cst_36 : f32 to vector<16x64xf32>
    %143 = arith.subf %142, %135 : vector<16x64xf32>
    %144 = arith.mulf %143, %141 : vector<16x64xf32>
    %145 = arith.mulf %135, %119 : vector<16x64xf32>
    %146 = arith.addf %144, %145 : vector<16x64xf32>
    %147 = arith.index_cast %c0_i32_31 : i32 to index
    %c0_37 = arith.constant 0 : index
    %c0_38 = arith.constant 0 : index
    %148 = vector.load %arg10[%147, %c0_37, %c0_38] : memref<8x16x64xf32, #tpu.memory_space<vmem>>, vector<1x16x64xf32>
    %149 = vector.shape_cast %148 : vector<1x16x64xf32> to vector<16x64xf32>
    %150 = vector.shape_cast %146 : vector<16x64xf32> to vector<1x16x64xf32>
    tpu.vector_store %arg10[%147, %c0_37, %c0_38], %150 {strides = array<i32>} : memref<8x16x64xf32, #tpu.memory_space<vmem>>, vector<1x16x64xf32>,
    %c1_i32_39 = arith.constant 1 : i32
    %151 = arith.index_cast %c1_i32_39 : i32 to index
    %c0_40 = arith.constant 0 : index
    %c0_41 = arith.constant 0 : index
    %152 = vector.load %arg9[%151, %c0_40, %c0_41] : memref<8x16x192xbf16, #tpu.memory_space<vmem>>, vector<1x16x192xbf16>
    %153 = vector.shape_cast %152 : vector<1x16x192xbf16> to vector<16x192xbf16>
    %154 = arith.extf %153 : vector<16x192xbf16> to vector<16x192xf32>
    %155 = arith.truncf %146 : vector<16x64xf32> to vector<16x64xbf16>
    %cst_42 = arith.constant dense<0.000000e+00> : vector<16x192xf32>
    %156 = tpu.matmul %155, %115, %cst_42 {dimension_numbers = #tpu.dot_dimension_numbers<[1], [0], [0], [1], [0, 0, 1, 1], [], []>} : vector<16x64xbf16>, vector<64x192xbf16>, vector<16x192xf32> -> vector<16x192xf32>
    %157 = vector.extract_strided_slice %154 {offsets = [0, 0], sizes = [16, 128], strides = [1, 1]} : vector<16x192xf32> to vector<16x128xf32>
    %158 = vector.extract_strided_slice %156 {offsets = [0, 0], sizes = [16, 128], strides = [1, 1]} : vector<16x192xf32> to vector<16x128xf32>
    %159 = arith.addf %157, %158 : vector<16x128xf32>
    %160 = arith.negf %159 : vector<16x128xf32>
    %161 = math.exp %160 : vector<16x128xf32>
    %cst_43 = arith.constant 1.000000e+00 : f32
    %162 = vector.broadcast %cst_43 : f32 to vector<16x128xf32>
    %163 = arith.addf %162, %161 : vector<16x128xf32>
    %164 = arith.divf %162, %163 : vector<16x128xf32>
    %165 = vector.extract_strided_slice %164 {offsets = [0, 0], sizes = [16, 64], strides = [1, 1]} : vector<16x128xf32> to vector<16x64xf32>
    %166 = vector.extract_strided_slice %164 {offsets = [0, 64], sizes = [16, 64], strides = [1, 1]} : vector<16x128xf32> to vector<16x64xf32>
    %167 = vector.extract_strided_slice %154 {offsets = [0, 128], sizes = [16, 64], strides = [1, 1]} : vector<16x192xf32> to vector<16x64xf32>
    %168 = vector.extract_strided_slice %156 {offsets = [0, 128], sizes = [16, 64], strides = [1, 1]} : vector<16x192xf32> to vector<16x64xf32>
    %169 = arith.addf %168, %118 : vector<16x64xf32>
    %170 = arith.mulf %165, %169 : vector<16x64xf32>
    %171 = arith.addf %167, %170 : vector<16x64xf32>
    %172 = math.tanh %171 : vector<16x64xf32>
    %cst_44 = arith.constant 1.000000e+00 : f32
    %173 = vector.broadcast %cst_44 : f32 to vector<16x64xf32>
    %174 = arith.subf %173, %166 : vector<16x64xf32>
    %175 = arith.mulf %174, %172 : vector<16x64xf32>
    %176 = arith.mulf %166, %146 : vector<16x64xf32>
    %177 = arith.addf %175, %176 : vector<16x64xf32>
    %178 = arith.index_cast %c1_i32_39 : i32 to index
    %c0_45 = arith.constant 0 : index
    %c0_46 = arith.constant 0 : index
    %179 = vector.load %arg10[%178, %c0_45, %c0_46] : memref<8x16x64xf32, #tpu.memory_space<vmem>>, vector<1x16x64xf32>
    %180 = vector.shape_cast %179 : vector<1x16x64xf32> to vector<16x64xf32>
    %181 = vector.shape_cast %177 : vector<16x64xf32> to vector<1x16x64xf32>
    tpu.vector_store %arg10[%178, %c0_45, %c0_46], %181 {strides = array<i32>} : memref<8x16x64xf32, #tpu.memory_space<vmem>>, vector<1x16x64xf32>,
    %c2_i32 = arith.constant 2 : i32
    %182 = arith.index_cast %c2_i32 : i32 to index
    %c0_47 = arith.constant 0 : index
    %c0_48 = arith.constant 0 : index
    %183 = vector.load %arg9[%182, %c0_47, %c0_48] : memref<8x16x192xbf16, #tpu.memory_space<vmem>>, vector<1x16x192xbf16>
    %184 = vector.shape_cast %183 : vector<1x16x192xbf16> to vector<16x192xbf16>
    %185 = arith.extf %184 : vector<16x192xbf16> to vector<16x192xf32>
    %186 = arith.truncf %177 : vector<16x64xf32> to vector<16x64xbf16>
    %cst_49 = arith.constant dense<0.000000e+00> : vector<16x192xf32>
    %187 = tpu.matmul %186, %115, %cst_49 {dimension_numbers = #tpu.dot_dimension_numbers<[1], [0], [0], [1], [0, 0, 1, 1], [], []>} : vector<16x64xbf16>, vector<64x192xbf16>, vector<16x192xf32> -> vector<16x192xf32>
    %188 = vector.extract_strided_slice %185 {offsets = [0, 0], sizes = [16, 128], strides = [1, 1]} : vector<16x192xf32> to vector<16x128xf32>
    %189 = vector.extract_strided_slice %187 {offsets = [0, 0], sizes = [16, 128], strides = [1, 1]} : vector<16x192xf32> to vector<16x128xf32>
    %190 = arith.addf %188, %189 : vector<16x128xf32>
    %191 = arith.negf %190 : vector<16x128xf32>
    %192 = math.exp %191 : vector<16x128xf32>
    %cst_50 = arith.constant 1.000000e+00 : f32
    %193 = vector.broadcast %cst_50 : f32 to vector<16x128xf32>
    %194 = arith.addf %193, %192 : vector<16x128xf32>
    %195 = arith.divf %193, %194 : vector<16x128xf32>
    %196 = vector.extract_strided_slice %195 {offsets = [0, 0], sizes = [16, 64], strides = [1, 1]} : vector<16x128xf32> to vector<16x64xf32>
    %197 = vector.extract_strided_slice %195 {offsets = [0, 64], sizes = [16, 64], strides = [1, 1]} : vector<16x128xf32> to vector<16x64xf32>
    %198 = vector.extract_strided_slice %185 {offsets = [0, 128], sizes = [16, 64], strides = [1, 1]} : vector<16x192xf32> to vector<16x64xf32>
    %199 = vector.extract_strided_slice %187 {offsets = [0, 128], sizes = [16, 64], strides = [1, 1]} : vector<16x192xf32> to vector<16x64xf32>
    %200 = arith.addf %199, %118 : vector<16x64xf32>
    %201 = arith.mulf %196, %200 : vector<16x64xf32>
    %202 = arith.addf %198, %201 : vector<16x64xf32>
    %203 = math.tanh %202 : vector<16x64xf32>
    %cst_51 = arith.constant 1.000000e+00 : f32
    %204 = vector.broadcast %cst_51 : f32 to vector<16x64xf32>
    %205 = arith.subf %204, %197 : vector<16x64xf32>
    %206 = arith.mulf %205, %203 : vector<16x64xf32>
    %207 = arith.mulf %197, %177 : vector<16x64xf32>
    %208 = arith.addf %206, %207 : vector<16x64xf32>
    %209 = arith.index_cast %c2_i32 : i32 to index
    %c0_52 = arith.constant 0 : index
    %c0_53 = arith.constant 0 : index
    %210 = vector.load %arg10[%209, %c0_52, %c0_53] : memref<8x16x64xf32, #tpu.memory_space<vmem>>, vector<1x16x64xf32>
    %211 = vector.shape_cast %210 : vector<1x16x64xf32> to vector<16x64xf32>
    %212 = vector.shape_cast %208 : vector<16x64xf32> to vector<1x16x64xf32>
    tpu.vector_store %arg10[%209, %c0_52, %c0_53], %212 {strides = array<i32>} : memref<8x16x64xf32, #tpu.memory_space<vmem>>, vector<1x16x64xf32>,
    %c3_i32 = arith.constant 3 : i32
    %213 = arith.index_cast %c3_i32 : i32 to index
    %c0_54 = arith.constant 0 : index
    %c0_55 = arith.constant 0 : index
    %214 = vector.load %arg9[%213, %c0_54, %c0_55] : memref<8x16x192xbf16, #tpu.memory_space<vmem>>, vector<1x16x192xbf16>
    %215 = vector.shape_cast %214 : vector<1x16x192xbf16> to vector<16x192xbf16>
    %216 = arith.extf %215 : vector<16x192xbf16> to vector<16x192xf32>
    %217 = arith.truncf %208 : vector<16x64xf32> to vector<16x64xbf16>
    %cst_56 = arith.constant dense<0.000000e+00> : vector<16x192xf32>
    %218 = tpu.matmul %217, %115, %cst_56 {dimension_numbers = #tpu.dot_dimension_numbers<[1], [0], [0], [1], [0, 0, 1, 1], [], []>} : vector<16x64xbf16>, vector<64x192xbf16>, vector<16x192xf32> -> vector<16x192xf32>
    %219 = vector.extract_strided_slice %216 {offsets = [0, 0], sizes = [16, 128], strides = [1, 1]} : vector<16x192xf32> to vector<16x128xf32>
    %220 = vector.extract_strided_slice %218 {offsets = [0, 0], sizes = [16, 128], strides = [1, 1]} : vector<16x192xf32> to vector<16x128xf32>
    %221 = arith.addf %219, %220 : vector<16x128xf32>
    %222 = arith.negf %221 : vector<16x128xf32>
    %223 = math.exp %222 : vector<16x128xf32>
    %cst_57 = arith.constant 1.000000e+00 : f32
    %224 = vector.broadcast %cst_57 : f32 to vector<16x128xf32>
    %225 = arith.addf %224, %223 : vector<16x128xf32>
    %226 = arith.divf %224, %225 : vector<16x128xf32>
    %227 = vector.extract_strided_slice %226 {offsets = [0, 0], sizes = [16, 64], strides = [1, 1]} : vector<16x128xf32> to vector<16x64xf32>
    %228 = vector.extract_strided_slice %226 {offsets = [0, 64], sizes = [16, 64], strides = [1, 1]} : vector<16x128xf32> to vector<16x64xf32>
    %229 = vector.extract_strided_slice %216 {offsets = [0, 128], sizes = [16, 64], strides = [1, 1]} : vector<16x192xf32> to vector<16x64xf32>
    %230 = vector.extract_strided_slice %218 {offsets = [0, 128], sizes = [16, 64], strides = [1, 1]} : vector<16x192xf32> to vector<16x64xf32>
    %231 = arith.addf %230, %118 : vector<16x64xf32>
    %232 = arith.mulf %227, %231 : vector<16x64xf32>
    %233 = arith.addf %229, %232 : vector<16x64xf32>
    %234 = math.tanh %233 : vector<16x64xf32>
    %cst_58 = arith.constant 1.000000e+00 : f32
    %235 = vector.broadcast %cst_58 : f32 to vector<16x64xf32>
    %236 = arith.subf %235, %228 : vector<16x64xf32>
    %237 = arith.mulf %236, %234 : vector<16x64xf32>
    %238 = arith.mulf %228, %208 : vector<16x64xf32>
    %239 = arith.addf %237, %238 : vector<16x64xf32>
    %240 = arith.index_cast %c3_i32 : i32 to index
    %c0_59 = arith.constant 0 : index
    %c0_60 = arith.constant 0 : index
    %241 = vector.load %arg10[%240, %c0_59, %c0_60] : memref<8x16x64xf32, #tpu.memory_space<vmem>>, vector<1x16x64xf32>
    %242 = vector.shape_cast %241 : vector<1x16x64xf32> to vector<16x64xf32>
    %243 = vector.shape_cast %239 : vector<16x64xf32> to vector<1x16x64xf32>
    tpu.vector_store %arg10[%240, %c0_59, %c0_60], %243 {strides = array<i32>} : memref<8x16x64xf32, #tpu.memory_space<vmem>>, vector<1x16x64xf32>,
    %c4_i32 = arith.constant 4 : i32
    %244 = arith.index_cast %c4_i32 : i32 to index
    %c0_61 = arith.constant 0 : index
    %c0_62 = arith.constant 0 : index
    %245 = vector.load %arg9[%244, %c0_61, %c0_62] : memref<8x16x192xbf16, #tpu.memory_space<vmem>>, vector<1x16x192xbf16>
    %246 = vector.shape_cast %245 : vector<1x16x192xbf16> to vector<16x192xbf16>
    %247 = arith.extf %246 : vector<16x192xbf16> to vector<16x192xf32>
    %248 = arith.truncf %239 : vector<16x64xf32> to vector<16x64xbf16>
    %cst_63 = arith.constant dense<0.000000e+00> : vector<16x192xf32>
    %249 = tpu.matmul %248, %115, %cst_63 {dimension_numbers = #tpu.dot_dimension_numbers<[1], [0], [0], [1], [0, 0, 1, 1], [], []>} : vector<16x64xbf16>, vector<64x192xbf16>, vector<16x192xf32> -> vector<16x192xf32>
    %250 = vector.extract_strided_slice %247 {offsets = [0, 0], sizes = [16, 128], strides = [1, 1]} : vector<16x192xf32> to vector<16x128xf32>
    %251 = vector.extract_strided_slice %249 {offsets = [0, 0], sizes = [16, 128], strides = [1, 1]} : vector<16x192xf32> to vector<16x128xf32>
    %252 = arith.addf %250, %251 : vector<16x128xf32>
    %253 = arith.negf %252 : vector<16x128xf32>
    %254 = math.exp %253 : vector<16x128xf32>
    %cst_64 = arith.constant 1.000000e+00 : f32
    %255 = vector.broadcast %cst_64 : f32 to vector<16x128xf32>
    %256 = arith.addf %255, %254 : vector<16x128xf32>
    %257 = arith.divf %255, %256 : vector<16x128xf32>
    %258 = vector.extract_strided_slice %257 {offsets = [0, 0], sizes = [16, 64], strides = [1, 1]} : vector<16x128xf32> to vector<16x64xf32>
    %259 = vector.extract_strided_slice %257 {offsets = [0, 64], sizes = [16, 64], strides = [1, 1]} : vector<16x128xf32> to vector<16x64xf32>
    %260 = vector.extract_strided_slice %247 {offsets = [0, 128], sizes = [16, 64], strides = [1, 1]} : vector<16x192xf32> to vector<16x64xf32>
    %261 = vector.extract_strided_slice %249 {offsets = [0, 128], sizes = [16, 64], strides = [1, 1]} : vector<16x192xf32> to vector<16x64xf32>
    %262 = arith.addf %261, %118 : vector<16x64xf32>
    %263 = arith.mulf %258, %262 : vector<16x64xf32>
    %264 = arith.addf %260, %263 : vector<16x64xf32>
    %265 = math.tanh %264 : vector<16x64xf32>
    %cst_65 = arith.constant 1.000000e+00 : f32
    %266 = vector.broadcast %cst_65 : f32 to vector<16x64xf32>
    %267 = arith.subf %266, %259 : vector<16x64xf32>
    %268 = arith.mulf %267, %265 : vector<16x64xf32>
    %269 = arith.mulf %259, %239 : vector<16x64xf32>
    %270 = arith.addf %268, %269 : vector<16x64xf32>
    %271 = arith.index_cast %c4_i32 : i32 to index
    %c0_66 = arith.constant 0 : index
    %c0_67 = arith.constant 0 : index
    %272 = vector.load %arg10[%271, %c0_66, %c0_67] : memref<8x16x64xf32, #tpu.memory_space<vmem>>, vector<1x16x64xf32>
    %273 = vector.shape_cast %272 : vector<1x16x64xf32> to vector<16x64xf32>
    %274 = vector.shape_cast %270 : vector<16x64xf32> to vector<1x16x64xf32>
    tpu.vector_store %arg10[%271, %c0_66, %c0_67], %274 {strides = array<i32>} : memref<8x16x64xf32, #tpu.memory_space<vmem>>, vector<1x16x64xf32>,
    %c5_i32 = arith.constant 5 : i32
    %275 = arith.index_cast %c5_i32 : i32 to index
    %c0_68 = arith.constant 0 : index
    %c0_69 = arith.constant 0 : index
    %276 = vector.load %arg9[%275, %c0_68, %c0_69] : memref<8x16x192xbf16, #tpu.memory_space<vmem>>, vector<1x16x192xbf16>
    %277 = vector.shape_cast %276 : vector<1x16x192xbf16> to vector<16x192xbf16>
    %278 = arith.extf %277 : vector<16x192xbf16> to vector<16x192xf32>
    %279 = arith.truncf %270 : vector<16x64xf32> to vector<16x64xbf16>
    %cst_70 = arith.constant dense<0.000000e+00> : vector<16x192xf32>
    %280 = tpu.matmul %279, %115, %cst_70 {dimension_numbers = #tpu.dot_dimension_numbers<[1], [0], [0], [1], [0, 0, 1, 1], [], []>} : vector<16x64xbf16>, vector<64x192xbf16>, vector<16x192xf32> -> vector<16x192xf32>
    %281 = vector.extract_strided_slice %278 {offsets = [0, 0], sizes = [16, 128], strides = [1, 1]} : vector<16x192xf32> to vector<16x128xf32>
    %282 = vector.extract_strided_slice %280 {offsets = [0, 0], sizes = [16, 128], strides = [1, 1]} : vector<16x192xf32> to vector<16x128xf32>
    %283 = arith.addf %281, %282 : vector<16x128xf32>
    %284 = arith.negf %283 : vector<16x128xf32>
    %285 = math.exp %284 : vector<16x128xf32>
    %cst_71 = arith.constant 1.000000e+00 : f32
    %286 = vector.broadcast %cst_71 : f32 to vector<16x128xf32>
    %287 = arith.addf %286, %285 : vector<16x128xf32>
    %288 = arith.divf %286, %287 : vector<16x128xf32>
    %289 = vector.extract_strided_slice %288 {offsets = [0, 0], sizes = [16, 64], strides = [1, 1]} : vector<16x128xf32> to vector<16x64xf32>
    %290 = vector.extract_strided_slice %288 {offsets = [0, 64], sizes = [16, 64], strides = [1, 1]} : vector<16x128xf32> to vector<16x64xf32>
    %291 = vector.extract_strided_slice %278 {offsets = [0, 128], sizes = [16, 64], strides = [1, 1]} : vector<16x192xf32> to vector<16x64xf32>
    %292 = vector.extract_strided_slice %280 {offsets = [0, 128], sizes = [16, 64], strides = [1, 1]} : vector<16x192xf32> to vector<16x64xf32>
    %293 = arith.addf %292, %118 : vector<16x64xf32>
    %294 = arith.mulf %289, %293 : vector<16x64xf32>
    %295 = arith.addf %291, %294 : vector<16x64xf32>
    %296 = math.tanh %295 : vector<16x64xf32>
    %cst_72 = arith.constant 1.000000e+00 : f32
    %297 = vector.broadcast %cst_72 : f32 to vector<16x64xf32>
    %298 = arith.subf %297, %290 : vector<16x64xf32>
    %299 = arith.mulf %298, %296 : vector<16x64xf32>
    %300 = arith.mulf %290, %270 : vector<16x64xf32>
    %301 = arith.addf %299, %300 : vector<16x64xf32>
    %302 = arith.index_cast %c5_i32 : i32 to index
    %c0_73 = arith.constant 0 : index
    %c0_74 = arith.constant 0 : index
    %303 = vector.load %arg10[%302, %c0_73, %c0_74] : memref<8x16x64xf32, #tpu.memory_space<vmem>>, vector<1x16x64xf32>
    %304 = vector.shape_cast %303 : vector<1x16x64xf32> to vector<16x64xf32>
    %305 = vector.shape_cast %301 : vector<16x64xf32> to vector<1x16x64xf32>
    tpu.vector_store %arg10[%302, %c0_73, %c0_74], %305 {strides = array<i32>} : memref<8x16x64xf32, #tpu.memory_space<vmem>>, vector<1x16x64xf32>,
    %c6_i32 = arith.constant 6 : i32
    %306 = arith.index_cast %c6_i32 : i32 to index
    %c0_75 = arith.constant 0 : index
    %c0_76 = arith.constant 0 : index
    %307 = vector.load %arg9[%306, %c0_75, %c0_76] : memref<8x16x192xbf16, #tpu.memory_space<vmem>>, vector<1x16x192xbf16>
    %308 = vector.shape_cast %307 : vector<1x16x192xbf16> to vector<16x192xbf16>
    %309 = arith.extf %308 : vector<16x192xbf16> to vector<16x192xf32>
    %310 = arith.truncf %301 : vector<16x64xf32> to vector<16x64xbf16>
    %cst_77 = arith.constant dense<0.000000e+00> : vector<16x192xf32>
    %311 = tpu.matmul %310, %115, %cst_77 {dimension_numbers = #tpu.dot_dimension_numbers<[1], [0], [0], [1], [0, 0, 1, 1], [], []>} : vector<16x64xbf16>, vector<64x192xbf16>, vector<16x192xf32> -> vector<16x192xf32>
    %312 = vector.extract_strided_slice %309 {offsets = [0, 0], sizes = [16, 128], strides = [1, 1]} : vector<16x192xf32> to vector<16x128xf32>
    %313 = vector.extract_strided_slice %311 {offsets = [0, 0], sizes = [16, 128], strides = [1, 1]} : vector<16x192xf32> to vector<16x128xf32>
    %314 = arith.addf %312, %313 : vector<16x128xf32>
    %315 = arith.negf %314 : vector<16x128xf32>
    %316 = math.exp %315 : vector<16x128xf32>
    %cst_78 = arith.constant 1.000000e+00 : f32
    %317 = vector.broadcast %cst_78 : f32 to vector<16x128xf32>
    %318 = arith.addf %317, %316 : vector<16x128xf32>
    %319 = arith.divf %317, %318 : vector<16x128xf32>
    %320 = vector.extract_strided_slice %319 {offsets = [0, 0], sizes = [16, 64], strides = [1, 1]} : vector<16x128xf32> to vector<16x64xf32>
    %321 = vector.extract_strided_slice %319 {offsets = [0, 64], sizes = [16, 64], strides = [1, 1]} : vector<16x128xf32> to vector<16x64xf32>
    %322 = vector.extract_strided_slice %309 {offsets = [0, 128], sizes = [16, 64], strides = [1, 1]} : vector<16x192xf32> to vector<16x64xf32>
    %323 = vector.extract_strided_slice %311 {offsets = [0, 128], sizes = [16, 64], strides = [1, 1]} : vector<16x192xf32> to vector<16x64xf32>
    %324 = arith.addf %323, %118 : vector<16x64xf32>
    %325 = arith.mulf %320, %324 : vector<16x64xf32>
    %326 = arith.addf %322, %325 : vector<16x64xf32>
    %327 = math.tanh %326 : vector<16x64xf32>
    %cst_79 = arith.constant 1.000000e+00 : f32
    %328 = vector.broadcast %cst_79 : f32 to vector<16x64xf32>
    %329 = arith.subf %328, %321 : vector<16x64xf32>
    %330 = arith.mulf %329, %327 : vector<16x64xf32>
    %331 = arith.mulf %321, %301 : vector<16x64xf32>
    %332 = arith.addf %330, %331 : vector<16x64xf32>
    %333 = arith.index_cast %c6_i32 : i32 to index
    %c0_80 = arith.constant 0 : index
    %c0_81 = arith.constant 0 : index
    %334 = vector.load %arg10[%333, %c0_80, %c0_81] : memref<8x16x64xf32, #tpu.memory_space<vmem>>, vector<1x16x64xf32>
    %335 = vector.shape_cast %334 : vector<1x16x64xf32> to vector<16x64xf32>
    %336 = vector.shape_cast %332 : vector<16x64xf32> to vector<1x16x64xf32>
    tpu.vector_store %arg10[%333, %c0_80, %c0_81], %336 {strides = array<i32>} : memref<8x16x64xf32, #tpu.memory_space<vmem>>, vector<1x16x64xf32>,
    %c7_i32 = arith.constant 7 : i32
    %337 = arith.index_cast %c7_i32 : i32 to index
    %c0_82 = arith.constant 0 : index
    %c0_83 = arith.constant 0 : index
    %338 = vector.load %arg9[%337, %c0_82, %c0_83] : memref<8x16x192xbf16, #tpu.memory_space<vmem>>, vector<1x16x192xbf16>
    %339 = vector.shape_cast %338 : vector<1x16x192xbf16> to vector<16x192xbf16>
    %340 = arith.extf %339 : vector<16x192xbf16> to vector<16x192xf32>
    %341 = arith.truncf %332 : vector<16x64xf32> to vector<16x64xbf16>
    %cst_84 = arith.constant dense<0.000000e+00> : vector<16x192xf32>
    %342 = tpu.matmul %341, %115, %cst_84 {dimension_numbers = #tpu.dot_dimension_numbers<[1], [0], [0], [1], [0, 0, 1, 1], [], []>} : vector<16x64xbf16>, vector<64x192xbf16>, vector<16x192xf32> -> vector<16x192xf32>
    %343 = vector.extract_strided_slice %340 {offsets = [0, 0], sizes = [16, 128], strides = [1, 1]} : vector<16x192xf32> to vector<16x128xf32>
    %344 = vector.extract_strided_slice %342 {offsets = [0, 0], sizes = [16, 128], strides = [1, 1]} : vector<16x192xf32> to vector<16x128xf32>
    %345 = arith.addf %343, %344 : vector<16x128xf32>
    %346 = arith.negf %345 : vector<16x128xf32>
    %347 = math.exp %346 : vector<16x128xf32>
    %cst_85 = arith.constant 1.000000e+00 : f32
    %348 = vector.broadcast %cst_85 : f32 to vector<16x128xf32>
    %349 = arith.addf %348, %347 : vector<16x128xf32>
    %350 = arith.divf %348, %349 : vector<16x128xf32>
    %351 = vector.extract_strided_slice %350 {offsets = [0, 0], sizes = [16, 64], strides = [1, 1]} : vector<16x128xf32> to vector<16x64xf32>
    %352 = vector.extract_strided_slice %350 {offsets = [0, 64], sizes = [16, 64], strides = [1, 1]} : vector<16x128xf32> to vector<16x64xf32>
    %353 = vector.extract_strided_slice %340 {offsets = [0, 128], sizes = [16, 64], strides = [1, 1]} : vector<16x192xf32> to vector<16x64xf32>
    %354 = vector.extract_strided_slice %342 {offsets = [0, 128], sizes = [16, 64], strides = [1, 1]} : vector<16x192xf32> to vector<16x64xf32>
    %355 = arith.addf %354, %118 : vector<16x64xf32>
    %356 = arith.mulf %351, %355 : vector<16x64xf32>
    %357 = arith.addf %353, %356 : vector<16x64xf32>
    %358 = math.tanh %357 : vector<16x64xf32>
    %cst_86 = arith.constant 1.000000e+00 : f32
    %359 = vector.broadcast %cst_86 : f32 to vector<16x64xf32>
    %360 = arith.subf %359, %352 : vector<16x64xf32>
    %361 = arith.mulf %360, %358 : vector<16x64xf32>
    %362 = arith.mulf %352, %332 : vector<16x64xf32>
    %363 = arith.addf %361, %362 : vector<16x64xf32>
    %364 = arith.index_cast %c7_i32 : i32 to index
    %c0_87 = arith.constant 0 : index
    %c0_88 = arith.constant 0 : index
    %365 = vector.load %arg10[%364, %c0_87, %c0_88] : memref<8x16x64xf32, #tpu.memory_space<vmem>>, vector<1x16x64xf32>
    %366 = vector.shape_cast %365 : vector<1x16x64xf32> to vector<16x64xf32>
    %367 = vector.shape_cast %363 : vector<16x64xf32> to vector<1x16x64xf32>
    tpu.vector_store %arg10[%364, %c0_87, %c0_88], %367 {strides = array<i32>} : memref<8x16x64xf32, #tpu.memory_space<vmem>>, vector<1x16x64xf32>,
    %c8_i32 = arith.constant 8 : i32
    %368 = tpu.iota {dimensions = array<i32: 1>} : vector<1x64xi32>
    %c32_i32_89 = arith.constant 32 : i32
    %369 = vector.broadcast %c32_i32_89 : i32 to vector<1x64xi32>
    %370 = arith.cmpi slt, %368, %369 : vector<1x64xi32>
    %c0_90 = arith.constant 0 : index
    %c0_91 = arith.constant 0 : index
    %c0_92 = arith.constant 0 : index
    %371 = vector.load %arg10[%c0_90, %c0_91, %c0_92] : memref<8x16x64xf32, #tpu.memory_space<vmem>>, vector<1x16x64xf32>
    %372 = vector.shape_cast %371 : vector<1x16x64xf32> to vector<16x64xf32>
    %c7_93 = arith.constant 7 : index
    %c0_94 = arith.constant 0 : index
    %c0_95 = arith.constant 0 : index
    %373 = vector.load %arg10[%c7_93, %c0_94, %c0_95] : memref<8x16x64xf32, #tpu.memory_space<vmem>>, vector<1x16x64xf32>
    %374 = vector.shape_cast %373 : vector<1x16x64xf32> to vector<16x64xf32>
    %375 = vector.shape_cast %370 : vector<1x64xi1> to vector<1x64xi1>
    %376 = vector.broadcast %375 : vector<1x64xi1> to vector<16x64xi1>
    %377 = arith.select %376, %372, %374 : vector<16x64xi1>, vector<16x64xf32>
    %c0_96 = arith.constant 0 : index
    %c0_97 = arith.constant 0 : index
    %c0_98 = arith.constant 0 : index
    %378 = vector.load %arg10[%c0_96, %c0_97, %c0_98] : memref<8x16x64xf32, #tpu.memory_space<vmem>>, vector<1x16x64xf32>
    %379 = vector.shape_cast %378 : vector<1x16x64xf32> to vector<16x64xf32>
    %380 = vector.shape_cast %377 : vector<16x64xf32> to vector<1x16x64xf32>
    tpu.vector_store %arg10[%c0_96, %c0_97, %c0_98], %380 {strides = array<i32>} : memref<8x16x64xf32, #tpu.memory_space<vmem>>, vector<1x16x64xf32>,
    %381 = vector.shape_cast %370 : vector<1x64xi1> to vector<1x64xi1>
    %382 = vector.broadcast %381 : vector<1x64xi1> to vector<16x64xi1>
    %383 = arith.select %382, %374, %372 : vector<16x64xi1>, vector<16x64xf32>
    %c7_99 = arith.constant 7 : index
    %c0_100 = arith.constant 0 : index
    %c0_101 = arith.constant 0 : index
    %384 = vector.load %arg10[%c7_99, %c0_100, %c0_101] : memref<8x16x64xf32, #tpu.memory_space<vmem>>, vector<1x16x64xf32>
    %385 = vector.shape_cast %384 : vector<1x16x64xf32> to vector<16x64xf32>
    %386 = vector.shape_cast %383 : vector<16x64xf32> to vector<1x16x64xf32>
    tpu.vector_store %arg10[%c7_99, %c0_100, %c0_101], %386 {strides = array<i32>} : memref<8x16x64xf32, #tpu.memory_space<vmem>>, vector<1x16x64xf32>,
    %c1_102 = arith.constant 1 : index
    %c0_103 = arith.constant 0 : index
    %c0_104 = arith.constant 0 : index
    %387 = vector.load %arg10[%c1_102, %c0_103, %c0_104] : memref<8x16x64xf32, #tpu.memory_space<vmem>>, vector<1x16x64xf32>
    %388 = vector.shape_cast %387 : vector<1x16x64xf32> to vector<16x64xf32>
    %c6_105 = arith.constant 6 : index
    %c0_106 = arith.constant 0 : index
    %c0_107 = arith.constant 0 : index
    %389 = vector.load %arg10[%c6_105, %c0_106, %c0_107] : memref<8x16x64xf32, #tpu.memory_space<vmem>>, vector<1x16x64xf32>
    %390 = vector.shape_cast %389 : vector<1x16x64xf32> to vector<16x64xf32>
    %391 = vector.shape_cast %370 : vector<1x64xi1> to vector<1x64xi1>
    %392 = vector.broadcast %391 : vector<1x64xi1> to vector<16x64xi1>
    %393 = arith.select %392, %388, %390 : vector<16x64xi1>, vector<16x64xf32>
    %c1_108 = arith.constant 1 : index
    %c0_109 = arith.constant 0 : index
    %c0_110 = arith.constant 0 : index
    %394 = vector.load %arg10[%c1_108, %c0_109, %c0_110] : memref<8x16x64xf32, #tpu.memory_space<vmem>>, vector<1x16x64xf32>
    %395 = vector.shape_cast %394 : vector<1x16x64xf32> to vector<16x64xf32>
    %396 = vector.shape_cast %393 : vector<16x64xf32> to vector<1x16x64xf32>
    tpu.vector_store %arg10[%c1_108, %c0_109, %c0_110], %396 {strides = array<i32>} : memref<8x16x64xf32, #tpu.memory_space<vmem>>, vector<1x16x64xf32>,
    %397 = vector.shape_cast %370 : vector<1x64xi1> to vector<1x64xi1>
    %398 = vector.broadcast %397 : vector<1x64xi1> to vector<16x64xi1>
    %399 = arith.select %398, %390, %388 : vector<16x64xi1>, vector<16x64xf32>
    %c6_111 = arith.constant 6 : index
    %c0_112 = arith.constant 0 : index
    %c0_113 = arith.constant 0 : index
    %400 = vector.load %arg10[%c6_111, %c0_112, %c0_113] : memref<8x16x64xf32, #tpu.memory_space<vmem>>, vector<1x16x64xf32>
    %401 = vector.shape_cast %400 : vector<1x16x64xf32> to vector<16x64xf32>
    %402 = vector.shape_cast %399 : vector<16x64xf32> to vector<1x16x64xf32>
    tpu.vector_store %arg10[%c6_111, %c0_112, %c0_113], %402 {strides = array<i32>} : memref<8x16x64xf32, #tpu.memory_space<vmem>>, vector<1x16x64xf32>,
    %c2_114 = arith.constant 2 : index
    %c0_115 = arith.constant 0 : index
    %c0_116 = arith.constant 0 : index
    %403 = vector.load %arg10[%c2_114, %c0_115, %c0_116] : memref<8x16x64xf32, #tpu.memory_space<vmem>>, vector<1x16x64xf32>
    %404 = vector.shape_cast %403 : vector<1x16x64xf32> to vector<16x64xf32>
    %c5_117 = arith.constant 5 : index
    %c0_118 = arith.constant 0 : index
    %c0_119 = arith.constant 0 : index
    %405 = vector.load %arg10[%c5_117, %c0_118, %c0_119] : memref<8x16x64xf32, #tpu.memory_space<vmem>>, vector<1x16x64xf32>
    %406 = vector.shape_cast %405 : vector<1x16x64xf32> to vector<16x64xf32>
    %407 = vector.shape_cast %370 : vector<1x64xi1> to vector<1x64xi1>
    %408 = vector.broadcast %407 : vector<1x64xi1> to vector<16x64xi1>
    %409 = arith.select %408, %404, %406 : vector<16x64xi1>, vector<16x64xf32>
    %c2_120 = arith.constant 2 : index
    %c0_121 = arith.constant 0 : index
    %c0_122 = arith.constant 0 : index
    %410 = vector.load %arg10[%c2_120, %c0_121, %c0_122] : memref<8x16x64xf32, #tpu.memory_space<vmem>>, vector<1x16x64xf32>
    %411 = vector.shape_cast %410 : vector<1x16x64xf32> to vector<16x64xf32>
    %412 = vector.shape_cast %409 : vector<16x64xf32> to vector<1x16x64xf32>
    tpu.vector_store %arg10[%c2_120, %c0_121, %c0_122], %412 {strides = array<i32>} : memref<8x16x64xf32, #tpu.memory_space<vmem>>, vector<1x16x64xf32>,
    %413 = vector.shape_cast %370 : vector<1x64xi1> to vector<1x64xi1>
    %414 = vector.broadcast %413 : vector<1x64xi1> to vector<16x64xi1>
    %415 = arith.select %414, %406, %404 : vector<16x64xi1>, vector<16x64xf32>
    %c5_123 = arith.constant 5 : index
    %c0_124 = arith.constant 0 : index
    %c0_125 = arith.constant 0 : index
    %416 = vector.load %arg10[%c5_123, %c0_124, %c0_125] : memref<8x16x64xf32, #tpu.memory_space<vmem>>, vector<1x16x64xf32>
    %417 = vector.shape_cast %416 : vector<1x16x64xf32> to vector<16x64xf32>
    %418 = vector.shape_cast %415 : vector<16x64xf32> to vector<1x16x64xf32>
    tpu.vector_store %arg10[%c5_123, %c0_124, %c0_125], %418 {strides = array<i32>} : memref<8x16x64xf32, #tpu.memory_space<vmem>>, vector<1x16x64xf32>,
    %c3_126 = arith.constant 3 : index
    %c0_127 = arith.constant 0 : index
    %c0_128 = arith.constant 0 : index
    %419 = vector.load %arg10[%c3_126, %c0_127, %c0_128] : memref<8x16x64xf32, #tpu.memory_space<vmem>>, vector<1x16x64xf32>
    %420 = vector.shape_cast %419 : vector<1x16x64xf32> to vector<16x64xf32>
    %c4_129 = arith.constant 4 : index
    %c0_130 = arith.constant 0 : index
    %c0_131 = arith.constant 0 : index
    %421 = vector.load %arg10[%c4_129, %c0_130, %c0_131] : memref<8x16x64xf32, #tpu.memory_space<vmem>>, vector<1x16x64xf32>
    %422 = vector.shape_cast %421 : vector<1x16x64xf32> to vector<16x64xf32>
    %423 = vector.shape_cast %370 : vector<1x64xi1> to vector<1x64xi1>
    %424 = vector.broadcast %423 : vector<1x64xi1> to vector<16x64xi1>
    %425 = arith.select %424, %420, %422 : vector<16x64xi1>, vector<16x64xf32>
    %c3_132 = arith.constant 3 : index
    %c0_133 = arith.constant 0 : index
    %c0_134 = arith.constant 0 : index
    %426 = vector.load %arg10[%c3_132, %c0_133, %c0_134] : memref<8x16x64xf32, #tpu.memory_space<vmem>>, vector<1x16x64xf32>
    %427 = vector.shape_cast %426 : vector<1x16x64xf32> to vector<16x64xf32>
    %428 = vector.shape_cast %425 : vector<16x64xf32> to vector<1x16x64xf32>
    tpu.vector_store %arg10[%c3_132, %c0_133, %c0_134], %428 {strides = array<i32>} : memref<8x16x64xf32, #tpu.memory_space<vmem>>, vector<1x16x64xf32>,
    %429 = vector.shape_cast %370 : vector<1x64xi1> to vector<1x64xi1>
    %430 = vector.broadcast %429 : vector<1x64xi1> to vector<16x64xi1>
    %431 = arith.select %430, %422, %420 : vector<16x64xi1>, vector<16x64xf32>
    %c4_135 = arith.constant 4 : index
    %c0_136 = arith.constant 0 : index
    %c0_137 = arith.constant 0 : index
    %432 = vector.load %arg10[%c4_135, %c0_136, %c0_137] : memref<8x16x64xf32, #tpu.memory_space<vmem>>, vector<1x16x64xf32>
    %433 = vector.shape_cast %432 : vector<1x16x64xf32> to vector<16x64xf32>
    %434 = vector.shape_cast %431 : vector<16x64xf32> to vector<1x16x64xf32>
    tpu.vector_store %arg10[%c4_135, %c0_136, %c0_137], %434 {strides = array<i32>} : memref<8x16x64xf32, #tpu.memory_space<vmem>>, vector<1x16x64xf32>,
    %c0_138 = arith.constant 0 : index
    %c0_139 = arith.constant 0 : index
    %c0_140 = arith.constant 0 : index
    %435 = vector.load %arg10[%c0_138, %c0_139, %c0_140] : memref<8x16x64xf32, #tpu.memory_space<vmem>>, vector<8x16x64xf32>
    %c0_141 = arith.constant 0 : index
    %c0_142 = arith.constant 0 : index
    %436 = vector.load %arg6[%c0_141, %c0_142] : memref<1x64xf32, #tpu.memory_space<vmem>>, vector<1x64xf32>
    %437 = vector.shape_cast %436 : vector<1x64xf32> to vector<1x1x64xf32>
    %438 = vector.broadcast %437 : vector<1x1x64xf32> to vector<8x16x64xf32>
    %439 = arith.mulf %435, %438 : vector<8x16x64xf32>
    %cst_143 = arith.constant dense<0.000000e+00> : vector<8x16xf32>
    %440 = vector.multi_reduction <add>, %439, %cst_143 [2] : vector<8x16x64xf32> to vector<8x16xf32>
    %441 = vector.shape_cast %440 : vector<8x16xf32> to vector<8x16x1xf32>
    %c0_144 = arith.constant 0 : index
    %c0_145 = arith.constant 0 : index
    %442 = vector.load %arg7[%c0_144, %c0_145] : memref<1x1xf32, #tpu.memory_space<vmem>>, vector<1x1xf32>
    %443 = vector.shape_cast %442 : vector<1x1xf32> to vector<1x1x1xf32>
    %444 = vector.broadcast %443 : vector<1x1x1xf32> to vector<8x16x1xf32>
    %445 = arith.addf %441, %444 : vector<8x16x1xf32>
    %446 = math.tanh %445 : vector<8x16x1xf32>
    %cst_146 = arith.constant dense<0xFF800000> : vector<16x1xf32>
    %447 = vector.multi_reduction <maximumf>, %446, %cst_146 [0] : vector<8x16x1xf32> to vector<16x1xf32>
    %448 = vector.shape_cast %447 : vector<16x1xf32> to vector<1x16x1xf32>
    %449 = vector.broadcast %448 : vector<1x16x1xf32> to vector<8x16x1xf32>
    %450 = arith.subf %446, %449 : vector<8x16x1xf32>
    %451 = math.exp %450 : vector<8x16x1xf32>
    %cst_147 = arith.constant dense<0.000000e+00> : vector<16x1xf32>
    %452 = vector.multi_reduction <add>, %451, %cst_147 [0] : vector<8x16x1xf32> to vector<16x1xf32>
    %453 = vector.shape_cast %452 : vector<16x1xf32> to vector<1x16x1xf32>
    %454 = tpu.reciprocal %453 {approx = true} : vector<1x16x1xf32> -> vector<1x16x1xf32>
    %455 = vector.broadcast %454 : vector<1x16x1xf32> to vector<8x16x1xf32>
    %456 = arith.mulf %451, %455 : vector<8x16x1xf32>
    %457 = vector.broadcast %456 : vector<8x16x1xf32> to vector<8x16x64xf32>
    %458 = arith.mulf %435, %457 : vector<8x16x64xf32>
    %cst_148 = arith.constant dense<0.000000e+00> : vector<16x64xf32>
    %459 = vector.multi_reduction <add>, %458, %cst_148 [0] : vector<8x16x64xf32> to vector<16x64xf32>
    %c0_149 = arith.constant 0 : index
    %c0_150 = arith.constant 0 : index
    %460 = vector.load %arg8[%c0_149, %c0_150] : memref<16x64xf32, #tpu.memory_space<vmem>>, vector<16x64xf32>
    tpu.vector_store %arg8[%c0_149, %c0_150], %459 {strides = array<i32>} : memref<16x64xf32, #tpu.memory_space<vmem>>, vector<16x64xf32>,
    return
  }
  func.func @transform_0(%arg0: i32) -> (i32, i32, i32) {
    %c0_i32 = arith.constant 0 : i32
    %c0_i32_0 = arith.constant 0 : i32
    %c0_i32_1 = arith.constant 0 : i32
    return %c0_i32, %arg0, %c0_i32_0 : i32, i32, i32
  }
  func.func @transform_1(%arg0: i32) -> (i32, i32) {
    %c0_i32 = arith.constant 0 : i32
    %c0_i32_0 = arith.constant 0 : i32
    %c0_i32_1 = arith.constant 0 : i32
    return %c0_i32, %c0_i32_0 : i32, i32
  }
  func.func @transform_2(%arg0: i32) -> (i32, i32) {
    %c0_i32 = arith.constant 0 : i32
    %c0_i32_0 = arith.constant 0 : i32
    %c0_i32_1 = arith.constant 0 : i32
    return %c0_i32, %c0_i32_0 : i32, i32
  }
  func.func @transform_3(%arg0: i32) -> (i32, i32) {
    %c0_i32 = arith.constant 0 : i32
    %c0_i32_0 = arith.constant 0 : i32
    %c0_i32_1 = arith.constant 0 : i32
    return %c0_i32, %c0_i32_0 : i32, i32
  }
  func.func @transform_4(%arg0: i32) -> (i32, i32) {
    %c0_i32 = arith.constant 0 : i32
    %c0_i32_0 = arith.constant 0 : i32
    %c0_i32_1 = arith.constant 0 : i32
    return %c0_i32, %c0_i32_0 : i32, i32
  }
  func.func @transform_5(%arg0: i32) -> (i32, i32) {
    %c0_i32 = arith.constant 0 : i32
    %c0_i32_0 = arith.constant 0 : i32
    %c0_i32_1 = arith.constant 0 : i32
    return %c0_i32, %c0_i32_0 : i32, i32
  }
  func.func @transform_6(%arg0: i32) -> (i32, i32) {
    %c0_i32 = arith.constant 0 : i32
    %c0_i32_0 = arith.constant 0 : i32
    %c0_i32_1 = arith.constant 0 : i32
    return %c0_i32, %c0_i32_0 : i32, i32
  }
  func.func @transform_7(%arg0: i32) -> (i32, i32) {
    %c0_i32 = arith.constant 0 : i32
    %c0_i32_0 = arith.constant 0 : i32
    return %arg0, %c0_i32 : i32, i32
  }
}

</mosaic_0001>

<bundles_post_ra>
// kernel: hierarchical_attention_gru.2
= control target key start
LH: loop header
LB: loop body
LE: loop exit
PB: predicated region body
PF: predicated region fallthrough
CT: control target
= control target key end

     0   :  { %v1921_v1 = vmov 0   ;;  %vm109_vm0 = vcmask 130048   ;;  %v49_v30 = vlaneseq  ;;  %vm287_vm3 = vcmask 523264   ;;  %s2699_s1 = inlined_call_operand.vmem [shape: bf16[16,192], index: 1, kind: input, shape index: {}]   ;;  %s2700_s0 = inlined_call_operand.vmem [shape: bf16[8,16,16], index: 0, kind: input, shape index: {}]   ;;  %s2701_s3 = inlined_call_operand.vmem [shape: bf16[64,192], index: 3, kind: input, shape index: {}]   ;;  %s2702_s2 = inlined_call_operand.vmem [shape: f32[1,192], index: 2, kind: input, shape index: {}]   ;;  %s2703_s4 = inlined_call_operand.vmem [shape: f32[1,64], index: 4, kind: input, shape index: {}]   ;;  %s2704_s6 = inlined_call_operand.<no memory space> [shape: f32[1,1], index: 6, kind: input, shape index: {}]   ;;  %s2705_s5 = inlined_call_operand.vmem [shape: f32[1,64], index: 5, kind: input, shape index: {}]   ;;  %s2706_s7 = inlined_call_operand.vmem [shape: f32[16,64], index: 7, kind: output, shape index: {}]  }
   0x1   :  { %v1734_v0 = vld [vmem:[%s2699_s1 + $0x4] ss:$8 sps:$4 sm:$0xff]   ;;  %166 = vmatprep.mubr.bf16.mxu0 %v1921_v1  ;;  %448 = vmatprep.mubr.bf16.mxu1 %v1921_v1  ;;  %v1736_v2 = vld [vmem:[%s2699_s1] ss:$8 sps:$4 sm:$0xff]   ;;  %v1995_v7 = vld [vmem:[%s2701_s3 + $0x14] ss:$8 sps:$4 sm:$0xff]  }
   0x2   :  { %1733 = vset.pattern.permute.xlu1 %v1921_v1  ;;  %1732 = vset.pattern.permute.xlu0 %v1921_v1  ;;  %v1737_v3 = vld [vmem:[%s2700_s0] sm:$0xff]   ;;  %v1738_v6 = vld [vmem:[%s2700_s0 + $0x8] sm:$0xff]   ;;  %v2002_v8 = vld [vmem:[%s2701_s3 + $0x10] ss:$8 sps:$4 sm:$0xff]   ;;  %v2097_v32 = vand.u32 127, %v49_v30  ;;  %v50_v35 = vshrl.u32 %v49_v30, 7 }
   0x3   :  { %134 = vmatprep.subr.bf16.mxu0 %v1734_v0  ;;  %v1981_v4 = vld [vmem:[%s2701_s3 + $0x4] ss:$8 sps:$4 sm:$0xff]   ;;  %v1986_v5 = vld [vmem:[%s2701_s3] ss:$8 sps:$4 sm:$0xff]   ;;  %v2025_v11 = vld [vmem:[%s2701_s3 + $0x34] ss:$8 sps:$4 sm:$0xff]  }
   0x4   :  { %135 = vmatpush1.bf16.msra.mxu0 %v1736_v2  ;;  %416 = vmatprep.subr.bf16.mxu1 %v1981_v4  ;;  %v2009_v9 = vld [vmem:[%s2701_s3 + $0x24] ss:$8 sps:$4 sm:$0xff]   ;;  %v2018_v10 = vld [vmem:[%s2701_s3 + $0x20] ss:$8 sps:$4 sm:$0xff]   ;;  %v1739_v12 = vld [vmem:[%s2700_s0 + $0x10] sm:$0xff]   ;;  %v249_v40 = vadd.s32 128, %v2097_v32 }
   0x5   :  { %835 = vmatprep.subr.bf16.mxu0 %v1981_v4  ;;  %417 = vmatpush1.bf16.msra.mxu1 %v1986_v5  ;;  %v2035_v13 = vld [vmem:[%s2701_s3 + $0x30] ss:$8 sps:$4 sm:$0xff]   ;;  %v1741_v15 = vld [vmem:[%s2700_s0 + $0x20] sm:$0xff]   ;;  %v1742_v16 = vld [vmem:[%s2700_s0 + $0x28] sm:$0xff]   ;;  %v51_v42 = vsub.s32 0, %v50_v35  ;;  %v55_v45 = vsub.s32 1, %v50_v35 }
   0x6   :  { %418 = vmatprep.subr.bf16.mxu1 %v1995_v7  ;;  %v1740_v14 = vld [vmem:[%s2700_s0 + $0x18] sm:$0xff]   ;;  %v1743_v17 = vld [vmem:[%s2700_s0 + $0x30] sm:$0xff]   ;;  %v47_v44 = vld [vmem:[%s2702_s2] sm:$0x3]  ;;  %v254_v46 = vand.u32 63, %v2097_v32  ;;  %v261_v47 = vand.u32 63, %v249_v40 }
   0x7   :  { %1688 = vmatmul.mubr.msk.bf16.vlgmr.msra.gmra.mrb[0].mxu0 %vm109_vm0, %v1737_v3  ;;  %v1747_v18 = vld [vmem:[%s2700_s0 + $0x38] sm:$0xff]   ;;  %v2112_v48 = vrot.slane %v47_v44, %v51_v42  ;;  %v2114_v49 = vrot.slane %v47_v44, %v55_v45  ;;  %vm1242_vm4 = vcmp.lt.s32.totalorder %v2097_v32, 32  ;;  %vm1419_vm5 = vcmask 7168  }
   0x8   :  { %176 = vmatprep.mubr.bf16.mxu0 %v1921_v1  ;;  %836 = vmatpush1.bf16.msra.mxu0 %v1986_v5  ;;  %vm2116_vm1 = vcmp.lt.s32.totalorder %v254_v46, 32  ;;  %vm2122_vm2 = vcmp.lt.s32.totalorder %v261_v47, 32 }
   0x9   :  { %837 = vmatprep.subr.bf16.mxu0 %v1995_v7  ;;  %419 = vmatpush1.bf16.msra.mxu1 %v2002_v8 }
   0xa   :  { %420 = vmatprep.subr.bf16.mxu1 %v2009_v9 }
   0xc   :  { %838 = vmatpush1.bf16.msra.mxu0 %v2002_v8 }
   0xd   :  { %839 = vmatprep.subr.bf16.mxu0 %v2009_v9  ;;  %421 = vmatpush1.bf16.msra.mxu1 %v2018_v10 }
   0xe   :  { %422 = vmatprep.subr.bf16.mxu1 %v2025_v11 }
   0xf   :  { %1689 = vmatmul.mubr.msk.bf16.gmra.mrb[4].mxu0 %vm109_vm0, %v1738_v6 }
  0x10   :  { %186 = vmatprep.mubr.bf16.mxu0 %v1921_v1  ;;  %840 = vmatpush1.bf16.msra.mxu0 %v2018_v10 }
  0x11   :  { %841 = vmatprep.subr.bf16.mxu0 %v2025_v11  ;;  %423 = vmatpush1.bf16.msra.mxu1 %v2035_v13 }
  0x12   :  { %520 = vmatprep.subr.bf16.mxu1 %v1981_v4 }
  0x14   :  { %842 = vmatpush1.bf16.msra.mxu0 %v2035_v13  ;;  %449 = vmatmul.mubr.bf16.vlgmr.msra.gmra.mrb[0].mxu1 %v1921_v1 }
  0x15   :  { %1045 = vmatprep.subr.bf16.mxu0 %v1981_v4  ;;  %521 = vmatpush1.bf16.msra.mxu1 %v1986_v5 }
  0x16   :  { %552 = vmatprep.mubr.bf16.mxu1 %v1921_v1  ;;  %522 = vmatprep.subr.bf16.mxu1 %v1995_v7 }
  0x17   :  { %1690 = vmatmul.mubr.msk.bf16.gmra.mrb[8].mxu0 %vm109_vm0, %v1739_v12 }
  0x18   :  { %196 = vmatprep.mubr.bf16.mxu0 %v1921_v1 }
  0x19   :  { %523 = vmatpush1.bf16.msra.mxu1 %v2002_v8 }
  0x1a   :  { %524 = vmatprep.subr.bf16.mxu1 %v2009_v9 }
  0x1d   :  { %525 = vmatpush1.bf16.msra.mxu1 %v2018_v10 }
  0x1e   :  { %526 = vmatprep.subr.bf16.mxu1 %v2025_v11 }
  0x1f   :  { %1691 = vmatmul.mubr.msk.bf16.gmra.mrb[12].mxu0 %vm109_vm0, %v1740_v14 }
  0x20   :  { %206 = vmatprep.mubr.bf16.mxu0 %v1921_v1 }
  0x21   :  { %527 = vmatpush1.bf16.msra.mxu1 %v2035_v13 }
  0x22   :  { %625 = vmatprep.subr.bf16.mxu1 %v1981_v4 }
  0x27   :  { %1692 = vmatmul.mubr.msk.bf16.gmra.mrb[16].mxu0 %vm109_vm0, %v1741_v15 }
  0x28   :  { %216 = vmatprep.mubr.bf16.mxu0 %v1921_v1 }
  0x2f   :  { %1693 = vmatmul.mubr.msk.bf16.gmra.mrb[20].mxu0 %vm109_vm0, %v1742_v16 }
  0x30   :  { %226 = vmatprep.mubr.bf16.mxu0 %v1921_v1 }
  0x37   :  { %1694 = vmatmul.mubr.msk.bf16.gmra.mrb[24].mxu0 %vm109_vm0, %v1743_v17 }
  0x38   :  { %236 = vmatprep.mubr.bf16.mxu0 %v1921_v1 }
  0x3f   :  { %1695 = vmatmul.mubr.msk.bf16.gmra.mrb[28].mxu0 %vm109_vm0, %v1747_v18 }
  0x40   :  { %867 = vmatprep.mubr.bf16.mxu0 %v1921_v1 }
  0xda   :  { %v2081_v19 = vpop.f32.mrb[0].mxu0 }
  0xdb   :  { %v2083_v20 = vpop.f32.mrb[1].mxu0 }
  0xdc   :  { %v2085_v21 = vpop.f32.mrb[2].mxu0 }
  0xdd   :  { %v2087_v22 = vpop.f32.mrb[3].mxu0 }
  0xe2   :  { %v2089_v23 = vpop.f32.mrb[4].mxu0 }
  0xe3   :  { %v2091_v24 = vpop.f32.mrb[5].mxu0 }
  0xe4   :  { %v2093_v25 = vpop.f32.mrb[6].mxu0 }
  0xe5   :  { %v2095_v26 = vpop.f32.mrb[7].mxu0 }
  0xe7   :  { %v2099_v33 = vpop.f32.mrb[0].mxu1 }
  0xe8   :  { %v2101_v34 = vpop.f32.mrb[1].mxu1 }
  0xe9   :  { %v2103_v36 = vpop.f32.mrb[2].mxu1 }
  0xea   :  { %v188_v27 = vpop.f32.mrb[8].mxu0  ;;  %v2105_v38 = vpop.f32.mrb[3].mxu1 }
  0xeb   :  { %v190_v28 = vpop.f32.mrb[9].mxu0 }
  0xec   :  { %v192_v29 = vpop.f32.mrb[10].mxu0  ;;  %v191_v42 = vadd.f32 %v190_v28, %v2114_v49 }
  0xed   :  { %v194_v31 = vpop.f32.mrb[11].mxu0  ;;  %v193_v45 = vadd.f32 %v192_v29, %v2112_v48 }
  0xf2   :  { %v198_v37 = vpop.f32.mrb[12].mxu0 }
  0xf3   :  { %v200_v39 = vpop.f32.mrb[13].mxu0  ;;  %v199_v52 = vadd.f32 %v198_v37, %v2112_v48 }
  0xf4   :  { %v202_v41 = vpop.f32.mrb[14].mxu0  ;;  %v201_v56 = vadd.f32 %v200_v39, %v2114_v49  ;;  %v189_v39 = vadd.f32 %v188_v27, %v2112_v48 }
  0xf5   :  { %v204_v43 = vpop.f32.mrb[15].mxu0  ;;  %v203_v59 = vadd.f32 %v202_v41, %v2112_v48 }
  0xf6   :  { %v205_v0 = vadd.f32 %v204_v43, %v2114_v49 }
  0xfa   :  { %v208_v50 = vpop.f32.mrb[16].mxu0 }
  0xfb   :  { %v209_v53 = vadd.f32 %v208_v50, %v2112_v48  ;;  %v210_v54 = vpop.f32.mrb[17].mxu0 }
  0xfc   :  { %v211_v57 = vadd.f32 %v210_v54, %v2114_v49  ;;  %v212_v58 = vpop.f32.mrb[18].mxu0 }
  0xfd   :  { %v307_v60 = vsel %vm2116_vm1, %v199_v52, %v209_v53  ;;  %v316_v61 = vsel %vm2116_vm1, %v209_v53, %v199_v52  ;;  %v213_v62 = vadd.f32 %v212_v58, %v2112_v48  ;;  %v214_v63 = vpop.f32.mrb[19].mxu0  ;;  %v195_v52 = vadd.f32 %v194_v31, %v2114_v49 }
  0xfe   :  { %v308_v2 = vsel %vm2122_vm2, %v201_v56, %v211_v57  ;;  %v317_v3 = vsel %vm2122_vm2, %v211_v57, %v201_v56  ;;  %v215_v6 = vadd.f32 %v214_v63, %v2114_v49  ;;  %v179_v63 = vadd.f32 %v2089_v23, %v2112_v48 }
  0xff   :  { %v309_v12 = vsel %vm2116_vm1, %v203_v59, %v213_v62  ;;  %v318_v14 = vsel %vm2116_vm1, %v213_v62, %v203_v59 }
 0x100   :  { %v2144_v15 = vpack.c.bf16 %v309_v12, %v307_v60  ;;  %v2146_v16 = vpack.c.bf16 %v318_v14, %v316_v61  ;;  %v310_v17 = vsel %vm2122_vm2, %v205_v0, %v215_v6  ;;  %v319_v18 = vsel %vm2122_vm2, %v215_v6, %v205_v0 }
 0x101   :  { %v312_v30 = vpack.c.bf16 %v310_v17, %v308_v2  ;;  %v321_v35 = vpack.c.bf16 %v319_v18, %v317_v3  ;;  %v181_v3 = vadd.f32 %v2091_v24, %v2114_v49  ;;  %v183_v14 = vadd.f32 %v2093_v25, %v2112_v48 }
 0x102   :  { %v218_v37 = vpop.f32.mrb[20].mxu0 }
 0x103   :  { %315 = vst.msk [vmem:[#allocation2 + $0x38] sm:$0xff] %vm287_vm3, %v312_v30  ;;  %324 = vst.msk [vmem:[#allocation2 + $0x48] sm:$0xff] %vm287_vm3, %v321_v35  ;;  %v219_v40 = vadd.f32 %v218_v37, %v2112_v48  ;;  %v220_v41 = vpop.f32.mrb[21].mxu0  ;;  %v185_v35 = vadd.f32 %v2095_v26, %v2114_v49 }
 0x104   :  { %v221_v43 = vadd.f32 %v220_v41, %v2114_v49  ;;  %v222_v44 = vpop.f32.mrb[22].mxu0 }
 0x105   :  { %v298_v46 = vsel %vm2116_vm1, %v189_v39, %v219_v40  ;;  %v325_v27 = vsel %vm2116_vm1, %v219_v40, %v189_v39  ;;  %v223_v47 = vadd.f32 %v222_v44, %v2112_v48  ;;  %v224_v50 = vpop.f32.mrb[23].mxu0 }
 0x106   :  { %v299_v53 = vsel %vm2122_vm2, %v191_v42, %v221_v43  ;;  %v326_v28 = vsel %vm2122_vm2, %v221_v43, %v191_v42  ;;  %v225_v54 = vadd.f32 %v224_v50, %v2114_v49 }
 0x107   :  { %v300_v29 = vsel %vm2116_vm1, %v193_v45, %v223_v47  ;;  %v327_v56 = vsel %vm2116_vm1, %v223_v47, %v193_v45 }
 0x108   :  { %v2174_v57 = vpack.c.bf16 %v300_v29, %v298_v46  ;;  %v2176_v58 = vpack.c.bf16 %v327_v56, %v325_v27  ;;  %v301_v31 = vsel %vm2122_vm2, %v195_v52, %v225_v54  ;;  %v328_v59 = vsel %vm2122_vm2, %v225_v54, %v195_v52 }
 0x109   :  { %v303_v60 = vpack.c.bf16 %v301_v31, %v299_v53  ;;  %v330_v61 = vpack.c.bf16 %v328_v59, %v326_v28  ;;  %v169_v27 = vadd.f32 %v2081_v19, %v2112_v48  ;;  %v171_v52 = vadd.f32 %v2083_v20, %v2114_v49 }
 0x10a   :  { %v228_v62 = vpop.f32.mrb[24].mxu0  ;;  %v173_v54 = vadd.f32 %v2085_v21, %v2112_v48  ;;  %v175_v59 = vadd.f32 %v2087_v22, %v2114_v49 }
 0x10b   :  { %306 = vst.msk [vmem:[#allocation2 + $0x28] sm:$0xff] %vm287_vm3, %v303_v60  ;;  %333 = vst.msk [vmem:[#allocation2 + $0x58] sm:$0xff] %vm287_vm3, %v330_v61  ;;  %v229_v0 = vadd.f32 %v228_v62, %v2112_v48  ;;  %v230_v2 = vpop.f32.mrb[25].mxu0 }
 0x10c   :  { %v231_v6 = vadd.f32 %v230_v2, %v2114_v49  ;;  %v232_v12 = vpop.f32.mrb[26].mxu0 }
 0x10d   :  { %v289_v17 = vsel %vm2116_vm1, %v179_v63, %v229_v0  ;;  %v334_v23 = vsel %vm2116_vm1, %v229_v0, %v179_v63  ;;  %v233_v18 = vadd.f32 %v232_v12, %v2112_v48  ;;  %v234_v30 = vpop.f32.mrb[27].mxu0 }
 0x10e   :  { %v290_v24 = vsel %vm2122_vm2, %v181_v3, %v231_v6  ;;  %v335_v37 = vsel %vm2122_vm2, %v231_v6, %v181_v3  ;;  %v235_v25 = vadd.f32 %v234_v30, %v2114_v49 }
 0x10f   :  { %v291_v39 = vsel %vm2116_vm1, %v183_v14, %v233_v18  ;;  %v336_v40 = vsel %vm2116_vm1, %v233_v18, %v183_v14 }
 0x110   :  { %v2208_v41 = vpack.c.bf16 %v291_v39, %v289_v17  ;;  %v2210_v42 = vpack.c.bf16 %v336_v40, %v334_v23  ;;  %v292_v26 = vsel %vm2122_vm2, %v185_v35, %v235_v25  ;;  %v337_v43 = vsel %vm2122_vm2, %v235_v25, %v185_v35  ;;  %v2255_v35 = vld [vmem:[%s2703_s4] ss:$0 sm:$0xff]  ;;  %s1922_s4 = smov 64  }
 0x111   :  { %v294_v44 = vpack.c.bf16 %v292_v26, %v290_v24  ;;  %v339_v45 = vpack.c.bf16 %v337_v43, %v335_v37  ;;  %v474_v37 = vadd.f32 %v2255_v35, %v2105_v38 }
 0x112   :  { %v238_v46 = vpop.f32.mrb[28].mxu0 }
 0x113   :  { %297 = vst.msk [vmem:[#allocation2 + $0x18] sm:$0xff] %vm287_vm3, %v294_v44  ;;  %342 = vst.msk [vmem:[#allocation2 + $0x68] sm:$0xff] %vm287_vm3, %v339_v45  ;;  %v239_v47 = vadd.f32 %v238_v46, %v2112_v48  ;;  %v240_v50 = vpop.f32.mrb[29].mxu0 }
 0x114   :  { %v241_v53 = vadd.f32 %v240_v50, %v2114_v49  ;;  %v242_v28 = vpop.f32.mrb[30].mxu0 }
 0x115   :  { %v280_v29 = vsel %vm2116_vm1, %v169_v27, %v239_v47  ;;  %v343_v19 = vsel %vm2116_vm1, %v239_v47, %v169_v27  ;;  %v243_v56 = vadd.f32 %v242_v28, %v2112_v48  ;;  %v244_v31 = vpop.f32.mrb[31].mxu0 }
 0x116   :  { %v281_v20 = vsel %vm2122_vm2, %v171_v52, %v241_v53  ;;  %v344_v60 = vsel %vm2122_vm2, %v241_v53, %v171_v52  ;;  %v245_v21 = vadd.f32 %v244_v31, %v2114_v49 }
 0x117   :  { %v282_v61 = vsel %vm2116_vm1, %v173_v54, %v243_v56  ;;  %v345_v62 = vsel %vm2116_vm1, %v243_v56, %v173_v54 }
 0x118   :  { %v284_v63 = vpack.c.bf16 %v282_v61, %v280_v29  ;;  %v2242_v48 = vpack.c.bf16 %v345_v62, %v343_v19  ;;  %v283_v22 = vsel %vm2122_vm2, %v175_v59, %v245_v21  ;;  %v346_v0 = vsel %vm2122_vm2, %v245_v21, %v175_v59 }
 0x119   :  { %v285_v2 = vpack.c.bf16 %v283_v22, %v281_v20  ;;  %v348_v3 = vpack.c.bf16 %v346_v0, %v344_v60  ;;  %v509_v59 = vunpack.c.l.bf16 %v2208_v41  ;;  %v511_v61 = vunpack.c.h.bf16 %v2208_v41 }
 0x11a   :  { %v369_v6 = vunpack.c.l.bf16 %v284_v63  ;;  %v371_v12 = vunpack.c.h.bf16 %v284_v63 }
 0x11b   :  { %288 = vst.msk [vmem:[#allocation2 + $0x8] sm:$0xff] %vm287_vm3, %v285_v2  ;;  %351 = vst.msk [vmem:[#allocation2 + $0x78] sm:$0xff] %vm287_vm3, %v348_v3 }
 0x11c   :  { %v459_v49 = vadd.f32 %v2099_v33, %v369_v6  ;;  %v460_v51 = vadd.f32 %v2103_v36, %v371_v12  ;;  %v473_v33 = vadd.f32 %v2255_v35, %v2101_v34 }
 0x11e   :  { %v1705_v14 = vmul.f32 -1.442695, %v459_v49  ;;  %v1706_v17 = vmul.f32 -1.442695, %v460_v51  ;;  %v508_v51 = vld [vmem:[#allocation2 + $0x18] sm:$0xff] }
 0x120   :  { %1757 = vpow2.f32 %v1705_v14 }
 0x121   :  { %1759 = vpow2.f32 %v1706_v17 }
 0x122   :  { %v368_v24 = vld [vmem:[#allocation2 + $0x8] sm:$0xff] }
 0x123   :  { %v370_v39 = vunpack.c.l.bf16 %v368_v24  ;;  %v372_v44 = vunpack.c.h.bf16 %v368_v24  ;;  %v512_v24 = vunpack.c.h.bf16 %v508_v51 }
 0x12a   :  { %v1758_v23 = vpop.eup %1757 }
 0x12b   :  { %v1760_v18 = vpop.eup %1759  ;;  %v467_v55 = vadd.f32 1.0, %v1758_v23  ;;  %v510_v23 = vunpack.c.l.bf16 %v508_v51 }
 0x12c   :  { %v468_v30 = vadd.f32 1.0, %v1760_v18 }
 0x12d   :  { %1761 = vrcp.f32 %v467_v55 }
 0x12e   :  { %1763 = vrcp.f32 %v468_v30 }
 0x137   :  { %v1762_v36 = vpop.eup %1761 }
 0x138   :  { %v1764_v25 = vpop.eup %1763  ;;  %v475_v40 = vmul.f32 %v1762_v36, %v473_v33  ;;  %v481_v47 = vsub.f32 1.0, %v1762_v36  ;;  %v493_v53 = vmul.f32 0.0, %v1762_v36 }
 0x139   :  { %v476_v26 = vmul.f32 %v1764_v25, %v474_v37  ;;  %v482_v38 = vsub.f32 1.0, %v1764_v25  ;;  %v494_v28 = vmul.f32 0.0, %v1764_v25 }
 0x13a   :  { %v477_v43 = vadd.f32 %v475_v40, %v370_v39 }
 0x13b   :  { %v478_v45 = vadd.f32 %v476_v26, %v372_v44 }
 0x13c   :  { %1765 = vtanh.f32 %v477_v43 }
 0x13d   :  { %1767 = vtanh.f32 %v478_v45 }
 0x146   :  { %v1766_v46 = vpop.eup %1765 }
 0x147   :  { %485 = vrot.lane.b32.xlu0 %v1766_v46, %s1922_s4  ;;  %v1768_v27 = vpop.eup %1767 }
 0x14b   :  { %487 = vrot.lane.b32.xlu0 %v1768_v27, %s1922_s4 }
 0x1b9   :  { %v486_v34 = vpop.permute.xlu0 %485 }
 0x1ba   :  { %v491_v50 = vmul.f32 %v486_v34, %v481_v47 }
 0x1bc   :  { %v2263_v29 = vadd.f32 %v493_v53, %v491_v50 }
 0x1bd   :  { %v488_v52 = vpop.permute.xlu0 %487 }
 0x1be   :  { %v492_v54 = vmul.f32 %v488_v52, %v482_v38  ;;  %v614_v52 = vunpack.c.l.bf16 %v2174_v57 }
 0x1c0   :  { %v2265_v19 = vadd.f32 %v494_v28, %v492_v54 }
 0x1c2   :  { %v513_v56 = vpack.c.bf16 %v2265_v19, %v2263_v29 }
 0x1c4   :  { %515 = vrot.lane.b32.xlu1 %v513_v56, %s1922_s4  ;;  %v616_v56 = vunpack.c.h.bf16 %v2174_v57 }
 0x236   :  { %v516_v31 = vpop.permute.xlu1 %515 }
 0x237   :  { %1707 = vmatmul.mubr.msk.bf16.vlgmr.msra.gmra.mrb[4].mxu1 %vm287_vm3, %v516_v31 }
 0x238   :  { %626 = vmatpush1.bf16.msra.mxu1 %v1986_v5  ;;  %657 = vmatprep.mubr.bf16.mxu1 %v1921_v1 }
 0x239   :  { %627 = vmatprep.subr.bf16.mxu1 %v1995_v7 }
 0x23c   :  { %628 = vmatpush1.bf16.msra.mxu1 %v2002_v8 }
 0x23d   :  { %629 = vmatprep.subr.bf16.mxu1 %v2009_v9 }
 0x240   :  { %630 = vmatpush1.bf16.msra.mxu1 %v2018_v10 }
 0x241   :  { %631 = vmatprep.subr.bf16.mxu1 %v2025_v11 }
 0x244   :  { %632 = vmatpush1.bf16.msra.mxu1 %v2035_v13 }
 0x245   :  { %730 = vmatprep.subr.bf16.mxu1 %v1981_v4 }
 0x30a   :  { %v554_v20 = vpop.f32.mrb[4].mxu1 }
 0x30b   :  { %v563_v60 = vadd.f32 %v554_v20, %v509_v59  ;;  %v556_v21 = vpop.f32.mrb[5].mxu1 }
 0x30c   :  { %v558_v62 = vpop.f32.mrb[6].mxu1  ;;  %v577_v14 = vadd.f32 %v2255_v35, %v556_v21 }
 0x30d   :  { %v1708_v63 = vmul.f32 -1.442695, %v563_v60  ;;  %v564_v22 = vadd.f32 %v558_v62, %v511_v61  ;;  %v560_v0 = vpop.f32.mrb[7].mxu1 }
 0x30e   :  { %v578_v41 = vadd.f32 %v2255_v35, %v560_v0  ;;  %v613_v0 = vld [vmem:[#allocation2 + $0x28] sm:$0xff] }
 0x30f   :  { %1769 = vpow2.f32 %v1708_v63  ;;  %v1709_v2 = vmul.f32 -1.442695, %v564_v22 }
 0x311   :  { %1771 = vpow2.f32 %v1709_v2 }
 0x319   :  { %v1770_v3 = vpop.eup %1769 }
 0x31a   :  { %v571_v6 = vadd.f32 1.0, %v1770_v3 }
 0x31b   :  { %v1772_v12 = vpop.eup %1771 }
 0x31c   :  { %1773 = vrcp.f32 %v571_v6  ;;  %v572_v49 = vadd.f32 1.0, %v1772_v12  ;;  %v615_v6 = vunpack.c.l.bf16 %v613_v0 }
 0x31e   :  { %1775 = vrcp.f32 %v572_v49 }
 0x326   :  { %v1774_v17 = vpop.eup %1773 }
 0x327   :  { %v579_v18 = vmul.f32 %v1774_v17, %v577_v14  ;;  %v585_v39 = vsub.f32 1.0, %v1774_v17  ;;  %v597_v45 = vmul.f32 %v1774_v17, %v2263_v29  ;;  %v617_v14 = vunpack.c.h.bf16 %v613_v0 }
 0x328   :  { %v1776_v55 = vpop.eup %1775 }
 0x329   :  { %v581_v30 = vadd.f32 %v579_v18, %v510_v23  ;;  %v580_v33 = vmul.f32 %v1776_v55, %v578_v41  ;;  %v586_v43 = vsub.f32 1.0, %v1776_v55  ;;  %v598_v46 = vmul.f32 %v1776_v55, %v2265_v19 }
 0x32b   :  { %1777 = vtanh.f32 %v581_v30  ;;  %v582_v36 = vadd.f32 %v580_v33, %v512_v24 }
 0x32d   :  { %1779 = vtanh.f32 %v582_v36 }
 0x335   :  { %v1778_v37 = vpop.eup %1777 }
 0x336   :  { %589 = vrot.lane.b32.xlu1 %v1778_v37, %s1922_s4 }
 0x337   :  { %v1780_v25 = vpop.eup %1779 }
 0x338   :  { %591 = vrot.lane.b32.xlu0 %v1780_v25, %s1922_s4 }
 0x3a8   :  { %v590_v40 = vpop.permute.xlu1 %589 }
 0x3a9   :  { %v595_v26 = vmul.f32 %v590_v40, %v585_v39 }
 0x3aa   :  { %v592_v44 = vpop.permute.xlu0 %591 }
 0x3ab   :  { %v596_v27 = vmul.f32 %v592_v44, %v586_v43  ;;  %v2288_v34 = vadd.f32 %v597_v45, %v595_v26  ;;  %v719_v45 = vunpack.c.l.bf16 %v2144_v15 }
 0x3ad   :  { %v2290_v47 = vadd.f32 %v598_v46, %v596_v27 }
 0x3af   :  { %v618_v50 = vpack.c.bf16 %v2290_v47, %v2288_v34 }
 0x3b1   :  { %620 = vrot.lane.b32.xlu1 %v618_v50, %s1922_s4 }
 0x423   :  { %v621_v38 = vpop.permute.xlu1 %620 }
 0x424   :  { %1710 = vmatmul.mubr.msk.bf16.vlgmr.msra.gmra.mrb[8].mxu1 %vm287_vm3, %v621_v38  ;;  %v721_v38 = vunpack.c.h.bf16 %v2144_v15 }
 0x425   :  { %731 = vmatpush1.bf16.msra.mxu1 %v1986_v5  ;;  %762 = vmatprep.mubr.bf16.mxu1 %v1921_v1 }
 0x426   :  { %732 = vmatprep.subr.bf16.mxu1 %v1995_v7 }
 0x429   :  { %733 = vmatpush1.bf16.msra.mxu1 %v2002_v8 }
 0x42a   :  { %734 = vmatprep.subr.bf16.mxu1 %v2009_v9 }
 0x42d   :  { %735 = vmatpush1.bf16.msra.mxu1 %v2018_v10 }
 0x42e   :  { %736 = vmatprep.subr.bf16.mxu1 %v2025_v11 }
 0x431   :  { %737 = vmatpush1.bf16.msra.mxu1 %v2035_v13 }
 0x432   :  { %940 = vmatprep.subr.bf16.mxu1 %v1981_v4 }
 0x4f7   :  { %v659_v53 = vpop.f32.mrb[8].mxu1 }
 0x4f8   :  { %v668_v28 = vadd.f32 %v659_v53, %v614_v52  ;;  %v661_v54 = vpop.f32.mrb[9].mxu1 }
 0x4f9   :  { %v663_v31 = vpop.f32.mrb[10].mxu1  ;;  %v682_v2 = vadd.f32 %v2255_v35, %v661_v54 }
 0x4fa   :  { %v1711_v59 = vmul.f32 -1.442695, %v668_v28  ;;  %v669_v20 = vadd.f32 %v663_v31, %v616_v56  ;;  %v665_v60 = vpop.f32.mrb[11].mxu1 }
 0x4fb   :  { %v683_v57 = vadd.f32 %v2255_v35, %v665_v60 }
 0x4fc   :  { %1781 = vpow2.f32 %v1711_v59  ;;  %v1712_v21 = vmul.f32 -1.442695, %v669_v20 }
 0x4fe   :  { %1783 = vpow2.f32 %v1712_v21 }
 0x506   :  { %v1782_v61 = vpop.eup %1781 }
 0x507   :  { %v676_v62 = vadd.f32 1.0, %v1782_v61 }
 0x508   :  { %v1784_v63 = vpop.eup %1783 }
 0x509   :  { %1785 = vrcp.f32 %v676_v62  ;;  %v677_v22 = vadd.f32 1.0, %v1784_v63 }
 0x50b   :  { %1787 = vrcp.f32 %v677_v22 }
 0x513   :  { %v1786_v3 = vpop.eup %1785 }
 0x514   :  { %v684_v12 = vmul.f32 %v1786_v3, %v682_v2  ;;  %v690_v55 = vsub.f32 1.0, %v1786_v3  ;;  %v702_v37 = vmul.f32 %v1786_v3, %v2288_v34 }
 0x515   :  { %v1788_v49 = vpop.eup %1787 }
 0x516   :  { %v686_v51 = vadd.f32 %v684_v12, %v615_v6  ;;  %v685_v17 = vmul.f32 %v1788_v49, %v683_v57  ;;  %v691_v33 = vsub.f32 1.0, %v1788_v49  ;;  %v703_v25 = vmul.f32 %v1788_v49, %v2290_v47 }
 0x518   :  { %1789 = vtanh.f32 %v686_v51  ;;  %v687_v23 = vadd.f32 %v685_v17, %v617_v14 }
 0x51a   :  { %1791 = vtanh.f32 %v687_v23 }
 0x522   :  { %v1790_v18 = vpop.eup %1789 }
 0x523   :  { %694 = vrot.lane.b32.xlu0 %v1790_v18, %s1922_s4 }
 0x524   :  { %v1792_v41 = vpop.eup %1791 }
 0x525   :  { %696 = vrot.lane.b32.xlu1 %v1792_v41, %s1922_s4 }
 0x595   :  { %v695_v30 = vpop.permute.xlu0 %694 }
 0x596   :  { %v700_v24 = vmul.f32 %v695_v30, %v690_v55 }
 0x597   :  { %v697_v36 = vpop.permute.xlu1 %696 }
 0x598   :  { %v701_v39 = vmul.f32 %v697_v36, %v691_v33  ;;  %v2313_v40 = vadd.f32 %v702_v37, %v700_v24  ;;  %v824_v37 = vunpack.c.l.bf16 %v2146_v16 }
 0x59a   :  { %v2315_v26 = vadd.f32 %v703_v25, %v701_v39 }
 0x59c   :  { %v723_v43 = vpack.c.bf16 %v2315_v26, %v2313_v40 }
 0x59e   :  { %725 = vrot.lane.b32.xlu0 %v723_v43, %s1922_s4 }
 0x610   :  { %v726_v44 = vpop.permute.xlu0 %725 }
 0x611   :  { %1713 = vmatmul.mubr.msk.bf16.vlgmr.msra.gmra.mrb[12].mxu1 %vm287_vm3, %v726_v44  ;;  %v826_v44 = vunpack.c.h.bf16 %v2146_v16 }
 0x612   :  { %941 = vmatpush1.bf16.msra.mxu1 %v1986_v5  ;;  %972 = vmatprep.mubr.bf16.mxu1 %v1921_v1 }
 0x613   :  { %942 = vmatprep.subr.bf16.mxu1 %v1995_v7 }
 0x616   :  { %943 = vmatpush1.bf16.msra.mxu1 %v2002_v8 }
 0x617   :  { %944 = vmatprep.subr.bf16.mxu1 %v2009_v9 }
 0x61a   :  { %945 = vmatpush1.bf16.msra.mxu1 %v2018_v10 }
 0x61b   :  { %946 = vmatprep.subr.bf16.mxu1 %v2025_v11 }
 0x61e   :  { %947 = vmatpush1.bf16.msra.mxu1 %v2035_v13 }
 0x61f   :  { %1150 = vmatprep.subr.bf16.mxu1 %v1981_v4  ;;  %v718_v4 = vld [vmem:[#allocation2 + $0x38] sm:$0xff] }
 0x620   :  { %v720_v62 = vunpack.c.l.bf16 %v718_v4  ;;  %v722_v2 = vunpack.c.h.bf16 %v718_v4 }
 0x6e4   :  { %v764_v46 = vpop.f32.mrb[12].mxu1 }
 0x6e5   :  { %v773_v27 = vadd.f32 %v764_v46, %v719_v45  ;;  %v766_v50 = vpop.f32.mrb[13].mxu1 }
 0x6e6   :  { %v768_v52 = vpop.f32.mrb[14].mxu1  ;;  %v787_v21 = vadd.f32 %v2255_v35, %v766_v50 }
 0x6e7   :  { %v1714_v53 = vmul.f32 -1.442695, %v773_v27  ;;  %v774_v28 = vadd.f32 %v768_v52, %v721_v38  ;;  %v770_v54 = vpop.f32.mrb[15].mxu1 }
 0x6e8   :  { %v788_v15 = vadd.f32 %v2255_v35, %v770_v54 }
 0x6e9   :  { %1793 = vpow2.f32 %v1714_v53  ;;  %v1715_v56 = vmul.f32 -1.442695, %v774_v28 }
 0x6eb   :  { %1795 = vpow2.f32 %v1715_v56  ;;  %v823_v56 = vld [vmem:[#allocation2 + $0x48] sm:$0xff] }
 0x6f3   :  { %v1794_v31 = vpop.eup %1793 }
 0x6f4   :  { %v781_v59 = vadd.f32 1.0, %v1794_v31 }
 0x6f5   :  { %v1796_v20 = vpop.eup %1795 }
 0x6f6   :  { %1797 = vrcp.f32 %v781_v59  ;;  %v782_v60 = vadd.f32 1.0, %v1796_v20  ;;  %v825_v20 = vunpack.c.l.bf16 %v823_v56 }
 0x6f8   :  { %1799 = vrcp.f32 %v782_v60 }
 0x700   :  { %v1798_v61 = vpop.eup %1797 }
 0x701   :  { %v789_v63 = vmul.f32 %v1798_v61, %v787_v21  ;;  %v795_v49 = vsub.f32 1.0, %v1798_v61  ;;  %v807_v18 = vmul.f32 %v1798_v61, %v2313_v40  ;;  %v827_v61 = vunpack.c.h.bf16 %v823_v56 }
 0x702   :  { %v1800_v22 = vpop.eup %1799 }
 0x703   :  { %v791_v0 = vadd.f32 %v789_v63, %v720_v62  ;;  %v790_v3 = vmul.f32 %v1800_v22, %v788_v15  ;;  %v796_v17 = vsub.f32 1.0, %v1800_v22  ;;  %v808_v41 = vmul.f32 %v1800_v22, %v2315_v26 }
 0x705   :  { %1801 = vtanh.f32 %v791_v0  ;;  %v792_v6 = vadd.f32 %v790_v3, %v722_v2 }
 0x707   :  { %1803 = vtanh.f32 %v792_v6 }
 0x70f   :  { %v1802_v12 = vpop.eup %1801 }
 0x710   :  { %799 = vrot.lane.b32.xlu1 %v1802_v12, %s1922_s4 }
 0x711   :  { %v1804_v57 = vpop.eup %1803 }
 0x712   :  { %801 = vrot.lane.b32.xlu0 %v1804_v57, %s1922_s4 }
 0x782   :  { %v800_v51 = vpop.permute.xlu1 %799 }
 0x783   :  { %v805_v14 = vmul.f32 %v800_v51, %v795_v49 }
 0x784   :  { %v802_v23 = vpop.permute.xlu0 %801 }
 0x785   :  { %v806_v55 = vmul.f32 %v802_v23, %v796_v17  ;;  %v2338_v30 = vadd.f32 %v807_v18, %v805_v14 }
 0x787   :  { %v2340_v24 = vadd.f32 %v808_v41, %v806_v55  ;;  %v929_v41 = vunpack.c.l.bf16 %v2176_v58 }
 0x789   :  { %v828_v33 = vpack.c.bf16 %v2340_v24, %v2338_v30 }
 0x78b   :  { %830 = vrot.lane.b32.xlu1 %v828_v33, %s1922_s4 }
 0x7fd   :  { %v831_v36 = vpop.permute.xlu1 %830 }
 0x7fe   :  { %1716 = vmatmul.mubr.msk.bf16.vlgmr.msra.gmra.mrb[32].mxu0 %vm287_vm3, %v831_v36 }
 0x7ff   :  { %1046 = vmatpush1.bf16.msra.mxu0 %v1986_v5  ;;  %1077 = vmatprep.mubr.bf16.mxu0 %v1921_v1 }
 0x800   :  { %1047 = vmatprep.subr.bf16.mxu0 %v1995_v7 }
 0x803   :  { %1048 = vmatpush1.bf16.msra.mxu0 %v2002_v8 }
 0x804   :  { %1049 = vmatprep.subr.bf16.mxu0 %v2009_v9 }
 0x807   :  { %1050 = vmatpush1.bf16.msra.mxu0 %v2018_v10 }
 0x808   :  { %1051 = vmatprep.subr.bf16.mxu0 %v2025_v11 }
 0x80b   :  { %1052 = vmatpush1.bf16.msra.mxu0 %v2035_v13 }
 0x8d1   :  { %v869_v25 = vpop.f32.mrb[32].mxu0 }
 0x8d2   :  { %v878_v39 = vadd.f32 %v869_v25, %v824_v37  ;;  %v871_v43 = vpop.f32.mrb[33].mxu0 }
 0x8d3   :  { %v873_v45 = vpop.f32.mrb[34].mxu0  ;;  %v892_v31 = vadd.f32 %v2255_v35, %v871_v43 }
 0x8d4   :  { %v1717_v46 = vmul.f32 -1.442695, %v878_v39  ;;  %v879_v27 = vadd.f32 %v873_v45, %v826_v44  ;;  %v875_v50 = vpop.f32.mrb[35].mxu0 }
 0x8d5   :  { %v893_v16 = vadd.f32 %v2255_v35, %v875_v50 }
 0x8d6   :  { %1805 = vpow2.f32 %v1717_v46  ;;  %v1718_v38 = vmul.f32 -1.442695, %v879_v27 }
 0x8d8   :  { %1807 = vpow2.f32 %v1718_v38 }
 0x8e0   :  { %v1806_v52 = vpop.eup %1805 }
 0x8e1   :  { %v886_v53 = vadd.f32 1.0, %v1806_v52 }
 0x8e2   :  { %v1808_v28 = vpop.eup %1807 }
 0x8e3   :  { %1809 = vrcp.f32 %v886_v53  ;;  %v887_v54 = vadd.f32 1.0, %v1808_v28 }
 0x8e5   :  { %1811 = vrcp.f32 %v887_v54 }
 0x8ed   :  { %v1810_v59 = vpop.eup %1809 }
 0x8ee   :  { %v894_v60 = vmul.f32 %v1810_v59, %v892_v31  ;;  %v900_v0 = vsub.f32 1.0, %v1810_v59  ;;  %v912_v57 = vmul.f32 %v1810_v59, %v2338_v30 }
 0x8ef   :  { %v1812_v4 = vpop.eup %1811 }
 0x8f0   :  { %v896_v21 = vadd.f32 %v894_v60, %v825_v20  ;;  %v895_v62 = vmul.f32 %v1812_v4, %v893_v16  ;;  %v901_v6 = vsub.f32 1.0, %v1812_v4  ;;  %v913_v49 = vmul.f32 %v1812_v4, %v2340_v24 }
 0x8f2   :  { %1813 = vtanh.f32 %v896_v21  ;;  %v897_v63 = vadd.f32 %v895_v62, %v827_v61 }
 0x8f4   :  { %1815 = vtanh.f32 %v897_v63 }
 0x8fc   :  { %v1814_v15 = vpop.eup %1813 }
 0x8fd   :  { %904 = vrot.lane.b32.xlu0 %v1814_v15, %s1922_s4 }
 0x8fe   :  { %v1816_v22 = vpop.eup %1815 }
 0x8ff   :  { %906 = vrot.lane.b32.xlu1 %v1816_v22, %s1922_s4  ;;  %v1034_v22 = vunpack.c.l.bf16 %v2210_v42 }
 0x96f   :  { %v905_v2 = vpop.permute.xlu0 %904 }
 0x970   :  { %v910_v3 = vmul.f32 %v905_v2, %v900_v0 }
 0x971   :  { %v907_v12 = vpop.permute.xlu1 %906 }
 0x972   :  { %v911_v51 = vmul.f32 %v907_v12, %v901_v6  ;;  %v2362_v14 = vadd.f32 %v912_v57, %v910_v3  ;;  %v1036_v6 = vunpack.c.h.bf16 %v2210_v42 }
 0x974   :  { %v2364_v17 = vadd.f32 %v913_v49, %v911_v51 }
 0x976   :  { %v933_v23 = vpack.c.bf16 %v2364_v17, %v2362_v14 }
 0x978   :  { %935 = vrot.lane.b32.xlu0 %v933_v23, %s1922_s4 }
 0x9ea   :  { %v936_v18 = vpop.permute.xlu0 %935 }
 0x9eb   :  { %1719 = vmatmul.mubr.msk.bf16.vlgmr.msra.gmra.mrb[16].mxu1 %vm287_vm3, %v936_v18 }
 0x9ec   :  { %1151 = vmatpush1.bf16.msra.mxu1 %v1986_v5  ;;  %1182 = vmatprep.mubr.bf16.mxu1 %v1921_v1  ;;  %v931_v5 = vunpack.c.h.bf16 %v2176_v58 }
 0x9ed   :  { %1152 = vmatprep.subr.bf16.mxu1 %v1995_v7 }
 0x9f0   :  { %1153 = vmatpush1.bf16.msra.mxu1 %v2002_v8 }
 0x9f1   :  { %1154 = vmatprep.subr.bf16.mxu1 %v2009_v9 }
 0x9f4   :  { %1155 = vmatpush1.bf16.msra.mxu1 %v2018_v10 }
 0x9f5   :  { %1156 = vmatprep.subr.bf16.mxu1 %v2025_v11 }
 0x9f8   :  { %1157 = vmatpush1.bf16.msra.mxu1 %v2035_v13  ;;  %v928_v13 = vld [vmem:[#allocation2 + $0x58] sm:$0xff] }
 0x9f9   :  { %v930_v45 = vunpack.c.l.bf16 %v928_v13  ;;  %v932_v38 = vunpack.c.h.bf16 %v928_v13 }
 0xabe   :  { %v974_v55 = vpop.f32.mrb[16].mxu1 }
 0xabf   :  { %v983_v33 = vadd.f32 %v974_v55, %v929_v41  ;;  %v976_v36 = vpop.f32.mrb[17].mxu1 }
 0xac0   :  { %v978_v1 = vpop.f32.mrb[18].mxu1  ;;  %v997_v43 = vadd.f32 %v2255_v35, %v976_v36  ;;  %v1033_v36 = vld [vmem:[#allocation2 + $0x68] sm:$0xff] }
 0xac1   :  { %v1720_v37 = vmul.f32 -1.442695, %v983_v33  ;;  %v984_v7 = vadd.f32 %v978_v1, %v931_v5  ;;  %v980_v25 = vpop.f32.mrb[19].mxu1 }
 0xac2   :  { %v998_v58 = vadd.f32 %v2255_v35, %v980_v25 }
 0xac3   :  { %1817 = vpow2.f32 %v1720_v37  ;;  %v1721_v8 = vmul.f32 -1.442695, %v984_v7  ;;  %v1035_v37 = vunpack.c.l.bf16 %v1033_v36 }
 0xac5   :  { %1819 = vpow2.f32 %v1721_v8 }
 0xacd   :  { %v1818_v9 = vpop.eup %1817 }
 0xace   :  { %v991_v10 = vadd.f32 1.0, %v1818_v9  ;;  %v1037_v9 = vunpack.c.h.bf16 %v1033_v36 }
 0xacf   :  { %v1820_v39 = vpop.eup %1819 }
 0xad0   :  { %1821 = vrcp.f32 %v991_v10  ;;  %v992_v11 = vadd.f32 1.0, %v1820_v39 }
 0xad2   :  { %1823 = vrcp.f32 %v992_v11 }
 0xada   :  { %v1822_v44 = vpop.eup %1821 }
 0xadb   :  { %v999_v46 = vmul.f32 %v1822_v44, %v997_v43  ;;  %v1005_v56 = vsub.f32 1.0, %v1822_v44  ;;  %v1017_v16 = vmul.f32 %v1822_v44, %v2362_v14 }
 0xadc   :  { %v1824_v27 = vpop.eup %1823 }
 0xadd   :  { %v1001_v50 = vadd.f32 %v999_v46, %v930_v45  ;;  %v1000_v52 = vmul.f32 %v1824_v27, %v998_v58  ;;  %v1006_v20 = vsub.f32 1.0, %v1824_v27  ;;  %v1018_v4 = vmul.f32 %v1824_v27, %v2364_v17 }
 0xadf   :  { %1825 = vtanh.f32 %v1001_v50  ;;  %v1002_v53 = vadd.f32 %v1000_v52, %v932_v38 }
 0xae1   :  { %1827 = vtanh.f32 %v1002_v53 }
 0xae9   :  { %v1826_v28 = vpop.eup %1825 }
 0xaea   :  { %1009 = vrot.lane.b32.xlu1 %v1826_v28, %s1922_s4 }
 0xaeb   :  { %v1828_v54 = vpop.eup %1827 }
 0xaec   :  { %1011 = vrot.lane.b32.xlu0 %v1828_v54, %s1922_s4 }
 0xb5c   :  { %v1010_v31 = vpop.permute.xlu1 %1009 }
 0xb5d   :  { %v1015_v59 = vmul.f32 %v1010_v31, %v1005_v56  ;;  %v1139_v56 = vunpack.c.l.bf16 %v2242_v48 }
 0xb5e   :  { %v1012_v60 = vpop.permute.xlu0 %1011 }
 0xb5f   :  { %v1016_v21 = vmul.f32 %v1012_v60, %v1006_v20  ;;  %v2386_v61 = vadd.f32 %v1017_v16, %v1015_v59  ;;  %v1141_v60 = vunpack.c.h.bf16 %v2242_v48 }
 0xb61   :  { %v2388_v62 = vadd.f32 %v1018_v4, %v1016_v21 }
 0xb63   :  { %v1038_v63 = vpack.c.bf16 %v2388_v62, %v2386_v61 }
 0xb65   :  { %1040 = vrot.lane.b32.xlu1 %v1038_v63, %s1922_s4 }
 0xbd7   :  { %v1041_v15 = vpop.permute.xlu1 %1040 }
 0xbd8   :  { %1722 = vmatmul.mubr.msk.bf16.vlgmr.msra.gmra.mrb[36].mxu0 %vm287_vm3, %v1041_v15 }
 0xcab   :  { %v1079_v0 = vpop.f32.mrb[36].mxu0 }
 0xcac   :  { %v1088_v2 = vadd.f32 %v1079_v0, %v1034_v22  ;;  %v1081_v3 = vpop.f32.mrb[37].mxu0 }
 0xcad   :  { %v1083_v12 = vpop.f32.mrb[38].mxu0  ;;  %v1102_v5 = vadd.f32 %v2255_v35, %v1081_v3 }
 0xcae   :  { %v1723_v57 = vmul.f32 -1.442695, %v1088_v2  ;;  %v1089_v49 = vadd.f32 %v1083_v12, %v1036_v6  ;;  %v1085_v51 = vpop.f32.mrb[39].mxu0  ;;  %v1138_v6 = vld [vmem:[#allocation2 + $0x78] sm:$0xff] }
 0xcaf   :  { %v1103_v42 = vadd.f32 %v2255_v35, %v1085_v51 }
 0xcb0   :  { %1829 = vpow2.f32 %v1723_v57  ;;  %v1724_v23 = vmul.f32 -1.442695, %v1089_v49  ;;  %v1140_v49 = vunpack.c.l.bf16 %v1138_v6 }
 0xcb2   :  { %1831 = vpow2.f32 %v1724_v23 }
 0xcba   :  { %v1830_v18 = vpop.eup %1829 }
 0xcbb   :  { %v1096_v41 = vadd.f32 1.0, %v1830_v18 }
 0xcbc   :  { %v1832_v55 = vpop.eup %1831 }
 0xcbd   :  { %1833 = vrcp.f32 %v1096_v41  ;;  %v1097_v33 = vadd.f32 1.0, %v1832_v55  ;;  %v1142_v41 = vunpack.c.h.bf16 %v1138_v6  ;;  %v2497_v6 = vld [vmem:[%s2705_s5] ss:$0 sm:$0xff] }
 0xcbf   :  { %1835 = vrcp.f32 %v1097_v33 }
 0xcc7   :  { %v1834_v1 = vpop.eup %1833 }
 0xcc8   :  { %v1104_v7 = vmul.f32 %v1834_v1, %v1102_v5  ;;  %v1110_v43 = vsub.f32 1.0, %v1834_v1  ;;  %v1122_v27 = vmul.f32 %v1834_v1, %v2386_v61 }
 0xcc9   :  { %v1836_v25 = vpop.eup %1835 }
 0xcca   :  { %v1106_v8 = vadd.f32 %v1104_v7, %v1035_v37  ;;  %v1105_v10 = vmul.f32 %v1836_v25, %v1103_v42  ;;  %v1111_v46 = vsub.f32 1.0, %v1836_v25  ;;  %v1123_v50 = vmul.f32 %v1836_v25, %v2388_v62 }
 0xccc   :  { %1837 = vtanh.f32 %v1106_v8  ;;  %v1107_v39 = vadd.f32 %v1105_v10, %v1037_v9  ;;  %v12_v8 = vstv %s2704_s6 }
 0xccd   :  { %13 = vst [vmem:[#allocation4] sm:$0x1] %v12_v8 }
 0xcce   :  { %1839 = vtanh.f32 %v1107_v39 }
 0xcd6   :  { %v1838_v11 = vpop.eup %1837 }
 0xcd7   :  { %1114 = vrot.lane.b32.xlu0 %v1838_v11, %s1922_s4 }
 0xcd8   :  { %v1840_v13 = vpop.eup %1839 }
 0xcd9   :  { %1116 = vrot.lane.b32.xlu1 %v1840_v13, %s1922_s4 }
 0xd49   :  { %v1115_v44 = vpop.permute.xlu0 %1114 }
 0xd4a   :  { %v1120_v45 = vmul.f32 %v1115_v44, %v1110_v43 }
 0xd4b   :  { %v1117_v58 = vpop.permute.xlu1 %1116 }
 0xd4c   :  { %v1121_v38 = vmul.f32 %v1117_v58, %v1111_v46  ;;  %v1124_v52 = vadd.f32 %v1122_v27, %v1120_v45 }
 0xd4e   :  { %v1125_v53 = vadd.f32 %v1123_v50, %v1121_v38 }
 0xd50   :  { %v1143_v28 = vpack.c.bf16 %v1125_v53, %v1124_v52 }
 0xd52   :  { %1145 = vrot.lane.b32.xlu0 %v1143_v28, %s1922_s4 }
 0xdc4   :  { %v1146_v54 = vpop.permute.xlu0 %1145 }
 0xdc5   :  { %1725 = vmatmul.mubr.msk.bf16.vlgmr.msra.gmra.mrb[20].mxu1 %vm287_vm3, %v1146_v54 }
 0xe98   :  { %v1184_v31 = vpop.f32.mrb[20].mxu1 }
 0xe99   :  { %v1193_v59 = vadd.f32 %v1184_v31, %v1139_v56  ;;  %v1186_v20 = vpop.f32.mrb[21].mxu1 }
 0xe9a   :  { %v1188_v16 = vpop.f32.mrb[22].mxu1  ;;  %v1207_v12 = vadd.f32 %v2255_v35, %v1186_v20 }
 0xe9b   :  { %v1726_v4 = vmul.f32 -1.442695, %v1193_v59  ;;  %v1194_v21 = vadd.f32 %v1188_v16, %v1141_v60  ;;  %v1190_v63 = vpop.f32.mrb[23].mxu1 }
 0xe9c   :  { %v1208_v48 = vadd.f32 %v2255_v35, %v1190_v63 }
 0xe9d   :  { %1841 = vpow2.f32 %v1726_v4  ;;  %v1727_v15 = vmul.f32 -1.442695, %v1194_v21 }
 0xe9f   :  { %1843 = vpow2.f32 %v1727_v15 }
 0xea7   :  { %v1842_v22 = vpop.eup %1841 }
 0xea8   :  { %v1201_v0 = vadd.f32 1.0, %v1842_v22 }
 0xea9   :  { %v1844_v2 = vpop.eup %1843 }
 0xeaa   :  { %1845 = vrcp.f32 %v1201_v0  ;;  %v1202_v3 = vadd.f32 1.0, %v1844_v2 }
 0xeac   :  { %1847 = vrcp.f32 %v1202_v3 }
 0xeb4   :  { %v1846_v57 = vpop.eup %1845 }
 0xeb5   :  { %v1209_v51 = vmul.f32 %v1846_v57, %v1207_v12  ;;  %v1215_v35 = vsub.f32 1.0, %v1846_v57 }
 0xeb6   :  { %v1848_v23 = vpop.eup %1847 }
 0xeb7   :  { %v1211_v18 = vadd.f32 %v1209_v51, %v1140_v49  ;;  %v1210_v55 = vmul.f32 %v1848_v23, %v1208_v48 }
 0xeb9   :  { %1849 = vtanh.f32 %v1211_v18  ;;  %v1212_v33 = vadd.f32 %v1210_v55, %v1142_v41 }
 0xebb   :  { %1851 = vtanh.f32 %v1212_v33 }
 0xec3   :  { %v1850_v36 = vpop.eup %1849 }
 0xec4   :  { %1219 = vrot.lane.b32.xlu1 %v1850_v36, %s1922_s4 }
 0xec5   :  { %v1852_v5 = vpop.eup %1851 }
 0xec6   :  { %1221 = vrot.lane.b32.xlu0 %v1852_v5, %s1922_s4 }
 0xec8   :  { %499 = vrot.lane.b32.xlu1 %v2263_v29, %s1922_s4 }
 0xeca   :  { %501 = vrot.lane.b32.xlu0 %v2265_v19, %s1922_s4  ;;  %v1227_v19 = vmul.f32 %v1846_v57, %v1124_v52 }
 0xecc   :  { %603 = vrot.lane.b32.xlu1 %v2288_v34, %s1922_s4 }
 0xece   :  { %605 = vrot.lane.b32.xlu0 %v2290_v47, %s1922_s4  ;;  %v1216_v47 = vsub.f32 1.0, %v1848_v23 }
 0xed0   :  { %708 = vrot.lane.b32.xlu1 %v2313_v40, %s1922_s4 }
 0xed2   :  { %710 = vrot.lane.b32.xlu0 %v2315_v26, %s1922_s4 }
 0xed4   :  { %813 = vrot.lane.b32.xlu1 %v2338_v30, %s1922_s4  ;;  %v1228_v30 = vmul.f32 %v1848_v23, %v1125_v53 }
 0xed6   :  { %815 = vrot.lane.b32.xlu0 %v2340_v24, %s1922_s4 }
 0xed8   :  { %918 = vrot.lane.b32.xlu1 %v2362_v14, %s1922_s4 }
 0xeda   :  { %920 = vrot.lane.b32.xlu0 %v2364_v17, %s1922_s4 }
 0xedc   :  { %1023 = vrot.lane.b32.xlu1 %v2386_v61, %s1922_s4 }
 0xede   :  { %1025 = vrot.lane.b32.xlu0 %v2388_v62, %s1922_s4 }
 0xee0   :  { %1128 = vrot.lane.b32.xlu1 %v1124_v52, %s1922_s4 }
 0xee2   :  { %1130 = vrot.lane.b32.xlu0 %v1125_v53, %s1922_s4 }
 0xf36   :  { %v1220_v29 = vpop.permute.xlu1 %1219 }
 0xf37   :  { %v1225_v34 = vmul.f32 %v1220_v29, %v1215_v35 }
 0xf38   :  { %v1222_v40 = vpop.permute.xlu0 %1221 }
 0xf39   :  { %v1229_v26 = vadd.f32 %v1227_v19, %v1225_v34  ;;  %v1226_v24 = vmul.f32 %v1222_v40, %v1216_v47 }
 0xf3a   :  { %v500_v14 = vpop.permute.xlu1 %499 }
 0xf3b   :  { %v1230_v17 = vadd.f32 %v1228_v30, %v1226_v24  ;;  %505 = vst.msk [vmem:[#allocation3] sm:$0xff] %vm287_vm3, %v500_v14  ;;  %1233 = vrot.lane.b32.xlu1 %v1229_v26, %s1922_s4 }
 0xf3c   :  { %v502_v61 = vpop.permute.xlu0 %501 }
 0xf3d   :  { %506 = vst.msk [vmem:[#allocation3 + $0x8] sm:$0xff] %vm287_vm3, %v502_v61  ;;  %1235 = vrot.lane.b32.xlu0 %v1230_v17, %s1922_s4 }
 0xf3e   :  { %v604_v62 = vpop.permute.xlu1 %603 }
 0xf3f   :  { %610 = vst.msk [vmem:[#allocation3 + $0x10] sm:$0xff] %vm287_vm3, %v604_v62 }
 0xf40   :  { %v606_v1 = vpop.permute.xlu0 %605 }
 0xf41   :  { %611 = vst.msk [vmem:[#allocation3 + $0x18] sm:$0xff] %vm287_vm3, %v606_v1 }
 0xf42   :  { %v709_v37 = vpop.permute.xlu1 %708 }
 0xf43   :  { %715 = vst.msk [vmem:[#allocation3 + $0x20] sm:$0xff] %vm287_vm3, %v709_v37 }
 0xf44   :  { %v711_v7 = vpop.permute.xlu0 %710 }
 0xf45   :  { %716 = vst.msk [vmem:[#allocation3 + $0x28] sm:$0xff] %vm287_vm3, %v711_v7 }
 0xf46   :  { %v814_v42 = vpop.permute.xlu1 %813  ;;  %v1257_v16 = vld [vmem:[#allocation3 + $0x10] sm:$0xff] }
 0xf47   :  { %820 = vst.msk [vmem:[#allocation3 + $0x30] sm:$0xff] %vm287_vm3, %v814_v42 }
 0xf48   :  { %v816_v25 = vpop.permute.xlu0 %815  ;;  %v1258_v15 = vld [vmem:[#allocation3 + $0x18] sm:$0xff] }
 0xf49   :  { %821 = vst.msk [vmem:[#allocation3 + $0x38] sm:$0xff] %vm287_vm3, %v816_v25 }
 0xf4a   :  { %v919_v9 = vpop.permute.xlu1 %918  ;;  %v1269_v53 = vld [vmem:[#allocation3 + $0x20] sm:$0xff] }
 0xf4b   :  { %925 = vst.msk [vmem:[#allocation3 + $0x40] sm:$0xff] %vm287_vm3, %v919_v9 }
 0xf4c   :  { %v921_v10 = vpop.permute.xlu0 %920  ;;  %v1270_v31 = vld [vmem:[#allocation3 + $0x28] sm:$0xff] }
 0xf4d   :  { %926 = vst.msk [vmem:[#allocation3 + $0x48] sm:$0xff] %vm287_vm3, %v921_v10 }
 0xf4e   :  { %v1024_v39 = vpop.permute.xlu1 %1023  ;;  %v1281_v13 = vld [vmem:[#allocation3 + $0x30] sm:$0xff] }
 0xf4f   :  { %1030 = vst.msk [vmem:[#allocation3 + $0x50] sm:$0xff] %vm287_vm3, %v1024_v39 }
 0xf50   :  { %v1026_v11 = vpop.permute.xlu0 %1025  ;;  %v1282_v58 = vld [vmem:[#allocation3 + $0x38] sm:$0xff] }
 0xf51   :  { %1031 = vst.msk [vmem:[#allocation3 + $0x58] sm:$0xff] %vm287_vm3, %v1026_v11 }
 0xf52   :  { %v1283_v43 = vld [vmem:[#allocation3 + $0x40] sm:$0xff]  ;;  %v1129_v44 = vpop.permute.xlu1 %1128 }
 0xf53   :  { %v1285_v45 = vsel %vm1242_vm4, %v1281_v13, %v1283_v43  ;;  %v1289_v46 = vsel %vm1242_vm4, %v1283_v43, %v1281_v13  ;;  %1135 = vst.msk [vmem:[#allocation3 + $0x60] sm:$0xff] %vm287_vm3, %v1129_v44  ;;  %v1243_v44 = vld [vmem:[#allocation3] sm:$0xff] }
 0xf54   :  { %1287 = vst.msk [vmem:[#allocation3 + $0x30] sm:$0xff] %vm287_vm3, %v1285_v45  ;;  %1291 = vst.msk [vmem:[#allocation3 + $0x40] sm:$0xff] %vm287_vm3, %v1289_v46  ;;  %v1284_v27 = vld [vmem:[#allocation3 + $0x48] sm:$0xff]  ;;  %v1131_v50 = vpop.permute.xlu0 %1130 }
 0xf55   :  { %v1286_v38 = vsel %vm1242_vm4, %v1282_v58, %v1284_v27  ;;  %v1290_v52 = vsel %vm1242_vm4, %v1284_v27, %v1282_v58  ;;  %1136 = vst.msk [vmem:[#allocation3 + $0x68] sm:$0xff] %vm287_vm3, %v1131_v50  ;;  %v1244_v27 = vld [vmem:[#allocation3 + $0x8] sm:$0xff] }
 0xf56   :  { %1288 = vst.msk [vmem:[#allocation3 + $0x38] sm:$0xff] %vm287_vm3, %v1286_v38  ;;  %1292 = vst.msk [vmem:[#allocation3 + $0x48] sm:$0xff] %vm287_vm3, %v1290_v52  ;;  %v1271_v28 = vld [vmem:[#allocation3 + $0x50] sm:$0xff] }
 0xf57   :  { %v1273_v54 = vsel %vm1242_vm4, %v1269_v53, %v1271_v28  ;;  %v1277_v56 = vsel %vm1242_vm4, %v1271_v28, %v1269_v53 }
 0xf58   :  { %1275 = vst.msk [vmem:[#allocation3 + $0x20] sm:$0xff] %vm287_vm3, %v1273_v54  ;;  %1279 = vst.msk [vmem:[#allocation3 + $0x50] sm:$0xff] %vm287_vm3, %v1277_v56  ;;  %v1272_v59 = vld [vmem:[#allocation3 + $0x58] sm:$0xff] }
 0xf59   :  { %v1274_v20 = vsel %vm1242_vm4, %v1270_v31, %v1272_v59  ;;  %v1278_v60 = vsel %vm1242_vm4, %v1272_v59, %v1270_v31 }
 0xf5a   :  { %1276 = vst.msk [vmem:[#allocation3 + $0x28] sm:$0xff] %vm287_vm3, %v1274_v20  ;;  %1280 = vst.msk [vmem:[#allocation3 + $0x58] sm:$0xff] %vm287_vm3, %v1278_v60  ;;  %v1259_v4 = vld [vmem:[#allocation3 + $0x60] sm:$0xff] }
 0xf5b   :  { %v1261_v21 = vsel %vm1242_vm4, %v1257_v16, %v1259_v4  ;;  %v1265_v63 = vsel %vm1242_vm4, %v1259_v4, %v1257_v16  ;;  %v2512_v41 = vld [vmem:[#allocation3 + $0x30] sm:$0xff]  ;;  %v2522_v29 = vld [vmem:[#allocation3 + $0x40] sm:$0xff] }
 0xf5c   :  { %1263 = vst.msk [vmem:[#allocation3 + $0x10] sm:$0xff] %vm287_vm3, %v1261_v21  ;;  %1267 = vst.msk [vmem:[#allocation3 + $0x60] sm:$0xff] %vm287_vm3, %v1265_v63  ;;  %v1260_v22 = vld [vmem:[#allocation3 + $0x68] sm:$0xff]  ;;  %v1322_v35 = vmul.f32 %v2497_v6, %v2512_v41  ;;  %v1324_v26 = vmul.f32 %v2497_v6, %v2522_v29 }
 0xf5d   :  { %v1262_v0 = vsel %vm1242_vm4, %v1258_v15, %v1260_v22  ;;  %v1266_v2 = vsel %vm1242_vm4, %v1260_v22, %v1258_v15  ;;  %v2517_v36 = vld [vmem:[#allocation3 + $0x38] sm:$0xff]  ;;  %v2527_v47 = vld [vmem:[#allocation3 + $0x48] sm:$0xff] }
 0xf5e   :  { %1264 = vst.msk [vmem:[#allocation3 + $0x18] sm:$0xff] %vm287_vm3, %v1262_v0  ;;  %1268 = vst.msk [vmem:[#allocation3 + $0x68] sm:$0xff] %vm287_vm3, %v1266_v2  ;;  %v1323_v34 = vmul.f32 %v2497_v6, %v2517_v36  ;;  %v1350_v40 = vsel %vm287_vm3, %v1322_v35, 0.0  ;;  %v1325_v14 = vmul.f32 %v2497_v6, %v2527_v47  ;;  %v1356_v61 = vsel %vm287_vm3, %v1324_v26, 0.0 }
 0xf5f   :  { %v2499_v12 = vld [vmem:[#allocation3 + $0x20] sm:$0xff]  ;;  %v2532_v30 = vld [vmem:[#allocation3 + $0x50] sm:$0xff] }
 0xf60   :  { %v1320_v18 = vmul.f32 %v2497_v6, %v2499_v12  ;;  %v1353_v24 = vsel %vm287_vm3, %v1323_v34, 0.0  ;;  %v1326_v62 = vmul.f32 %v2497_v6, %v2532_v30  ;;  %v1359_v37 = vsel %vm287_vm3, %v1325_v14, 0.0 }
 0xf61   :  { %v2505_v51 = vld [vmem:[#allocation3 + $0x28] sm:$0xff]  ;;  %v2537_v17 = vld [vmem:[#allocation3 + $0x58] sm:$0xff] }
 0xf62   :  { %v1321_v33 = vmul.f32 %v2497_v6, %v2505_v51  ;;  %v1344_v5 = vsel %vm287_vm3, %v1320_v18, 0.0  ;;  %v1327_v7 = vmul.f32 %v2497_v6, %v2537_v17  ;;  %v1362_v25 = vsel %vm287_vm3, %v1326_v62, 0.0  ;;  %v1729_v18 = vld [vmem:[#allocation4] ss:$0 sm:$0xff] }
 0xf63   :  { %v2492_v3 = vld [vmem:[#allocation3 + $0x10] sm:$0xff]  ;;  %v2542_v1 = vld [vmem:[#allocation3 + $0x60] sm:$0xff] }
 0xf64   :  { %v1318_v57 = vmul.f32 %v2497_v6, %v2492_v3  ;;  %v1347_v19 = vsel %vm287_vm3, %v1321_v33, 0.0  ;;  %v1328_v8 = vmul.f32 %v2497_v6, %v2542_v1  ;;  %v1365_v9 = vsel %vm287_vm3, %v1327_v7, 0.0 }
 0xf65   :  { %v2503_v49 = vld [vmem:[#allocation3 + $0x18] sm:$0xff]  ;;  %v2547_v42 = vld [vmem:[#allocation3 + $0x68] sm:$0xff] }
 0xf66   :  { %v1338_v48 = vsel %vm287_vm3, %v1318_v57, 0.0  ;;  %v1319_v23 = vmul.f32 %v2497_v6, %v2503_v49  ;;  %v1329_v10 = vmul.f32 %v2497_v6, %v2547_v42  ;;  %v1368_v39 = vsel %vm287_vm3, %v1328_v8, 0.0 }
 0xf67   :  { %1339 = vadd.xlane.f32.xlu0 %v1338_v48 }
 0xf68   :  { %v1341_v55 = vsel %vm287_vm3, %v1319_v23, 0.0  ;;  %v1371_v11 = vsel %vm287_vm3, %v1329_v10, 0.0 }
 0xf69   :  { %1342 = vadd.xlane.f32.xlu1 %v1341_v55 }
 0xf6b   :  { %1345 = vadd.xlane.f32.xlu0 %v1344_v5 }
 0xf6d   :  { %1348 = vadd.xlane.f32.xlu1 %v1347_v19 }
 0xf6f   :  { %1351 = vadd.xlane.f32.xlu0 %v1350_v40 }
 0xf71   :  { %1354 = vadd.xlane.f32.xlu1 %v1353_v24 }
 0xf73   :  { %1357 = vadd.xlane.f32.xlu0 %v1356_v61 }
 0xf75   :  { %1360 = vadd.xlane.f32.xlu1 %v1359_v37 }
 0xf77   :  { %1363 = vadd.xlane.f32.xlu0 %v1362_v25 }
 0xf79   :  { %1366 = vadd.xlane.f32.xlu1 %v1365_v9 }
 0xf7b   :  { %1369 = vadd.xlane.f32.xlu0 %v1368_v39 }
 0xf7d   :  { %1372 = vadd.xlane.f32.xlu1 %v1371_v11 }
 0xfad   :  { %v1234_v13 = vpop.permute.xlu1 %1233 }
 0xfae   :  { %1240 = vst.msk [vmem:[#allocation3 + $0x70] sm:$0xff] %vm287_vm3, %v1234_v13 }
 0xfaf   :  { %v1236_v43 = vpop.permute.xlu0 %1235 }
 0xfb0   :  { %1241 = vst.msk [vmem:[#allocation3 + $0x78] sm:$0xff] %vm287_vm3, %v1236_v43 }
 0xfb5   :  { %v1245_v45 = vld [vmem:[#allocation3 + $0x70] sm:$0xff] }
 0xfb6   :  { %v1249_v46 = vsel %vm1242_vm4, %v1243_v44, %v1245_v45  ;;  %v1253_v58 = vsel %vm1242_vm4, %v1245_v45, %v1243_v44 }
 0xfb7   :  { %1251 = vst.msk [vmem:[#allocation3] sm:$0xff] %vm287_vm3, %v1249_v46  ;;  %1255 = vst.msk [vmem:[#allocation3 + $0x70] sm:$0xff] %vm287_vm3, %v1253_v58  ;;  %v1246_v50 = vld [vmem:[#allocation3 + $0x78] sm:$0xff] }
 0xfb8   :  { %v1250_v38 = vsel %vm1242_vm4, %v1244_v27, %v1246_v50  ;;  %v1254_v52 = vsel %vm1242_vm4, %v1246_v50, %v1244_v27 }
 0xfb9   :  { %1252 = vst.msk [vmem:[#allocation3 + $0x8] sm:$0xff] %vm287_vm3, %v1250_v38  ;;  %1256 = vst.msk [vmem:[#allocation3 + $0x78] sm:$0xff] %vm287_vm3, %v1254_v52 }
 0xfbe   :  { %v2571_v53 = vld [vmem:[#allocation3] sm:$0xff]  ;;  %v2579_v31 = vld [vmem:[#allocation3 + $0x70] sm:$0xff] }
 0xfbf   :  { %v1316_v28 = vmul.f32 %v2497_v6, %v2571_v53  ;;  %v1330_v16 = vmul.f32 %v2497_v6, %v2579_v31 }
 0xfc0   :  { %v2575_v54 = vld [vmem:[#allocation3 + $0x8] sm:$0xff]  ;;  %v2577_v56 = vld [vmem:[#allocation3 + $0x78] sm:$0xff] }
 0xfc1   :  { %v1332_v59 = vsel %vm287_vm3, %v1316_v28, 0.0  ;;  %v1317_v32 = vmul.f32 %v2497_v6, %v2575_v54  ;;  %v1331_v20 = vmul.f32 %v2497_v6, %v2577_v56  ;;  %v1374_v21 = vsel %vm287_vm3, %v1330_v16, 0.0 }
 0xfc2   :  { %1333 = vadd.xlane.f32.xlu1 %v1332_v59 }
 0xfc3   :  { %v1335_v60 = vsel %vm287_vm3, %v1317_v32, 0.0  ;;  %v1377_v4 = vsel %vm287_vm3, %v1331_v20, 0.0 }
 0xfc4   :  { %1336 = vadd.xlane.f32.xlu0 %v1335_v60 }
 0xfc6   :  { %1378 = vadd.xlane.f32.xlu1 %v1377_v4 }
 0xfc8   :  { %1375 = vadd.xlane.f32.xlu0 %v1374_v21 }
 0xff4   :  { %v1340_v15 = vpop.xlane.xlu0 %1339 }
 0xff5   :  { %v1389_v55 = vadd.f32 %v1729_v18, %v1340_v15 }
 0xff6   :  { %v1343_v63 = vpop.xlane.xlu1 %1342 }
 0xff7   :  { %v1390_v5 = vadd.f32 %v1729_v18, %v1343_v63  ;;  %1853 = vtanh.f32 %v1389_v55 }
 0xff8   :  { %v1346_v0 = vpop.xlane.xlu0 %1345 }
 0xff9   :  { %v1391_v6 = vadd.f32 %v1729_v18, %v1346_v0  ;;  %1855 = vtanh.f32 %v1390_v5 }
 0xffa   :  { %v1349_v22 = vpop.xlane.xlu1 %1348 }
 0xffb   :  { %v1392_v19 = vadd.f32 %v1729_v18, %v1349_v22  ;;  %1857 = vtanh.f32 %v1391_v6 }
 0xffc   :  { %v1352_v57 = vpop.xlane.xlu0 %1351 }
 0xffd   :  { %v1393_v34 = vadd.f32 %v1729_v18, %v1352_v57  ;;  %1859 = vtanh.f32 %v1392_v19 }
 0xffe   :  { %v1355_v2 = vpop.xlane.xlu1 %1354 }
 0xfff   :  { %v1394_v40 = vadd.f32 %v1729_v18, %v1355_v2  ;;  %1861 = vtanh.f32 %v1393_v34 }
0x1000   :  { %v1358_v23 = vpop.xlane.xlu0 %1357 }
0x1001   :  { %v1395_v26 = vadd.f32 %v1729_v18, %v1358_v23  ;;  %1863 = vtanh.f32 %v1394_v40  ;;  %v2591_v11 = vpop.eup %1853 }
0x1002   :  { %v1361_v48 = vpop.xlane.xlu1 %1360  ;;  %v1421_v63 = vsel %vm1419_vm5, %v2591_v11, -inf }
0x1003   :  { %v1396_v14 = vadd.f32 %v1729_v18, %v1361_v48  ;;  %1865 = vtanh.f32 %v1395_v26  ;;  %v2593_v43 = vpop.eup %1855 }
0x1004   :  { %v1364_v35 = vpop.xlane.xlu0 %1363  ;;  %v1436_v34 = vsel %vm1419_vm5, %v2593_v43, -inf }
0x1005   :  { %v1397_v61 = vadd.f32 %v1729_v18, %v1364_v35  ;;  %1867 = vtanh.f32 %v1396_v14  ;;  %v1858_v45 = vpop.eup %1857 }
0x1006   :  { %v1367_v33 = vpop.xlane.xlu1 %1366  ;;  %v1422_v60 = vsel %vm1419_vm5, %v1858_v45, -inf }
0x1007   :  { %v1398_v37 = vadd.f32 %v1729_v18, %v1367_v33  ;;  %1869 = vtanh.f32 %v1397_v61  ;;  %v2595_v58 = vpop.eup %1859 }
0x1008   :  { %v1370_v62 = vpop.xlane.xlu0 %1369  ;;  %v1437_v0 = vsel %vm1419_vm5, %v2595_v58, -inf }
0x1009   :  { %v1399_v8 = vadd.f32 %v1729_v18, %v1370_v62  ;;  %v1862_v50 = vpop.eup %1861 }
0x100a   :  { %v1373_v24 = vpop.xlane.xlu1 %1372  ;;  %v1424_v16 = vsel %vm1419_vm5, %v1862_v50, -inf }
0x100b   :  { %v1400_v10 = vadd.f32 %v1729_v18, %v1373_v24  ;;  %v2597_v38 = vpop.eup %1863 }
0x100c   :  { %v1439_v55 = vsel %vm1419_vm5, %v2597_v38, -inf }
0x100d   :  { %v1866_v52 = vpop.eup %1865  ;;  %v1440_v14 = vmax.f32 %v1436_v34, %v1439_v55 }
0x100e   :  { %v1426_v2 = vsel %vm1419_vm5, %v1866_v52, -inf }
0x100f   :  { %v2599_v28 = vpop.eup %1867 }
0x1010   :  { %v1441_v35 = vsel %vm1419_vm5, %v2599_v28, -inf }
0x1011   :  { %v1870_v59 = vpop.eup %1869 }
0x1012   :  { %v1428_v57 = vsel %vm1419_vm5, %v1870_v59, -inf }
0x104f   :  { %v1334_v7 = vpop.xlane.xlu1 %1333 }
0x1050   :  { %v1387_v25 = vadd.f32 %v1729_v18, %v1334_v7 }
0x1051   :  { %v1337_v9 = vpop.xlane.xlu0 %1336 }
0x1052   :  { %1871 = vtanh.f32 %v1387_v25  ;;  %v1388_v39 = vadd.f32 %v1729_v18, %v1337_v9 }
0x1053   :  { %1873 = vtanh.f32 %v1398_v37  ;;  %v1379_v13 = vpop.xlane.xlu1 %1378 }
0x1054   :  { %1875 = vtanh.f32 %v1388_v39  ;;  %v1402_v44 = vadd.f32 %v1729_v18, %v1379_v13 }
0x1055   :  { %1877 = vtanh.f32 %v1399_v8  ;;  %v1376_v46 = vpop.xlane.xlu0 %1375 }
0x1056   :  { %1879 = vtanh.f32 %v1400_v10  ;;  %v1401_v27 = vadd.f32 %v1729_v18, %v1376_v46  ;;  %v1425_v18 = vmax.f32 %v1421_v63, %v1424_v16 }
0x1057   :  { %1881 = vtanh.f32 %v1402_v44 }
0x1058   :  { %1883 = vtanh.f32 %v1401_v27  ;;  %v1429_v40 = vmax.f32 %v1425_v18, %v1428_v57 }
0x105c   :  { %v1872_v32 = vpop.eup %1871 }
0x105d   :  { %v2601_v20 = vpop.eup %1873  ;;  %v1420_v4 = vsel %vm1419_vm5, %v1872_v32, -inf }
0x105e   :  { %v1876_v21 = vpop.eup %1875  ;;  %v1423_v15 = vmax.f32 %v1420_v4, %v1422_v60  ;;  %v1443_v26 = vsel %vm1419_vm5, %v2601_v20, -inf }
0x105f   :  { %v1878_v22 = vpop.eup %1877  ;;  %v1435_v48 = vsel %vm1419_vm5, %v1876_v21, -inf  ;;  %v1444_v9 = vmax.f32 %v1440_v14, %v1443_v26 }
0x1060   :  { %v2613_v23 = vpop.eup %1879  ;;  %v1427_v33 = vmax.f32 %v1423_v15, %v1426_v2  ;;  %v1438_v5 = vmax.f32 %v1435_v48, %v1437_v0  ;;  %v1430_v61 = vsel %vm1419_vm5, %v1878_v22, -inf }
0x1061   :  { %v2617_v6 = vpop.eup %1881  ;;  %v1445_v37 = vsel %vm1419_vm5, %v2613_v23, -inf }
0x1062   :  { %v1884_v19 = vpop.eup %1883  ;;  %v1442_v24 = vmax.f32 %v1438_v5, %v1441_v35  ;;  %v1447_v7 = vsel %vm1419_vm5, %v2617_v6, -inf  ;;  %v1431_v25 = vmax.f32 %v1427_v33, %v1430_v61 }
0x1063   :  { %v1432_v62 = vsel %vm1419_vm5, %v1884_v19, -inf  ;;  %v1448_v13 = vmax.f32 %v1444_v9, %v1447_v7 }
0x1064   :  { %v1433_v8 = vmax.f32 %v1429_v40, %v1432_v62  ;;  %v1446_v10 = vmax.f32 %v1442_v24, %v1445_v37 }
0x1066   :  { %v1434_v39 = vmax.f32 %v1431_v25, %v1433_v8  ;;  %v1449_v46 = vmax.f32 %v1446_v10, %v1448_v13 }
0x1068   :  { %v1462_v44 = vsub.f32 %v1878_v22, %v1434_v39  ;;  %v1450_v27 = vsub.f32 %v1872_v32, %v1434_v39  ;;  %v1452_v60 = vsub.f32 %v2591_v11, %v1434_v39  ;;  %v1454_v16 = vsub.f32 %v1858_v45, %v1434_v39 }
0x1069   :  { %v1456_v63 = vsub.f32 %v1862_v50, %v1434_v39  ;;  %v1458_v15 = vsub.f32 %v1866_v52, %v1434_v39  ;;  %v1460_v2 = vsub.f32 %v1870_v59, %v1434_v39  ;;  %v1451_v18 = vsub.f32 %v1876_v21, %v1449_v46 }
0x106a   :  { %v1490_v4 = vmul.f32 1.442695, %v1462_v44  ;;  %v1466_v0 = vmul.f32 1.442695, %v1450_v27  ;;  %v1470_v57 = vmul.f32 1.442695, %v1452_v60  ;;  %v1453_v33 = vsub.f32 %v2593_v43, %v1449_v46 }
0x106b   :  { %v1474_v48 = vmul.f32 1.442695, %v1454_v16  ;;  %v1478_v55 = vmul.f32 1.442695, %v1456_v63  ;;  %v1482_v5 = vmul.f32 1.442695, %v1458_v15  ;;  %v1455_v22 = vsub.f32 %v2595_v58, %v1449_v46 }
0x106c   :  { %1885 = vpow2.f32 %v1490_v4  ;;  %v1486_v32 = vmul.f32 1.442695, %v1460_v2  ;;  %v1457_v11 = vsub.f32 %v2597_v38, %v1449_v46  ;;  %v1464_v45 = vsub.f32 %v1884_v19, %v1434_v39 }
0x106d   :  { %1887 = vpow2.f32 %v1466_v0  ;;  %v1468_v50 = vmul.f32 1.442695, %v1451_v18  ;;  %v1459_v52 = vsub.f32 %v2599_v28, %v1449_v46  ;;  %v1472_v59 = vmul.f32 1.442695, %v1453_v33 }
0x106e   :  { %1889 = vpow2.f32 %v1470_v57  ;;  %v1476_v21 = vmul.f32 1.442695, %v1455_v22  ;;  %v1461_v43 = vsub.f32 %v2601_v20, %v1449_v46  ;;  %v1480_v35 = vmul.f32 1.442695, %v1457_v11 }
0x106f   :  { %1891 = vpow2.f32 %v1474_v48  ;;  %v1494_v34 = vmul.f32 1.442695, %v1464_v45  ;;  %v1463_v58 = vsub.f32 %v2613_v23, %v1449_v46  ;;  %v1484_v40 = vmul.f32 1.442695, %v1459_v52 }
0x1070   :  { %1893 = vpow2.f32 %v1478_v55  ;;  %v1465_v19 = vsub.f32 %v2617_v6, %v1449_v46  ;;  %v1488_v28 = vmul.f32 1.442695, %v1461_v43 }
0x1071   :  { %1895 = vpow2.f32 %v1482_v5  ;;  %v1492_v20 = vmul.f32 1.442695, %v1463_v58 }
0x1072   :  { %1897 = vpow2.f32 %v1486_v32  ;;  %v1496_v37 = vmul.f32 1.442695, %v1465_v19 }
0x1073   :  { %1899 = vpow2.f32 %v1468_v50 }
0x1074   :  { %1901 = vpow2.f32 %v1472_v59 }
0x1075   :  { %1903 = vpow2.f32 %v1476_v21 }
0x1076   :  { %v2638_v38 = vpop.eup %1885  ;;  %1905 = vpow2.f32 %v1480_v35 }
0x1077   :  { %v1888_v26 = vpop.eup %1887  ;;  %1907 = vpow2.f32 %v1494_v34  ;;  %v1509_v33 = vsel %vm1419_vm5, %v2638_v38, 0.0 }
0x1078   :  { %v1890_v24 = vpop.eup %1889  ;;  %v1498_v14 = vsel %vm1419_vm5, %v1888_v26, 0.0  ;;  %1909 = vpow2.f32 %v1484_v40 }
0x1079   :  { %v1892_v61 = vpop.eup %1891  ;;  %v1499_v62 = vsel %vm1419_vm5, %v1890_v24, 0.0  ;;  %1911 = vpow2.f32 %v1488_v28 }
0x107a   :  { %v1894_v23 = vpop.eup %1893  ;;  %v1500_v7 = vadd.f32 %v1499_v62, %v1498_v14  ;;  %v1501_v8 = vsel %vm1419_vm5, %v1892_v61, 0.0  ;;  %1913 = vpow2.f32 %v1492_v20 }
0x107b   :  { %v1896_v25 = vpop.eup %1895  ;;  %v1503_v39 = vsel %vm1419_vm5, %v1894_v23, 0.0  ;;  %1915 = vpow2.f32 %v1496_v37 }
0x107c   :  { %v1898_v6 = vpop.eup %1897  ;;  %v1502_v9 = vadd.f32 %v1501_v8, %v1500_v7  ;;  %v1505_v60 = vsel %vm1419_vm5, %v1896_v25, 0.0 }
0x107d   :  { %v1900_v10 = vpop.eup %1899  ;;  %v1507_v2 = vsel %vm1419_vm5, %v1898_v6, 0.0 }
0x107e   :  { %v1902_v13 = vpop.eup %1901  ;;  %v1504_v44 = vadd.f32 %v1503_v39, %v1502_v9  ;;  %v1513_v46 = vsel %vm1419_vm5, %v1900_v10, 0.0 }
0x107f   :  { %v1904_v27 = vpop.eup %1903  ;;  %v1514_v16 = vsel %vm1419_vm5, %v1902_v13, 0.0 }
0x1080   :  { %v1906_v4 = vpop.eup %1905  ;;  %v1506_v63 = vadd.f32 %v1505_v60, %v1504_v44  ;;  %v1515_v15 = vadd.f32 %v1514_v16, %v1513_v46  ;;  %v1516_v57 = vsel %vm1419_vm5, %v1904_v27, 0.0 }
0x1081   :  { %v1908_v0 = vpop.eup %1907  ;;  %v1518_v5 = vsel %vm1419_vm5, %v1906_v4, 0.0 }
0x1082   :  { %v1910_v48 = vpop.eup %1909  ;;  %v1508_v18 = vadd.f32 %v1507_v2, %v1506_v63  ;;  %v1517_v55 = vadd.f32 %v1516_v57, %v1515_v15  ;;  %v1511_v45 = vsel %vm1419_vm5, %v1908_v0, 0.0 }
0x1083   :  { %v1912_v22 = vpop.eup %1911  ;;  %v1520_v50 = vsel %vm1419_vm5, %v1910_v48, 0.0 }
0x1084   :  { %v1510_v32 = vadd.f32 %v1509_v33, %v1508_v18  ;;  %v1519_v11 = vadd.f32 %v1518_v5, %v1517_v55  ;;  %v1914_v52 = vpop.eup %1913  ;;  %v1522_v43 = vsel %vm1419_vm5, %v1912_v22, 0.0 }
0x1085   :  { %v1916_v35 = vpop.eup %1915  ;;  %v1524_v58 = vsel %vm1419_vm5, %v1914_v52, 0.0 }
0x1086   :  { %v1512_v59 = vadd.f32 %v1511_v45, %v1510_v32  ;;  %v1521_v21 = vadd.f32 %v1520_v50, %v1519_v11  ;;  %v1526_v19 = vsel %vm1419_vm5, %v1916_v35, 0.0 }
0x1088   :  { %1917 = vrcp.f32 %v1512_v59  ;;  %v1523_v34 = vadd.f32 %v1522_v43, %v1521_v21 }
0x108a   :  { %v1525_v40 = vadd.f32 %v1524_v58, %v1523_v34 }
0x108c   :  { %v1527_v28 = vadd.f32 %v1526_v19, %v1525_v40 }
0x108e   :  { %1919 = vrcp.f32 %v1527_v28 }
0x1092   :  { %v1918_v14 = vpop.eup %1917 }
0x1093   :  { %v1532_v20 = vmul.f32 %v1918_v14, %v1890_v24  ;;  %v1530_v62 = vmul.f32 %v1918_v14, %v1888_v26  ;;  %v1534_v37 = vmul.f32 %v1918_v14, %v1892_v61  ;;  %v1536_v9 = vmul.f32 %v1918_v14, %v1894_v23 }
0x1094   :  { %v1538_v44 = vmul.f32 %v1918_v14, %v1896_v25  ;;  %v1540_v60 = vmul.f32 %v1918_v14, %v1898_v6  ;;  %v1542_v23 = vmul.f32 %v1918_v14, %v2638_v38  ;;  %v1544_v15 = vmul.f32 %v1918_v14, %v1908_v0 }
0x1095   :  { %1558 = vperm.xlu1 %1733, %v1532_v20   ;;  %1548 = vperm.xlu0 %1732, %v1530_v62  }
0x1098   :  { %v1920_v7 = vpop.eup %1919 }
0x1099   :  { %1568 = vperm.xlu1 %1733, %v1534_v37   ;;  %v1539_v8 = vmul.f32 %v1920_v7, %v1910_v48  ;;  %v1541_v39 = vmul.f32 %v1920_v7, %v1912_v22  ;;  %v1543_v46 = vmul.f32 %v1920_v7, %v1914_v52  ;;  %v1545_v16 = vmul.f32 %v1920_v7, %v1916_v35 }
0x109a   :  { %v1531_v26 = vmul.f32 %v1920_v7, %v1900_v10  ;;  %v1533_v24 = vmul.f32 %v1920_v7, %v1902_v13  ;;  %v1535_v61 = vmul.f32 %v1920_v7, %v1904_v27  ;;  %v1537_v63 = vmul.f32 %v1920_v7, %v1906_v4 }
0x109b   :  { %1593 = vperm.xlu0 %1732, %v1539_v8  }
0x109d   :  { %1578 = vperm.xlu1 %1733, %v1536_v9  }
0x109f   :  { %1603 = vperm.xlu0 %1732, %v1541_v39  }
0x10a1   :  { %1588 = vperm.xlu1 %1733, %v1538_v44  }
0x10a3   :  { %1613 = vperm.xlu0 %1732, %v1543_v46  }
0x10a5   :  { %1598 = vperm.xlu1 %1733, %v1540_v60  }
0x10a7   :  { %1623 = vperm.xlu0 %1732, %v1545_v16  }
0x10a9   :  { %1553 = vperm.xlu1 %1733, %v1531_v26  }
0x10ad   :  { %1563 = vperm.xlu1 %1733, %v1533_v24  }
0x10b1   :  { %1573 = vperm.xlu1 %1733, %v1535_v61  }
0x10b5   :  { %1583 = vperm.xlu1 %1733, %v1537_v63  }
0x10b9   :  { %1608 = vperm.xlu1 %1733, %v1542_v23  }
0x10bd   :  { %1618 = vperm.xlu1 %1733, %v1544_v15  }
0x1114   :  { %v1559_v25 = vpop.permute.xlu1 %1558  ;;  %v1549_v6 = vpop.permute.xlu0 %1548 }
0x1115   :  { %v1628_v13 = vmul.f32 %v1559_v25, %v2492_v3  ;;  %v1626_v4 = vmul.f32 %v1549_v6, %v2571_v53 }
0x1117   :  { %v1643_v22 = vsel %vm287_vm3, %v1628_v13, 0.0  ;;  %v1642_v11 = vsel %vm287_vm3, %v1626_v4, 0.0 }
0x1118   :  { %v1569_v2 = vpop.permute.xlu1 %1568  ;;  %v1644_v59 = vadd.f32 %v1643_v22, %v1642_v11 }
0x1119   :  { %v1630_v38 = vmul.f32 %v1569_v2, %v2499_v12 }
0x111a   :  { %v1594_v55 = vpop.permute.xlu0 %1593 }
0x111b   :  { %v1645_v53 = vsel %vm287_vm3, %v1630_v38, 0.0  ;;  %v1635_v35 = vmul.f32 %v1594_v55, %v2527_v47 }
0x111c   :  { %v1579_v57 = vpop.permute.xlu1 %1578  ;;  %v1646_v58 = vadd.f32 %v1645_v53, %v1644_v59 }
0x111d   :  { %v1632_v45 = vmul.f32 %v1579_v57, %v2512_v41  ;;  %v1664_v47 = vsel %vm287_vm3, %v1635_v35, 0.0 }
0x111e   :  { %v1604_v33 = vpop.permute.xlu0 %1603 }
0x111f   :  { %v1647_v41 = vsel %vm287_vm3, %v1632_v45, 0.0  ;;  %v1637_v19 = vmul.f32 %v1604_v33, %v2537_v17 }
0x1120   :  { %v1589_v48 = vpop.permute.xlu1 %1588  ;;  %v1648_v14 = vadd.f32 %v1647_v41, %v1646_v58 }
0x1121   :  { %v1666_v17 = vsel %vm287_vm3, %v1637_v19, 0.0 }
0x1122   :  { %v1614_v52 = vpop.permute.xlu0 %1613 }
0x1123   :  { %v1639_v7 = vmul.f32 %v1614_v52, %v2547_v42 }
0x1124   :  { %v1599_v18 = vpop.permute.xlu1 %1598 }
0x1125   :  { %v1636_v34 = vmul.f32 %v1599_v18, %v2532_v30  ;;  %v1668_v26 = vsel %vm287_vm3, %v1639_v7, 0.0 }
0x1126   :  { %v1624_v20 = vpop.permute.xlu0 %1623 }
0x1127   :  { %v1651_v30 = vsel %vm287_vm3, %v1636_v34, 0.0  ;;  %v1641_v39 = vmul.f32 %v1624_v20, %v2577_v56 }
0x1128   :  { %v1554_v10 = vpop.permute.xlu1 %1553 }
0x1129   :  { %v1627_v0 = vmul.f32 %v1554_v10, %v2575_v54  ;;  %v1670_v63 = vsel %vm287_vm3, %v1641_v39, 0.0 }
0x112b   :  { %v1657_v12 = vsel %vm287_vm3, %v1627_v0, 0.0 }
0x112c   :  { %v1564_v27 = vpop.permute.xlu1 %1563 }
0x112d   :  { %v1629_v5 = vmul.f32 %v1564_v27, %v2503_v49  ;;  %v1634_v49 = vmul.f32 %v1589_v48, %v2522_v29 }
0x112f   :  { %v1658_v50 = vsel %vm287_vm3, %v1629_v5, 0.0  ;;  %v1649_v29 = vsel %vm287_vm3, %v1634_v49, 0.0 }
0x1130   :  { %v1574_v32 = vpop.permute.xlu1 %1573  ;;  %v1659_v21 = vadd.f32 %v1658_v50, %v1657_v12  ;;  %v1650_v8 = vadd.f32 %v1649_v29, %v1648_v14 }
0x1131   :  { %v1631_v3 = vmul.f32 %v1574_v32, %v2505_v51 }
0x1132   :  { %v1652_v46 = vadd.f32 %v1651_v30, %v1650_v8 }
0x1133   :  { %v1660_v54 = vsel %vm287_vm3, %v1631_v3, 0.0 }
0x1134   :  { %v1584_v43 = vpop.permute.xlu1 %1583  ;;  %v1661_v40 = vadd.f32 %v1660_v54, %v1659_v21 }
0x1135   :  { %v1633_v51 = vmul.f32 %v1584_v43, %v2517_v36 }
0x1137   :  { %v1662_v28 = vsel %vm287_vm3, %v1633_v51, 0.0 }
0x1138   :  { %v1663_v62 = vadd.f32 %v1662_v28, %v1661_v40  ;;  %v1609_v37 = vpop.permute.xlu1 %1608 }
0x1139   :  { %v1638_v36 = vmul.f32 %v1609_v37, %v2542_v1 }
0x113a   :  { %v1665_v9 = vadd.f32 %v1664_v47, %v1663_v62 }
0x113b   :  { %v1653_v44 = vsel %vm287_vm3, %v1638_v36, 0.0 }
0x113c   :  { %v1667_v60 = vadd.f32 %v1666_v17, %v1665_v9  ;;  %v1619_v16 = vpop.permute.xlu1 %1618  ;;  %v1654_v61 = vadd.f32 %v1653_v44, %v1652_v46 }
0x113d   :  { %v1640_v24 = vmul.f32 %v1619_v16, %v2579_v31 }
0x113e   :  { %v1669_v42 = vadd.f32 %v1668_v26, %v1667_v60 }
0x113f   :  { %v1655_v1 = vsel %vm287_vm3, %v1640_v24, 0.0 }
0x1140   :  { %v1671_v23 = vadd.f32 %v1670_v63, %v1669_v42  ;;  %v1656_v15 = vadd.f32 %v1655_v1, %v1654_v61 }
0x1142   :  { %1672 = vst.msk [vmem:[%s2706_s7] sm:$0xff] %vm287_vm3, %v1656_v15  ;;  %1673 = vst.msk [vmem:[%s2706_s7 + $0x8] sm:$0xff] %vm287_vm3, %v1671_v23 }

// kernel: hierarchical_attention_gru.3
= control target key start
LH: loop header
LB: loop body
LE: loop exit
PB: predicated region body
PF: predicated region fallthrough
CT: control target
= control target key end

     0   :  { %v61_v0 = vlaneseq  ;;  %v1833_v2 = vmov 0   ;;  %v1834_v3 = vmov 1966171168   ;;  %vm168_vm0 = vcmask 523264   ;;  %s1836_s27 = smov 64   ;;  %s2420_s1 = inlined_call_operand.vmem [shape: bf16[64,192], index: 1, kind: input, shape index: {}]   ;;  %s2421_s0 = inlined_call_operand.vmem [shape: bf16[8,2,64], index: 0, kind: input, shape index: {}]   ;;  %s2422_s3 = inlined_call_operand.vmem [shape: bf16[64,192], index: 3, kind: input, shape index: {}]   ;;  %s2423_s2 = inlined_call_operand.vmem [shape: f32[1,192], index: 2, kind: input, shape index: {}]   ;;  %s2424_s4 = inlined_call_operand.vmem [shape: f32[1,64], index: 4, kind: input, shape index: {}]   ;;  %s2425_s6 = inlined_call_operand.<no memory space> [shape: f32[1,1], index: 6, kind: input, shape index: {}]   ;;  %s2426_s5 = inlined_call_operand.vmem [shape: f32[1,64], index: 5, kind: input, shape index: {}]   ;;  %s2427_s7 = inlined_call_operand.vmem [shape: f32[64,32], index: 7, kind: input, shape index: {}]   ;;  %s2428_s10 = inlined_call_operand.<no memory space> [shape: f32[1,1], index: 10, kind: input, shape index: {}]   ;;  %s2429_s8 = inlined_call_operand.vmem [shape: f32[1,32], index: 8, kind: input, shape index: {}]   ;;  %s2430_s9 = inlined_call_operand.vmem [shape: f32[1,32], index: 9, kind: input, shape index: {}]   ;;  %s2431_s11 = inlined_call_operand.vmem [shape: f32[2,1], index: 11, kind: output, shape index: {}]  }
   0x1   :  { %v1727_v1 = vld [vmem:[%s2420_s1 + $0x4] ss:$8 sps:$4 sm:$0xff]   ;;  %204 = vmatprep.mubr.bf16.mxu0 %v1833_v2  ;;  %v84_v4 = vunpack.c.l.s4 %v1834_v3  ;;  %654 = vmatprep.mubr.bf16.mxu1 %v1833_v2  ;;  %v1729_v5 = vld [vmem:[%s2420_s1] ss:$8 sps:$4 sm:$0xff]   ;;  %v1730_v7 = vld [vmem:[%s2420_s1 + $0x14] ss:$8 sps:$4 sm:$0xff]  }
   0x2   :  { %v1909_v6 = vshrl.u32 %v61_v0, 7  ;;  %1726 = vset.pattern.permute.xlu1 %v1833_v2  ;;  %1725 = vset.pattern.permute.xlu0 %v1833_v2  ;;  %v1732_v9 = vld [vmem:[%s2420_s1 + $0x10] ss:$8 sps:$4 sm:$0xff]   ;;  %v1733_v10 = vld [vmem:[%s2420_s1 + $0x24] ss:$8 sps:$4 sm:$0xff]   ;;  %v2040_v50 = vand.u32 127, %v61_v0 }
   0x3   :  { %172 = vmatprep.subr.bf16.mxu0 %v1727_v1  ;;  %v85_v8 = vunpack.c.0.s8 %v84_v4  ;;  %v1735_v12 = vld [vmem:[%s2420_s1 + $0x20] ss:$8 sps:$4 sm:$0xff]   ;;  %v1736_v15 = vld [vmem:[%s2420_s1 + $0x34] ss:$8 sps:$4 sm:$0xff]   ;;  %v47_v18 = vld [vmem:[%s2421_s0 + $0x4] sm:$0x1] }
   0x4   :  { %173 = vmatpush1.bf16.msra.mxu0 %v1729_v5  ;;  %v43_v13 = vld [vmem:[%s2421_s0] sm:$0x1]  ;;  %v44_v14 = vld [vmem:[%s2421_s0 + $0x1] sm:$0x1]  ;;  %v45_v16 = vld [vmem:[%s2421_s0 + $0x2] sm:$0x1] }
   0x5   :  { %174 = vmatprep.subr.bf16.mxu0 %v1730_v7  ;;  %v1923_v11 = vsub.s32 %v85_v8, %v1909_v6  ;;  %v46_v17 = vld [vmem:[%s2421_s0 + $0x3] sm:$0x1]  ;;  %v79_v19 = vcombine.low %v43_v13, %v44_v14  ;;  %v48_v20 = vld [vmem:[%s2421_s0 + $0x5] sm:$0x1]  ;;  %v49_v21 = vld [vmem:[%s2421_s0 + $0x6] sm:$0x1] }
   0x6   :  { %v50_v22 = vld [vmem:[%s2421_s0 + $0x7] sm:$0x1]  ;;  %v80_v23 = vcombine.low %v45_v16, %v46_v17  ;;  %v81_v24 = vcombine.low %v47_v18, %v48_v20  ;;  %v1965_v29 = vld [vmem:[%s2422_s3] ss:$8 sps:$4 sm:$0xff]   ;;  %v1973_v32 = vld [vmem:[%s2422_s3 + $0x14] ss:$8 sps:$4 sm:$0xff]  }
   0x7   :  { %v82_v25 = vcombine.low %v49_v21, %v50_v22  ;;  %v89_v26 = vrot.slane %v79_v19, %v1923_v11  ;;  %v1959_v27 = vld [vmem:[%s2422_s3 + $0x4] ss:$8 sps:$4 sm:$0xff]   ;;  %v1738_v33 = vld [vmem:[%s2420_s1 + $0x30] ss:$8 sps:$4 sm:$0xff]   ;;  %v1996_v40 = vld [vmem:[%s2422_s3 + $0x20] ss:$8 sps:$4 sm:$0xff]  }
   0x8   :  { %175 = vmatpush1.bf16.msra.mxu0 %v1732_v9  ;;  %v96_v28 = vrot.slane %v80_v23, %v1923_v11  ;;  %v103_v30 = vrot.slane %v81_v24, %v1923_v11  ;;  %622 = vmatprep.subr.bf16.mxu1 %v1959_v27  ;;  %v1982_v35 = vld [vmem:[%s2422_s3 + $0x10] ss:$8 sps:$4 sm:$0xff]   ;;  %v1988_v37 = vld [vmem:[%s2422_s3 + $0x24] ss:$8 sps:$4 sm:$0xff]   ;;  %v2002_v42 = vld [vmem:[%s2422_s3 + $0x34] ss:$8 sps:$4 sm:$0xff]  }
   0x9   :  { %176 = vmatprep.subr.bf16.mxu0 %v1733_v10  ;;  %v110_v31 = vrot.slane %v82_v25, %v1923_v11  ;;  %623 = vmatpush1.bf16.msra.mxu1 %v1965_v29  ;;  %v2010_v43 = vld [vmem:[%s2422_s3 + $0x30] ss:$8 sps:$4 sm:$0xff]   ;;  %v63_v44 = vsub.s32 0, %v1909_v6  ;;  %v59_v45 = vld [vmem:[%s2423_s2] sm:$0x3]  ;;  %v67_v46 = vsub.s32 1, %v1909_v6 }
   0xa   :  { %v111_v34 = vcombine.low %v89_v26, %v96_v28  ;;  %624 = vmatprep.subr.bf16.mxu1 %v1973_v32  ;;  %v1835_v47 = vmov 1983009808   ;;  %v257_v56 = vadd.s32 128, %v2040_v50  ;;  %v262_v0 = vand.u32 63, %v2040_v50 }
   0xb   :  { %v112_v36 = vcombine.low %v103_v30, %v110_v31  ;;  %v222_v48 = vunpack.c.l.s4 %v1835_v47  ;;  %v64_v49 = vrot.slane %v59_v45, %v63_v44  ;;  %v68_v51 = vrot.slane %v59_v45, %v67_v46 }
   0xc   :  { %177 = vmatpush1.bf16.msra.mxu0 %v1735_v12  ;;  %v119_v38 = vrot.slane %v111_v34, %v1923_v11  ;;  %v269_v3 = vand.u32 63, %v257_v56  ;;  %vm2057_vm1 = vcmp.lt.s32.totalorder %v262_v0, 32  ;;  %vm330_vm3 = vcmask 1040384  }
   0xd   :  { %178 = vmatprep.subr.bf16.mxu0 %v1736_v15  ;;  %v126_v39 = vrot.slane %v112_v36, %v1923_v11  ;;  %625 = vmatpush1.bf16.msra.mxu1 %v1982_v35  ;;  %v223_v52 = vunpack.c.0.s8 %v222_v48  ;;  %vm331_vm4 = vcmask 517121   ;;  %vm696_vm6 = vcmask 517120  }
   0xe   :  { %626 = vmatprep.subr.bf16.mxu1 %v1988_v37  ;;  %vm2061_vm2 = vcmp.lt.s32.totalorder %v269_v3, 32  ;;  %vm2103_vm5 = vmor %vm331_vm4, %vm330_vm3  ;;  %vm1293_vm7 = vcmp.lt.s32.totalorder %v2040_v50, 32  ;;  %vm1390_vm8 = vcmask 1024   ;;  %vm1838_vm9 = vmmov 0  }
   0xf   :  { %v127_v41 = vcombine.low %v119_v38, %v126_v39  ;;  %v2044_v58 = vsub.s32 %v223_v52, %v1909_v6  ;;  %vm1614_vm10 = vcmask 254976  }
  0x10   :  { %179 = vmatpush1.bf16.msra.mxu0 %v1738_v33 }
  0x11   :  { %707 = vmatprep.subr.bf16.mxu0 %v1959_v27  ;;  %627 = vmatpush1.bf16.msra.mxu1 %v1996_v40 }
  0x12   :  { %628 = vmatprep.subr.bf16.mxu1 %v2002_v42 }
  0x13   :  { %1639 = vmatmul.mubr.msk.bf16.vlgmr.msra.gmra.mrb[0].mxu0 %vm168_vm0, %v127_v41 }
  0x14   :  { %708 = vmatpush1.bf16.msra.mxu0 %v1965_v29  ;;  %739 = vmatprep.mubr.bf16.mxu0 %v1833_v2 }
  0x15   :  { %709 = vmatprep.subr.bf16.mxu0 %v1973_v32  ;;  %629 = vmatpush1.bf16.msra.mxu1 %v2010_v43 }
  0x16   :  { %792 = vmatprep.subr.bf16.mxu1 %v1959_v27 }
  0x18   :  { %710 = vmatpush1.bf16.msra.mxu0 %v1982_v35  ;;  %655 = vmatmul.mubr.bf16.vlgmr.msra.gmra.mrb[0].mxu1 %v1833_v2 }
  0x19   :  { %711 = vmatprep.subr.bf16.mxu0 %v1988_v37  ;;  %793 = vmatpush1.bf16.msra.mxu1 %v1965_v29 }
  0x1a   :  { %794 = vmatprep.subr.bf16.mxu1 %v1973_v32  ;;  %824 = vmatprep.mubr.bf16.mxu1 %v1833_v2 }
  0x1c   :  { %712 = vmatpush1.bf16.msra.mxu0 %v1996_v40 }
  0x1d   :  { %713 = vmatprep.subr.bf16.mxu0 %v2002_v42  ;;  %795 = vmatpush1.bf16.msra.mxu1 %v1982_v35 }
  0x1e   :  { %796 = vmatprep.subr.bf16.mxu1 %v1988_v37 }
  0x20   :  { %714 = vmatpush1.bf16.msra.mxu0 %v2010_v43 }
  0x21   :  { %877 = vmatprep.subr.bf16.mxu0 %v1959_v27  ;;  %797 = vmatpush1.bf16.msra.mxu1 %v1996_v40 }
  0x22   :  { %798 = vmatprep.subr.bf16.mxu1 %v2002_v42 }
  0x25   :  { %799 = vmatpush1.bf16.msra.mxu1 %v2010_v43 }
  0x26   :  { %962 = vmatprep.subr.bf16.mxu1 %v1959_v27 }
  0xe6   :  { %v206_v53 = vpop.f32.mrb[0].mxu0 }
  0xe7   :  { %v207_v54 = vadd.f32 %v206_v53, %v64_v49  ;;  %v208_v55 = vpop.f32.mrb[1].mxu0 }
  0xe8   :  { %v209_v57 = vadd.f32 %v208_v55, %v68_v51  ;;  %v210_v59 = vpop.f32.mrb[2].mxu0 }
  0xe9   :  { %v211_v60 = vadd.f32 %v210_v59, %v64_v49  ;;  %v212_v61 = vpop.f32.mrb[3].mxu0 }
  0xea   :  { %v219_v62 = vcombine.low %v207_v54, %v209_v57  ;;  %v220_v63 = vcombine.high %v207_v54, %v209_v57  ;;  %v213_v1 = vadd.f32 %v212_v61, %v68_v51 }
  0xeb   :  { %v2053_v13 = vpop.f32.mrb[0].mxu1 }
  0xec   :  { %v227_v4 = vrot.slane %v219_v62, %v2044_v58  ;;  %v234_v5 = vrot.slane %v220_v63, %v2044_v58  ;;  %v237_v7 = vcombine.low %v211_v60, %v213_v1  ;;  %v238_v8 = vcombine.high %v211_v60, %v213_v1  ;;  %v2065_v18 = vpop.f32.mrb[1].mxu1 }
  0xed   :  { %v660_v21 = vpop.f32.mrb[2].mxu1 }
  0xee   :  { %v235_v9 = vcombine.high %v227_v4, %v227_v4  ;;  %v236_v10 = vcombine.high %v234_v5, %v234_v5  ;;  %v2050_v6 = vrot.slane %v227_v4, %v2044_v58  ;;  %v384_v12 = vrot.slane %v234_v5, %v2044_v58  ;;  %v661_v26 = vpop.f32.mrb[3].mxu1 }
  0xef   :  { %v245_v14 = vrot.slane %v237_v7, %v2044_v58  ;;  %v252_v15 = vrot.slane %v238_v8, %v2044_v58 }
  0xf0   :  { %v340_v19 = vrot.slane %v235_v9, %v2044_v58  ;;  %v428_v20 = vrot.slane %v236_v10, %v2044_v58  ;;  %v295_v28 = vcombine.high %v2050_v6, %v2050_v6  ;;  %v385_v31 = vcombine.high %v384_v12, %v384_v12 }
  0xf1   :  { %v253_v22 = vcombine.high %v245_v14, %v245_v14  ;;  %v254_v23 = vcombine.high %v252_v15, %v252_v15  ;;  %v350_v24 = vrot.slane %v252_v15, %v2044_v58  ;;  %v438_v25 = vrot.slane %v245_v14, %v2044_v58 }
  0xf2   :  { %v341_v30 = vcombine.high %v340_v19, %v340_v19  ;;  %v429_v33 = vcombine.high %v428_v20, %v428_v20 }
  0xf3   :  { %v304_v34 = vrot.slane %v254_v23, %v2044_v58  ;;  %v351_v36 = vcombine.high %v350_v24, %v350_v24  ;;  %v354_v38 = vsel %vm2057_vm1, %v340_v19, %v350_v24  ;;  %v394_v39 = vrot.slane %v253_v22, %v2044_v58 }
  0xf4   :  { %v439_v41 = vcombine.high %v438_v25, %v438_v25  ;;  %v442_v44 = vsel %vm2057_vm1, %v428_v20, %v438_v25  ;;  %v466_v45 = vsel %vm2057_vm1, %v438_v25, %v428_v20  ;;  %v514_v46 = vsel %vm2057_vm1, %v350_v24, %v340_v19 }
  0xf5   :  { %v305_v47 = vcombine.high %v304_v34, %v304_v34  ;;  %v308_v48 = vsel %vm2057_vm1, %v2050_v6, %v304_v34  ;;  %v355_v49 = vsel %vm2061_vm2, %v341_v30, %v351_v36  ;;  %v395_v51 = vcombine.high %v394_v39, %v394_v39 }
  0xf6   :  { %v1641_v52 = vpack.c.bf16 %v355_v49, %v354_v38  ;;  %v398_v53 = vsel %vm2057_vm1, %v384_v12, %v394_v39  ;;  %v443_v54 = vsel %vm2061_vm2, %v429_v33, %v439_v41  ;;  %v467_v55 = vsel %vm2061_vm2, %v439_v41, %v429_v33 }
  0xf7   :  { %v309_v56 = vsel %vm2061_vm2, %v295_v28, %v305_v47  ;;  %v399_v57 = vsel %vm2061_vm2, %v385_v31, %v395_v51  ;;  %v1643_v59 = vpack.c.bf16 %v443_v54, %v442_v44  ;;  %v1644_v60 = vpack.c.bf16 %v467_v55, %v466_v45 }
  0xf8   :  { %v1640_v61 = vpack.c.bf16 %v309_v56, %v308_v48  ;;  %v367_v62 = vrot.slane %v1641_v52, %v1923_v11  ;;  %v1642_v63 = vpack.c.bf16 %v399_v57, %v398_v53  ;;  %v490_v1 = vsel %vm2057_vm1, %v394_v39, %v384_v12  ;;  %v2151_v39 = vld [vmem:[%s2424_s4] ss:$0 sm:$0xff] }
  0xf9   :  { %v455_v3 = vrot.slane %v1643_v59, %v1923_v11  ;;  %v479_v4 = vrot.slane %v1644_v60, %v1923_v11  ;;  %v491_v5 = vsel %vm2061_vm2, %v395_v51, %v385_v31  ;;  %v515_v7 = vsel %vm2061_vm2, %v351_v36, %v341_v30 }
  0xfa   :  { %v321_v8 = vrot.slane %v1640_v61, %v1923_v11  ;;  %v374_v9 = vrot.slane %v367_v62, %v1923_v11  ;;  %v411_v10 = vrot.slane %v1642_v63, %v1923_v11  ;;  %v1645_v12 = vpack.c.bf16 %v491_v5, %v490_v1 }
  0xfb   :  { %v462_v14 = vrot.slane %v455_v3, %v1923_v11  ;;  %v486_v15 = vrot.slane %v479_v4, %v1923_v11  ;;  %v1646_v19 = vpack.c.bf16 %v515_v7, %v514_v46  ;;  %v538_v20 = vsel %vm2057_vm1, %v304_v34, %v2050_v6 }
  0xfc   :  { %v328_v21 = vrot.slane %v321_v8, %v1923_v11  ;;  %377 = vst.msk [vmem:[#allocation2 + $0x2] sm:$0x3] %vm2103_vm5, %v374_v9  ;;  %v418_v22 = vrot.slane %v411_v10, %v1923_v11  ;;  %v503_v23 = vrot.slane %v1645_v12, %v1923_v11  ;;  %v539_v24 = vsel %vm2061_vm2, %v305_v47, %v295_v28 }
  0xfd   :  { %465 = vst.msk [vmem:[#allocation2 + $0x6] sm:$0x3] %vm2103_vm5, %v462_v14  ;;  %489 = vst.msk [vmem:[#allocation2 + $0x8] sm:$0x3] %vm2103_vm5, %v486_v15  ;;  %v527_v6 = vrot.slane %v1646_v19, %v1923_v11  ;;  %v1647_v16 = vpack.c.bf16 %v539_v24, %v538_v20 }
  0xfe   :  { %333 = vst.msk [vmem:[#allocation2] sm:$0x3] %vm2103_vm5, %v328_v21  ;;  %421 = vst.msk [vmem:[#allocation2 + $0x4] sm:$0x3] %vm2103_vm5, %v418_v22  ;;  %v510_v25 = vrot.slane %v503_v23, %v1923_v11 }
  0xff   :  { %v534_v17 = vrot.slane %v527_v6, %v1923_v11  ;;  %v551_v26 = vrot.slane %v1647_v16, %v1923_v11 }
 0x100   :  { %513 = vst.msk [vmem:[#allocation2 + $0xa] sm:$0x3] %vm2103_vm5, %v510_v25 }
 0x101   :  { %537 = vst.msk [vmem:[#allocation2 + $0xc] sm:$0x3] %vm2103_vm5, %v534_v17  ;;  %v558_v28 = vrot.slane %v551_v26, %v1923_v11  ;;  %v670_v11 = vadd.f32 %v2151_v39, %v2065_v18 }
 0x103   :  { %561 = vst.msk [vmem:[#allocation2 + $0xe] sm:$0x3] %vm2103_vm5, %v558_v28  ;;  %v698_v54 = vld [vmem:[#allocation2 + $0x2] sm:$0x3] }
 0x104   :  { %v699_v55 = vunpack.c.l.bf16 %v698_v54 }
 0x105   :  { %v577_v30 = vld [vmem:[#allocation2] sm:$0x3]  ;;  %v783_v21 = vld [vmem:[#allocation2 + $0x4] sm:$0x3] }
 0x106   :  { %v578_v31 = vunpack.c.l.bf16 %v577_v30  ;;  %v758_v4 = vrot.slane %v699_v55, 2  ;;  %v784_v22 = vunpack.c.l.bf16 %v783_v21 }
 0x108   :  { %v663_v33 = vadd.f32 %v2053_v13, %v578_v31  ;;  %v673_v44 = vrot.slane %v578_v31, 2 }
 0x10a   :  { %v1657_v34 = vmul.f32 -1.442695, %v663_v33  ;;  %v843_v33 = vrot.slane %v784_v22, 2 }
 0x10c   :  { %1751 = vpow2.f32 %v1657_v34 }
 0x116   :  { %v1752_v36 = vpop.eup %1751 }
 0x117   :  { %v667_v38 = vadd.f32 1.0, %v1752_v36 }
 0x119   :  { %1753 = vrcp.f32 %v667_v38 }
 0x123   :  { %v1754_v41 = vpop.eup %1753 }
 0x124   :  { %v671_v45 = vmul.f32 %v1754_v41, %v670_v11  ;;  %v677_v13 = vsub.f32 1.0, %v1754_v41  ;;  %v683_v49 = vmul.f32 0.0, %v1754_v41 }
 0x126   :  { %v675_v46 = vadd.f32 %v673_v44, %v671_v45 }
 0x128   :  { %1755 = vtanh.f32 %v675_v46 }
 0x132   :  { %v1756_v47 = vpop.eup %1755 }
 0x133   :  { %679 = vrot.lane.b32.xlu0 %v1756_v47, %s1836_s27 }
 0x1a5   :  { %v680_v48 = vpop.permute.xlu0 %679 }
 0x1a6   :  { %v682_v51 = vmul.f32 %v680_v48, %v677_v13  ;;  %v868_v48 = vld [vmem:[#allocation2 + $0x6] sm:$0x3] }
 0x1a8   :  { %v2156_v52 = vadd.f32 %v683_v49, %v682_v51  ;;  %v869_v49 = vunpack.c.l.bf16 %v868_v48 }
 0x1aa   :  { %v700_v53 = vpack.c.bf16 %v2156_v52, %v2156_v52 }
 0x1ac   :  { %702 = vrot.lane.b32.xlu0 %v700_v53, %s1836_s27 }
 0x21e   :  { %v703_v18 = vpop.permute.xlu0 %702 }
 0x21f   :  { %1658 = vmatmul.mubr.msk.bf16.vlgmr.msra.gmra.mrb[4].mxu0 %vm168_vm0, %v703_v18 }
 0x220   :  { %878 = vmatpush1.bf16.msra.mxu0 %v1965_v29  ;;  %909 = vmatprep.mubr.bf16.mxu0 %v1833_v2 }
 0x221   :  { %879 = vmatprep.subr.bf16.mxu0 %v1973_v32 }
 0x224   :  { %880 = vmatpush1.bf16.msra.mxu0 %v1982_v35 }
 0x225   :  { %881 = vmatprep.subr.bf16.mxu0 %v1988_v37 }
 0x228   :  { %882 = vmatpush1.bf16.msra.mxu0 %v1996_v40 }
 0x229   :  { %883 = vmatprep.subr.bf16.mxu0 %v2002_v42 }
 0x22c   :  { %884 = vmatpush1.bf16.msra.mxu0 %v2010_v43 }
 0x22d   :  { %1047 = vmatprep.subr.bf16.mxu0 %v1959_v27 }
 0x2f2   :  { %v741_v56 = vpop.f32.mrb[4].mxu0 }
 0x2f3   :  { %v748_v57 = vadd.f32 %v741_v56, %v699_v55  ;;  %v743_v59 = vpop.f32.mrb[5].mxu0 }
 0x2f4   :  { %v745_v60 = vpop.f32.mrb[6].mxu0  ;;  %v755_v0 = vadd.f32 %v2151_v39, %v743_v59 }
 0x2f5   :  { %v1659_v61 = vmul.f32 -1.442695, %v748_v57  ;;  %v746_v62 = vpop.f32.mrb[7].mxu0 }
 0x2f6   :  { %v928_v62 = vrot.slane %v869_v49, 2 }
 0x2f7   :  { %1757 = vpow2.f32 %v1659_v61 }
 0x301   :  { %v1758_v63 = vpop.eup %1757 }
 0x302   :  { %v752_v1 = vadd.f32 1.0, %v1758_v63 }
 0x304   :  { %1759 = vrcp.f32 %v752_v1 }
 0x30e   :  { %v1760_v3 = vpop.eup %1759 }
 0x30f   :  { %v756_v5 = vmul.f32 %v1760_v3, %v755_v0  ;;  %v762_v9 = vsub.f32 1.0, %v1760_v3  ;;  %v768_v12 = vmul.f32 %v1760_v3, %v2156_v52 }
 0x311   :  { %v760_v7 = vadd.f32 %v758_v4, %v756_v5 }
 0x313   :  { %1761 = vtanh.f32 %v760_v7 }
 0x31d   :  { %v1762_v8 = vpop.eup %1761 }
 0x31e   :  { %764 = vrot.lane.b32.xlu1 %v1762_v8, %s1836_s27 }
 0x390   :  { %v765_v10 = vpop.permute.xlu1 %764 }
 0x391   :  { %v767_v14 = vmul.f32 %v765_v10, %v762_v9  ;;  %v953_v10 = vld [vmem:[#allocation2 + $0x8] sm:$0x3] }
 0x393   :  { %v2174_v15 = vadd.f32 %v768_v12, %v767_v14  ;;  %v954_v12 = vunpack.c.l.bf16 %v953_v10 }
 0x395   :  { %v785_v19 = vpack.c.bf16 %v2174_v15, %v2174_v15 }
 0x397   :  { %787 = vrot.lane.b32.xlu1 %v785_v19, %s1836_s27 }
 0x409   :  { %v788_v20 = vpop.permute.xlu1 %787 }
 0x40a   :  { %1660 = vmatmul.mubr.msk.bf16.vlgmr.msra.gmra.mrb[4].mxu1 %vm168_vm0, %v788_v20 }
 0x40b   :  { %963 = vmatpush1.bf16.msra.mxu1 %v1965_v29  ;;  %994 = vmatprep.mubr.bf16.mxu1 %v1833_v2 }
 0x40c   :  { %964 = vmatprep.subr.bf16.mxu1 %v1973_v32 }
 0x40f   :  { %965 = vmatpush1.bf16.msra.mxu1 %v1982_v35 }
 0x410   :  { %966 = vmatprep.subr.bf16.mxu1 %v1988_v37 }
 0x413   :  { %967 = vmatpush1.bf16.msra.mxu1 %v1996_v40 }
 0x414   :  { %968 = vmatprep.subr.bf16.mxu1 %v2002_v42 }
 0x417   :  { %969 = vmatpush1.bf16.msra.mxu1 %v2010_v43 }
 0x418   :  { %1132 = vmatprep.subr.bf16.mxu1 %v1959_v27 }
 0x4dd   :  { %v826_v23 = vpop.f32.mrb[4].mxu1 }
 0x4de   :  { %v833_v24 = vadd.f32 %v826_v23, %v784_v22  ;;  %v828_v6 = vpop.f32.mrb[5].mxu1 }
 0x4df   :  { %v830_v16 = vpop.f32.mrb[6].mxu1  ;;  %v840_v30 = vadd.f32 %v2151_v39, %v828_v6 }
 0x4e0   :  { %v1661_v25 = vmul.f32 -1.442695, %v833_v24  ;;  %v831_v17 = vpop.f32.mrb[7].mxu1 }
 0x4e1   :  { %v1013_v17 = vrot.slane %v954_v12, 2 }
 0x4e2   :  { %1763 = vpow2.f32 %v1661_v25 }
 0x4ec   :  { %v1764_v26 = vpop.eup %1763 }
 0x4ed   :  { %v837_v28 = vadd.f32 1.0, %v1764_v26 }
 0x4ef   :  { %1765 = vrcp.f32 %v837_v28 }
 0x4f9   :  { %v1766_v31 = vpop.eup %1765 }
 0x4fa   :  { %v841_v34 = vmul.f32 %v1766_v31, %v840_v30  ;;  %v847_v11 = vsub.f32 1.0, %v1766_v31  ;;  %v853_v44 = vmul.f32 %v1766_v31, %v2174_v15 }
 0x4fc   :  { %v845_v36 = vadd.f32 %v843_v33, %v841_v34 }
 0x4fe   :  { %1767 = vtanh.f32 %v845_v36 }
 0x508   :  { %v1768_v38 = vpop.eup %1767 }
 0x509   :  { %849 = vrot.lane.b32.xlu0 %v1768_v38, %s1836_s27 }
 0x57b   :  { %v850_v41 = vpop.permute.xlu0 %849 }
 0x57c   :  { %v852_v45 = vmul.f32 %v850_v41, %v847_v11 }
 0x57e   :  { %v2192_v46 = vadd.f32 %v853_v44, %v852_v45  ;;  %v1038_v44 = vld [vmem:[#allocation2 + $0xa] sm:$0x3] }
 0x57f   :  { %v1039_v45 = vunpack.c.l.bf16 %v1038_v44 }
 0x580   :  { %v870_v47 = vpack.c.bf16 %v2192_v46, %v2192_v46 }
 0x582   :  { %872 = vrot.lane.b32.xlu1 %v870_v47, %s1836_s27 }
 0x5f4   :  { %v873_v13 = vpop.permute.xlu1 %872 }
 0x5f5   :  { %1662 = vmatmul.mubr.msk.bf16.vlgmr.msra.gmra.mrb[8].mxu0 %vm168_vm0, %v873_v13 }
 0x5f6   :  { %1048 = vmatpush1.bf16.msra.mxu0 %v1965_v29  ;;  %1079 = vmatprep.mubr.bf16.mxu0 %v1833_v2 }
 0x5f7   :  { %1049 = vmatprep.subr.bf16.mxu0 %v1973_v32 }
 0x5fa   :  { %1050 = vmatpush1.bf16.msra.mxu0 %v1982_v35 }
 0x5fb   :  { %1051 = vmatprep.subr.bf16.mxu0 %v1988_v37 }
 0x5fe   :  { %1052 = vmatpush1.bf16.msra.mxu0 %v1996_v40 }
 0x5ff   :  { %1053 = vmatprep.subr.bf16.mxu0 %v2002_v42 }
 0x602   :  { %1054 = vmatpush1.bf16.msra.mxu0 %v2010_v43 }
 0x603   :  { %1217 = vmatprep.subr.bf16.mxu0 %v1959_v27 }
 0x6c8   :  { %v911_v51 = vpop.f32.mrb[8].mxu0 }
 0x6c9   :  { %v918_v53 = vadd.f32 %v911_v51, %v869_v49  ;;  %v913_v18 = vpop.f32.mrb[9].mxu0 }
 0x6ca   :  { %v915_v54 = vpop.f32.mrb[10].mxu0  ;;  %v925_v60 = vadd.f32 %v2151_v39, %v913_v18 }
 0x6cb   :  { %v1663_v55 = vmul.f32 -1.442695, %v918_v53  ;;  %v916_v56 = vpop.f32.mrb[11].mxu0 }
 0x6cd   :  { %1769 = vpow2.f32 %v1663_v55 }
 0x6d7   :  { %v1770_v57 = vpop.eup %1769 }
 0x6d8   :  { %v922_v59 = vadd.f32 1.0, %v1770_v57 }
 0x6da   :  { %1771 = vrcp.f32 %v922_v59 }
 0x6e4   :  { %v1772_v61 = vpop.eup %1771 }
 0x6e5   :  { %v926_v63 = vmul.f32 %v1772_v61, %v925_v60  ;;  %v932_v0 = vsub.f32 1.0, %v1772_v61  ;;  %v938_v4 = vmul.f32 %v1772_v61, %v2192_v46  ;;  %v1123_v61 = vld [vmem:[#allocation2 + $0xc] sm:$0x3] }
 0x6e7   :  { %v930_v1 = vadd.f32 %v928_v62, %v926_v63  ;;  %v1124_v62 = vunpack.c.l.bf16 %v1123_v61 }
 0x6e9   :  { %1773 = vtanh.f32 %v930_v1 }
 0x6f3   :  { %v1774_v27 = vpop.eup %1773 }
 0x6f4   :  { %934 = vrot.lane.b32.xlu0 %v1774_v27, %s1836_s27 }
 0x766   :  { %v935_v3 = vpop.permute.xlu0 %934 }
 0x767   :  { %v937_v5 = vmul.f32 %v935_v3, %v932_v0 }
 0x769   :  { %v2210_v7 = vadd.f32 %v938_v4, %v937_v5 }
 0x76b   :  { %v955_v8 = vpack.c.bf16 %v2210_v7, %v2210_v7 }
 0x76d   :  { %957 = vrot.lane.b32.xlu1 %v955_v8, %s1836_s27 }
 0x7df   :  { %v958_v9 = vpop.permute.xlu1 %957 }
 0x7e0   :  { %1664 = vmatmul.mubr.msk.bf16.vlgmr.msra.gmra.mrb[8].mxu1 %vm168_vm0, %v958_v9 }
 0x7e1   :  { %1133 = vmatpush1.bf16.msra.mxu1 %v1965_v29  ;;  %1164 = vmatprep.mubr.bf16.mxu1 %v1833_v2 }
 0x7e2   :  { %1134 = vmatprep.subr.bf16.mxu1 %v1973_v32 }
 0x7e5   :  { %1135 = vmatpush1.bf16.msra.mxu1 %v1982_v35 }
 0x7e6   :  { %1136 = vmatprep.subr.bf16.mxu1 %v1988_v37 }
 0x7e9   :  { %1137 = vmatpush1.bf16.msra.mxu1 %v1996_v40 }
 0x7ea   :  { %1138 = vmatprep.subr.bf16.mxu1 %v2002_v42 }
 0x7ed   :  { %1139 = vmatpush1.bf16.msra.mxu1 %v2010_v43 }
 0x8b3   :  { %v996_v14 = vpop.f32.mrb[8].mxu1 }
 0x8b4   :  { %v1003_v19 = vadd.f32 %v996_v14, %v954_v12  ;;  %v998_v20 = vpop.f32.mrb[9].mxu1  ;;  %v1183_v12 = vrot.slane %v1124_v62, 2 }
 0x8b5   :  { %v1000_v21 = vpop.f32.mrb[10].mxu1  ;;  %v1010_v16 = vadd.f32 %v2151_v39, %v998_v20 }
 0x8b6   :  { %v1665_v22 = vmul.f32 -1.442695, %v1003_v19  ;;  %v1001_v23 = vpop.f32.mrb[11].mxu1 }
 0x8b8   :  { %1775 = vpow2.f32 %v1665_v22 }
 0x8c2   :  { %v1776_v24 = vpop.eup %1775 }
 0x8c3   :  { %v1007_v6 = vadd.f32 1.0, %v1776_v24 }
 0x8c5   :  { %1777 = vrcp.f32 %v1007_v6 }
 0x8cf   :  { %v1778_v25 = vpop.eup %1777 }
 0x8d0   :  { %v1011_v26 = vmul.f32 %v1778_v25, %v1010_v16  ;;  %v1017_v31 = vsub.f32 1.0, %v1778_v25  ;;  %v1023_v34 = vmul.f32 %v1778_v25, %v2210_v7  ;;  %v692_v25 = vrot.slane %v2156_v52, %v2044_v58 }
 0x8d2   :  { %v1015_v28 = vadd.f32 %v1013_v17, %v1011_v26  ;;  %v862_v17 = vrot.slane %v2192_v46, %v2044_v58 }
 0x8d4   :  { %1779 = vtanh.f32 %v1015_v28 }
 0x8de   :  { %v1780_v30 = vpop.eup %1779 }
 0x8df   :  { %1019 = vrot.lane.b32.xlu0 %v1780_v30, %s1836_s27 }
 0x951   :  { %v1020_v33 = vpop.permute.xlu0 %1019 }
 0x952   :  { %v1022_v36 = vmul.f32 %v1020_v33, %v1017_v31 }
 0x954   :  { %v2227_v38 = vadd.f32 %v1023_v34, %v1022_v36  ;;  %v1208_v34 = vld [vmem:[#allocation2 + $0xe] sm:$0x3] }
 0x955   :  { %v1209_v36 = vunpack.c.l.bf16 %v1208_v34 }
 0x956   :  { %v1040_v11 = vpack.c.bf16 %v2227_v38, %v2227_v38  ;;  %v1032_v26 = vrot.slane %v2227_v38, %v2044_v58 }
 0x958   :  { %1042 = vrot.lane.b32.xlu1 %v1040_v11, %s1836_s27 }
 0x9ca   :  { %v1043_v41 = vpop.permute.xlu1 %1042 }
 0x9cb   :  { %1666 = vmatmul.mubr.msk.bf16.vlgmr.msra.gmra.mrb[12].mxu0 %vm168_vm0, %v1043_v41 }
 0x9cc   :  { %1218 = vmatpush1.bf16.msra.mxu0 %v1965_v29  ;;  %1249 = vmatprep.mubr.bf16.mxu0 %v1833_v2 }
 0x9cd   :  { %1219 = vmatprep.subr.bf16.mxu0 %v1973_v32 }
 0x9d0   :  { %1220 = vmatpush1.bf16.msra.mxu0 %v1982_v35 }
 0x9d1   :  { %1221 = vmatprep.subr.bf16.mxu0 %v1988_v37 }
 0x9d4   :  { %1222 = vmatpush1.bf16.msra.mxu0 %v1996_v40  ;;  %v1098_v40 = vrot.slane %v1039_v45, 2 }
 0x9d5   :  { %1223 = vmatprep.subr.bf16.mxu0 %v2002_v42 }
 0x9d8   :  { %1224 = vmatpush1.bf16.msra.mxu0 %v2010_v43 }
 0xa9e   :  { %v1081_v47 = vpop.f32.mrb[12].mxu0 }
 0xa9f   :  { %v1088_v13 = vadd.f32 %v1081_v47, %v1039_v45  ;;  %v1083_v48 = vpop.f32.mrb[13].mxu0 }
 0xaa0   :  { %v1085_v29 = vpop.f32.mrb[14].mxu0  ;;  %v1095_v35 = vadd.f32 %v2151_v39, %v1083_v48 }
 0xaa1   :  { %v1667_v49 = vmul.f32 -1.442695, %v1088_v13  ;;  %v1086_v2 = vpop.f32.mrb[15].mxu0 }
 0xaa2   :  { %v1268_v2 = vrot.slane %v1209_v36, 2 }
 0xaa3   :  { %1781 = vpow2.f32 %v1667_v49 }
 0xaad   :  { %v1782_v32 = vpop.eup %1781 }
 0xaae   :  { %v1092_v51 = vadd.f32 1.0, %v1782_v32 }
 0xab0   :  { %1783 = vrcp.f32 %v1092_v51 }
 0xaba   :  { %v1784_v37 = vpop.eup %1783 }
 0xabb   :  { %v1096_v53 = vmul.f32 %v1784_v37, %v1095_v35  ;;  %v1102_v18 = vsub.f32 1.0, %v1784_v37  ;;  %v1108_v55 = vmul.f32 %v1784_v37, %v2227_v38  ;;  %v777_v37 = vrot.slane %v2174_v15, %v2044_v58 }
 0xabd   :  { %v1100_v42 = vadd.f32 %v1098_v40, %v1096_v53  ;;  %v947_v40 = vrot.slane %v2210_v7, %v2044_v58 }
 0xabf   :  { %1785 = vtanh.f32 %v1100_v42 }
 0xac9   :  { %v1786_v43 = vpop.eup %1785 }
 0xaca   :  { %1104 = vrot.lane.b32.xlu0 %v1786_v43, %s1836_s27 }
 0xb3c   :  { %v1105_v54 = vpop.permute.xlu0 %1104 }
 0xb3d   :  { %v1107_v56 = vmul.f32 %v1105_v54, %v1102_v18 }
 0xb3f   :  { %v2244_v57 = vadd.f32 %v1108_v55, %v1107_v56 }
 0xb41   :  { %v1125_v59 = vpack.c.bf16 %v2244_v57, %v2244_v57 }
 0xb43   :  { %1127 = vrot.lane.b32.xlu1 %v1125_v59, %s1836_s27 }
 0xbb5   :  { %v1128_v60 = vpop.permute.xlu1 %1127 }
 0xbb6   :  { %1668 = vmatmul.mubr.msk.bf16.vlgmr.msra.gmra.mrb[12].mxu1 %vm168_vm0, %v1128_v60 }
 0xc89   :  { %v1166_v63 = vpop.f32.mrb[12].mxu1 }
 0xc8a   :  { %v1173_v1 = vadd.f32 %v1166_v63, %v1124_v62  ;;  %v1168_v27 = vpop.f32.mrb[13].mxu1 }
 0xc8b   :  { %v1170_v0 = vpop.f32.mrb[14].mxu1  ;;  %v1180_v9 = vadd.f32 %v2151_v39, %v1168_v27  ;;  %v16_v27 = vstv %s2425_s6 }
 0xc8c   :  { %v1669_v3 = vmul.f32 -1.442695, %v1173_v1  ;;  %v1171_v4 = vpop.f32.mrb[15].mxu1  ;;  %17 = vst [vmem:[#allocation4] sm:$0x1] %v16_v27 }
 0xc8e   :  { %1787 = vpow2.f32 %v1669_v3 }
 0xc98   :  { %v1788_v5 = vpop.eup %1787 }
 0xc99   :  { %v1177_v8 = vadd.f32 1.0, %v1788_v5 }
 0xc9b   :  { %1789 = vrcp.f32 %v1177_v8 }
 0xca5   :  { %v1790_v10 = vpop.eup %1789 }
 0xca6   :  { %v1181_v14 = vmul.f32 %v1790_v10, %v1180_v9  ;;  %v1187_v21 = vsub.f32 1.0, %v1790_v10  ;;  %v1193_v23 = vmul.f32 %v1790_v10, %v2244_v57  ;;  %v1672_v9 = vld [vmem:[%s2426_s5] ss:$0 sm:$0xff] }
 0xca8   :  { %v1185_v19 = vadd.f32 %v1183_v12, %v1181_v14 }
 0xcaa   :  { %1791 = vtanh.f32 %v1185_v19 }
 0xcb4   :  { %v1792_v20 = vpop.eup %1791 }
 0xcb5   :  { %1189 = vrot.lane.b32.xlu0 %v1792_v20, %s1836_s27 }
 0xd27   :  { %v1190_v22 = vpop.permute.xlu0 %1189 }
 0xd28   :  { %v1192_v24 = vmul.f32 %v1190_v22, %v1187_v21 }
 0xd2a   :  { %v1194_v6 = vadd.f32 %v1193_v23, %v1192_v24 }
 0xd2c   :  { %v1210_v16 = vpack.c.bf16 %v1194_v6, %v1194_v6  ;;  %v1202_v28 = vrot.slane %v1194_v6, %v2044_v58 }
 0xd2e   :  { %1212 = vrot.lane.b32.xlu1 %v1210_v16, %s1836_s27 }
 0xd32   :  { %693 = vrot.lane.b32.xlu1 %v692_v25, %s1836_s27 }
 0xd36   :  { %863 = vrot.lane.b32.xlu1 %v862_v17, %s1836_s27 }
 0xd3a   :  { %1033 = vrot.lane.b32.xlu1 %v1032_v26, %s1836_s27 }
 0xd3e   :  { %1203 = vrot.lane.b32.xlu1 %v1202_v28, %s1836_s27 }
 0xda0   :  { %v1213_v30 = vpop.permute.xlu1 %1212 }
 0xda1   :  { %1670 = vmatmul.mubr.msk.bf16.vlgmr.msra.gmra.mrb[16].mxu0 %vm168_vm0, %v1213_v30 }
 0xda4   :  { %v694_v52 = vpop.permute.xlu1 %693 }
 0xda5   :  { %697 = vst.msk [vmem:[#allocation3] sm:$0x3] %vm696_vm6, %v694_v52 }
 0xda8   :  { %v864_v31 = vpop.permute.xlu1 %863 }
 0xda9   :  { %867 = vst.msk [vmem:[#allocation3 + $0x4] sm:$0x3] %vm696_vm6, %v864_v31 }
 0xdac   :  { %v1034_v46 = vpop.permute.xlu1 %1033 }
 0xdad   :  { %1037 = vst.msk [vmem:[#allocation3 + $0x8] sm:$0x3] %vm696_vm6, %v1034_v46  ;;  %v1294_v46 = vld [vmem:[#allocation3] sm:$0x3] }
 0xdb0   :  { %v1204_v33 = vpop.permute.xlu1 %1203  ;;  %v1308_v0 = vld [vmem:[#allocation3 + $0x4] sm:$0x3] }
 0xdb1   :  { %1207 = vst.msk [vmem:[#allocation3 + $0xc] sm:$0x3] %vm696_vm6, %v1204_v33 }
 0xdb8   :  { %v1303_v56 = vld [vmem:[#allocation3 + $0xc] sm:$0x3] }
 0xe74   :  { %v1251_v38 = vpop.f32.mrb[16].mxu0 }
 0xe75   :  { %v1258_v11 = vadd.f32 %v1251_v38, %v1209_v36  ;;  %v1253_v41 = vpop.f32.mrb[17].mxu0 }
 0xe76   :  { %v1255_v44 = vpop.f32.mrb[18].mxu0  ;;  %v1265_v29 = vadd.f32 %v2151_v39, %v1253_v41  ;;  %v1117_v39 = vrot.slane %v2244_v57, %v2044_v58 }
 0xe77   :  { %v1671_v45 = vmul.f32 -1.442695, %v1258_v11  ;;  %v1256_v47 = vpop.f32.mrb[19].mxu0 }
 0xe79   :  { %1793 = vpow2.f32 %v1671_v45 }
 0xe83   :  { %v1794_v13 = vpop.eup %1793 }
 0xe84   :  { %v1262_v48 = vadd.f32 1.0, %v1794_v13 }
 0xe86   :  { %1795 = vrcp.f32 %v1262_v48 }
 0xe90   :  { %v1796_v49 = vpop.eup %1795 }
 0xe91   :  { %v1266_v32 = vmul.f32 %v1796_v49, %v1265_v29  ;;  %v1272_v53 = vsub.f32 1.0, %v1796_v49  ;;  %v1278_v43 = vmul.f32 %v1796_v49, %v1194_v6  ;;  %v1673_v49 = vld [vmem:[#allocation4] ss:$0 sm:$0xff] }
 0xe93   :  { %v1270_v51 = vadd.f32 %v1268_v2, %v1266_v32 }
 0xe95   :  { %1797 = vtanh.f32 %v1270_v51 }
 0xe9f   :  { %v1798_v35 = vpop.eup %1797 }
 0xea0   :  { %1274 = vrot.lane.b32.xlu0 %v1798_v35, %s1836_s27 }
 0xea4   :  { %778 = vrot.lane.b32.xlu0 %v777_v37, %s1836_s27 }
 0xea8   :  { %948 = vrot.lane.b32.xlu0 %v947_v40, %s1836_s27 }
 0xeac   :  { %1118 = vrot.lane.b32.xlu0 %v1117_v39, %s1836_s27 }
 0xf12   :  { %v1275_v42 = vpop.permute.xlu0 %1274 }
 0xf13   :  { %v1277_v18 = vmul.f32 %v1275_v42, %v1272_v53 }
 0xf15   :  { %v1279_v54 = vadd.f32 %v1278_v43, %v1277_v18 }
 0xf16   :  { %v779_v55 = vpop.permute.xlu0 %778 }
 0xf17   :  { %782 = vst.msk [vmem:[#allocation3 + $0x2] sm:$0x3] %vm696_vm6, %v779_v55  ;;  %v1287_v15 = vrot.slane %v1279_v54, %v2044_v58  ;;  %v1315_v58 = vld [vmem:[#allocation3 + $0x8] sm:$0x3] }
 0xf19   :  { %1288 = vrot.lane.b32.xlu0 %v1287_v15, %s1836_s27 }
 0xf1a   :  { %v949_v7 = vpop.permute.xlu0 %948 }
 0xf1b   :  { %952 = vst.msk [vmem:[#allocation3 + $0x6] sm:$0x3] %vm696_vm6, %v949_v7 }
 0xf1e   :  { %v1302_v57 = vld [vmem:[#allocation3 + $0x2] sm:$0x3]  ;;  %v1119_v59 = vpop.permute.xlu0 %1118 }
 0xf1f   :  { %v1304_v60 = vsel %vm1293_vm7, %v1302_v57, %v1303_v56  ;;  %v1306_v61 = vsel %vm1293_vm7, %v1303_v56, %v1302_v57  ;;  %1122 = vst.msk [vmem:[#allocation3 + $0xa] sm:$0x3] %vm696_vm6, %v1119_v59 }
 0xf20   :  { %1305 = vst.msk [vmem:[#allocation3 + $0x2] sm:$0x3] %vm696_vm6, %v1304_v60  ;;  %1307 = vst.msk [vmem:[#allocation3 + $0xc] sm:$0x3] %vm696_vm6, %v1306_v61 }
 0xf22   :  { %v1314_v62 = vld [vmem:[#allocation3 + $0x6] sm:$0x3] }
 0xf23   :  { %v1316_v63 = vsel %vm1293_vm7, %v1314_v62, %v1315_v58  ;;  %v1318_v1 = vsel %vm1293_vm7, %v1315_v58, %v1314_v62 }
 0xf24   :  { %1317 = vst.msk [vmem:[#allocation3 + $0x6] sm:$0x3] %vm696_vm6, %v1316_v63  ;;  %1319 = vst.msk [vmem:[#allocation3 + $0x8] sm:$0x3] %vm696_vm6, %v1318_v1 }
 0xf26   :  { %v1309_v3 = vld [vmem:[#allocation3 + $0xa] sm:$0x3] }
 0xf27   :  { %v1310_v4 = vsel %vm1293_vm7, %v1308_v0, %v1309_v3  ;;  %v1312_v5 = vsel %vm1293_vm7, %v1309_v3, %v1308_v0  ;;  %v2318_v20 = vld [vmem:[#allocation3 + $0x2] sm:$0x3]  ;;  %v2330_v26 = vld [vmem:[#allocation3 + $0xc] sm:$0x3] }
 0xf28   :  { %1311 = vst.msk [vmem:[#allocation3 + $0x4] sm:$0x3] %vm696_vm6, %v1310_v4  ;;  %1313 = vst.msk [vmem:[#allocation3 + $0xa] sm:$0x3] %vm696_vm6, %v1312_v5  ;;  %v1336_v22 = vmul.f32 %v1672_v9, %v2318_v20  ;;  %v1341_v30 = vmul.f32 %v1672_v9, %v2330_v26 }
 0xf2a   :  { %v1346_v24 = vsel %vm696_vm6, %v1336_v22, 0.0  ;;  %v1361_v52 = vsel %vm696_vm6, %v1341_v30, 0.0 }
 0xf2b   :  { %v2308_v8 = vld [vmem:[#allocation3 + $0x6] sm:$0x3]  ;;  %v2326_v16 = vld [vmem:[#allocation3 + $0x8] sm:$0x3] }
 0xf2c   :  { %v1338_v10 = vmul.f32 %v1672_v9, %v2308_v8  ;;  %v1339_v17 = vmul.f32 %v1672_v9, %v2326_v16 }
 0xf2e   :  { %v1352_v12 = vsel %vm696_vm6, %v1338_v10, 0.0  ;;  %v1355_v28 = vsel %vm696_vm6, %v1339_v17, 0.0 }
 0xf2f   :  { %1353 = vadd.xlane.f32.xlu1 %v1352_v12  ;;  %v2315_v14 = vld [vmem:[#allocation3 + $0xa] sm:$0x3]  ;;  %v2322_v23 = vld [vmem:[#allocation3 + $0x4] sm:$0x3] }
 0xf30   :  { %v1340_v19 = vmul.f32 %v1672_v9, %v2315_v14  ;;  %v1337_v6 = vmul.f32 %v1672_v9, %v2322_v23 }
 0xf32   :  { %v1358_v21 = vsel %vm696_vm6, %v1340_v19, 0.0  ;;  %v1349_v25 = vsel %vm696_vm6, %v1337_v6, 0.0 }
 0xf33   :  { %1359 = vadd.xlane.f32.xlu1 %v1358_v21 }
 0xf38   :  { %1347 = vadd.xlane.f32.xlu0 %v1346_v24 }
 0xf3c   :  { %1350 = vadd.xlane.f32.xlu0 %v1349_v25 }
 0xf40   :  { %1356 = vadd.xlane.f32.xlu0 %v1355_v28 }
 0xf44   :  { %1362 = vadd.xlane.f32.xlu0 %v1361_v52 }
 0xf8b   :  { %v1289_v31 = vpop.permute.xlu0 %1288 }
 0xf8c   :  { %1292 = vst.msk [vmem:[#allocation3 + $0xe] sm:$0x3] %vm696_vm6, %v1289_v31 }
 0xf93   :  { %v1295_v33 = vld [vmem:[#allocation3 + $0xe] sm:$0x3] }
 0xf94   :  { %v1298_v34 = vsel %vm1293_vm7, %v1294_v46, %v1295_v33  ;;  %v1300_v36 = vsel %vm1293_vm7, %v1295_v33, %v1294_v46 }
 0xf95   :  { %1299 = vst.msk [vmem:[#allocation3] sm:$0x3] %vm696_vm6, %v1298_v34  ;;  %1301 = vst.msk [vmem:[#allocation3 + $0xe] sm:$0x3] %vm696_vm6, %v1300_v36 }
 0xf9c   :  { %v2342_v38 = vld [vmem:[#allocation3] sm:$0x3]  ;;  %v2344_v11 = vld [vmem:[#allocation3 + $0xe] sm:$0x3] }
 0xf9d   :  { %v1335_v41 = vmul.f32 %v1672_v9, %v2342_v38  ;;  %v1342_v45 = vmul.f32 %v1672_v9, %v2344_v11 }
 0xf9f   :  { %v1343_v44 = vsel %vm696_vm6, %v1335_v41, 0.0  ;;  %v1364_v47 = vsel %vm696_vm6, %v1342_v45, 0.0 }
 0xfa0   :  { %1344 = vadd.xlane.f32.xlu1 %v1343_v44 }
 0xfa4   :  { %1365 = vadd.xlane.f32.xlu1 %v1364_v47 }
 0xfbc   :  { %v1354_v29 = vpop.xlane.xlu1 %1353 }
 0xfbd   :  { %v1377_v2 = vadd.f32 %v1673_v49, %v1354_v29 }
 0xfbf   :  { %1799 = vtanh.f32 %v1377_v2 }
 0xfc0   :  { %v1360_v51 = vpop.xlane.xlu1 %1359 }
 0xfc1   :  { %v1379_v39 = vadd.f32 %v1673_v49, %v1360_v51 }
 0xfc5   :  { %v1348_v50 = vpop.xlane.xlu0 %1347 }
 0xfc6   :  { %v1375_v35 = vadd.f32 %v1673_v49, %v1348_v50 }
 0xfc8   :  { %1801 = vtanh.f32 %v1375_v35 }
 0xfc9   :  { %v1351_v13 = vpop.xlane.xlu0 %1350  ;;  %v1800_v55 = vpop.eup %1799 }
 0xfca   :  { %v1376_v42 = vadd.f32 %v1673_v49, %v1351_v13  ;;  %v1394_v0 = vsel %vm1390_vm8, %v1800_v55, -inf }
 0xfcd   :  { %v1357_v48 = vpop.xlane.xlu0 %1356 }
 0xfce   :  { %v1378_v37 = vadd.f32 %v1673_v49, %v1357_v48 }
 0xfd0   :  { %1803 = vtanh.f32 %v1378_v37 }
 0xfd1   :  { %v1363_v32 = vpop.xlane.xlu0 %1362 }
 0xfd2   :  { %v1380_v40 = vadd.f32 %v1673_v49, %v1363_v32  ;;  %v1802_v15 = vpop.eup %1801 }
 0xfd3   :  { %v1392_v58 = vsel %vm1390_vm8, %v1802_v15, -inf }
 0xfd4   :  { %1805 = vtanh.f32 %v1380_v40 }
 0xfda   :  { %v1804_v7 = vpop.eup %1803 }
 0xfdb   :  { %v1395_v62 = vsel %vm1390_vm8, %v1804_v7, -inf }
 0xfde   :  { %v1806_v56 = vpop.eup %1805 }
 0xfdf   :  { %v1399_v63 = vsel %vm1390_vm8, %v1806_v56, -inf }
0x102d   :  { %v1345_v53 = vpop.xlane.xlu1 %1344 }
0x102e   :  { %v1374_v43 = vadd.f32 %v1673_v49, %v1345_v53 }
0x1030   :  { %1807 = vtanh.f32 %v1374_v43 }
0x1031   :  { %1809 = vtanh.f32 %v1379_v39  ;;  %v1366_v18 = vpop.xlane.xlu1 %1365 }
0x1032   :  { %1811 = vtanh.f32 %v1376_v42  ;;  %v1381_v54 = vadd.f32 %v1673_v49, %v1366_v18 }
0x1034   :  { %1813 = vtanh.f32 %v1381_v54 }
0x103a   :  { %v1808_v57 = vpop.eup %1807 }
0x103b   :  { %v1810_v59 = vpop.eup %1809  ;;  %v1391_v60 = vsel %vm1390_vm8, %v1808_v57, -inf }
0x103c   :  { %v1812_v61 = vpop.eup %1811  ;;  %v1396_v27 = vmax.f32 %v1391_v60, %v1395_v62  ;;  %v1397_v3 = vsel %vm1390_vm8, %v1810_v59, -inf }
0x103d   :  { %v1393_v4 = vsel %vm1390_vm8, %v1812_v61, -inf  ;;  %v1398_v9 = vmax.f32 %v1392_v58, %v1397_v3  ;;  %v1517_v3 = vld [vmem:[%s2427_s7] sm:$0xff] }
0x103e   :  { %v1814_v1 = vpop.eup %1813  ;;  %v1400_v10 = vmax.f32 %v1393_v4, %v1399_v63  ;;  %v1518_v4 = vld [vmem:[%s2427_s7 + $0x8] sm:$0xff] }
0x103f   :  { %v1401_v5 = vsel %vm1390_vm8, %v1814_v1, -inf  ;;  %v1403_v19 = vmax.f32 %v1396_v27, %v1398_v9 }
0x1040   :  { %v1402_v12 = vmax.f32 %v1394_v0, %v1401_v5  ;;  %v1837_v0 = vmov 0.0|0.0   ;;  %v1707_v5 = vpack.c.bf16 %v1518_v4, %v1517_v3 }
0x1041   :  { %1706 = vmatprep.subr.bf16.mxu1 %v1837_v0 }
0x1042   :  { %v1404_v21 = vmax.f32 %v1400_v10, %v1402_v12  ;;  %1708 = vmatpush3.bf16.msra.mxu1 %v1707_v5  ;;  %v1519_v10 = vld [vmem:[%s2427_s7 + $0x10] sm:$0xff]  ;;  %v1520_v12 = vld [vmem:[%s2427_s7 + $0x18] sm:$0xff] }
0x1043   :  { %1709 = vmatprep.subr.bf16.mxu1 %v1837_v0 }
0x1044   :  { %v1405_v22 = vmax.f32 %v1403_v19, %v1404_v21  ;;  %v1710_v19 = vpack.c.bf16 %v1520_v12, %v1519_v10 }
0x1046   :  { %v1406_v24 = vsub.f32 %v1808_v57, %v1405_v22  ;;  %v1407_v6 = vsub.f32 %v1802_v15, %v1405_v22  ;;  %v1408_v25 = vsub.f32 %v1812_v61, %v1405_v22  ;;  %v1409_v17 = vsub.f32 %v1800_v55, %v1405_v22  ;;  %1711 = vmatpush3.bf16.msra.mxu1 %v1710_v19 }
0x1047   :  { %v1410_v28 = vsub.f32 %v1804_v7, %v1405_v22  ;;  %v1411_v46 = vsub.f32 %v1810_v59, %v1405_v22  ;;  %v1412_v34 = vsub.f32 %v1806_v56, %v1405_v22  ;;  %v1413_v41 = vsub.f32 %v1814_v1, %v1405_v22  ;;  %v1521_v22 = vld [vmem:[%s2427_s7 + $0x20] sm:$0xff]  ;;  %1712 = vmatprep.subr.bf16.mxu1 %v1837_v0 }
0x1048   :  { %v1414_v30 = vmul.f32 1.442695, %v1406_v24  ;;  %v1416_v52 = vmul.f32 1.442695, %v1407_v6  ;;  %v1418_v31 = vmul.f32 1.442695, %v1408_v25 }
0x1049   :  { %v1420_v33 = vmul.f32 1.442695, %v1409_v17  ;;  %v1422_v36 = vmul.f32 1.442695, %v1410_v28  ;;  %v1424_v44 = vmul.f32 1.442695, %v1411_v46 }
0x104a   :  { %1815 = vpow2.f32 %v1414_v30  ;;  %v1426_v45 = vmul.f32 1.442695, %v1412_v34  ;;  %v1428_v47 = vmul.f32 1.442695, %v1413_v41  ;;  %v1522_v24 = vld [vmem:[%s2427_s7 + $0x28] sm:$0xff]  ;;  %v1523_v25 = vld [vmem:[%s2427_s7 + $0x30] sm:$0xff] }
0x104b   :  { %1817 = vpow2.f32 %v1416_v52  ;;  %v1713_v6 = vpack.c.bf16 %v1522_v24, %v1521_v22  ;;  %v1524_v17 = vld [vmem:[%s2427_s7 + $0x38] sm:$0xff]  ;;  %v1839_v30 = vmov 0.0  }
0x104c   :  { %1819 = vpow2.f32 %v1418_v31  ;;  %v1716_v28 = vpack.c.bf16 %v1524_v17, %v1523_v25  ;;  %1703 = vmatprep.mubr.msk.f32.mxu1 %vm1838_vm9, %v1839_v30 }
0x104d   :  { %1821 = vpow2.f32 %v1420_v33  ;;  %1714 = vmatpush3.bf16.msra.mxu1 %v1713_v6 }
0x104e   :  { %1823 = vpow2.f32 %v1422_v36  ;;  %1715 = vmatprep.subr.bf16.mxu1 %v1837_v0 }
0x104f   :  { %1825 = vpow2.f32 %v1424_v44 }
0x1050   :  { %1827 = vpow2.f32 %v1426_v45 }
0x1051   :  { %1829 = vpow2.f32 %v1428_v47  ;;  %1717 = vmatpush3.bf16.msra.mxu1 %v1716_v28 }
0x1054   :  { %v1816_v50 = vpop.eup %1815 }
0x1055   :  { %v1818_v13 = vpop.eup %1817  ;;  %v1430_v48 = vsel %vm1390_vm8, %v1816_v50, 0.0 }
0x1056   :  { %v1820_v29 = vpop.eup %1819  ;;  %v1431_v49 = vsel %vm1390_vm8, %v1818_v13, 0.0 }
0x1057   :  { %v1822_v2 = vpop.eup %1821  ;;  %v1432_v32 = vadd.f32 %v1431_v49, %v1430_v48  ;;  %v1433_v51 = vsel %vm1390_vm8, %v1820_v29, 0.0 }
0x1058   :  { %v1824_v35 = vpop.eup %1823  ;;  %v1435_v40 = vsel %vm1390_vm8, %v1822_v2, 0.0 }
0x1059   :  { %v1434_v37 = vadd.f32 %v1433_v51, %v1432_v32  ;;  %v1826_v39 = vpop.eup %1825  ;;  %v1437_v42 = vsel %vm1390_vm8, %v1824_v35, 0.0 }
0x105a   :  { %v1828_v43 = vpop.eup %1827  ;;  %v1439_v54 = vsel %vm1390_vm8, %v1826_v39, 0.0 }
0x105b   :  { %v1436_v53 = vadd.f32 %v1435_v40, %v1434_v37  ;;  %v1830_v55 = vpop.eup %1829  ;;  %v1441_v7 = vsel %vm1390_vm8, %v1828_v43, 0.0 }
0x105c   :  { %v1443_v57 = vsel %vm1390_vm8, %v1830_v55, 0.0 }
0x105d   :  { %v1438_v18 = vadd.f32 %v1437_v42, %v1436_v53 }
0x105f   :  { %v1440_v15 = vadd.f32 %v1439_v54, %v1438_v18  ;;  %v18_v18 = vstv %s2428_s10 }
0x1060   :  { %19 = vst [vmem:[#allocation5] sm:$0x1] %v18_v18 }
0x1061   :  { %v1442_v56 = vadd.f32 %v1441_v7, %v1440_v15 }
0x1063   :  { %v1444_v59 = vadd.f32 %v1443_v57, %v1442_v56 }
0x1065   :  { %1831 = vrcp.f32 %v1444_v59 }
0x1067   :  { %v1677_v59 = vld [vmem:[#allocation5] ss:$0 sm:$0xff] }
0x106f   :  { %v1832_v60 = vpop.eup %1831 }
0x1070   :  { %v1447_v61 = vmul.f32 %v1832_v60, %v1818_v13  ;;  %v1446_v58 = vmul.f32 %v1832_v60, %v1816_v50  ;;  %v1448_v62 = vmul.f32 %v1832_v60, %v1820_v29  ;;  %v1449_v63 = vmul.f32 %v1832_v60, %v1822_v2 }
0x1071   :  { %v1450_v1 = vmul.f32 %v1832_v60, %v1824_v35  ;;  %v1451_v27 = vmul.f32 %v1832_v60, %v1826_v39  ;;  %v1452_v9 = vmul.f32 %v1832_v60, %v1828_v43  ;;  %v1453_v21 = vmul.f32 %v1832_v60, %v1830_v55 }
0x1072   :  { %1461 = vperm.xlu1 %1726, %v1447_v61   ;;  %1456 = vperm.xlu0 %1725, %v1446_v58  }
0x1076   :  { %1466 = vperm.xlu1 %1726, %v1448_v62  }
0x107a   :  { %1471 = vperm.xlu1 %1726, %v1449_v63  }
0x107e   :  { %1476 = vperm.xlu1 %1726, %v1450_v1  }
0x1082   :  { %1481 = vperm.xlu1 %1726, %v1451_v27  }
0x1086   :  { %1486 = vperm.xlu1 %1726, %v1452_v9  }
0x108a   :  { %1491 = vperm.xlu1 %1726, %v1453_v21  }
0x10f1   :  { %v1462_v52 = vpop.permute.xlu1 %1461  ;;  %v1457_v46 = vpop.permute.xlu0 %1456 }
0x10f2   :  { %v1495_v34 = vmul.f32 %v1462_v52, %v2318_v20  ;;  %v1494_v36 = vmul.f32 %v1457_v46, %v2342_v38 }
0x10f4   :  { %v1503_v45 = vsel %vm696_vm6, %v1495_v34, 0.0  ;;  %v1502_v47 = vsel %vm696_vm6, %v1494_v36, 0.0 }
0x10f5   :  { %v1467_v31 = vpop.permute.xlu1 %1466  ;;  %v1504_v29 = vadd.f32 %v1503_v45, %v1502_v47 }
0x10f6   :  { %v1496_v41 = vmul.f32 %v1467_v31, %v2322_v23 }
0x10f8   :  { %v1505_v13 = vsel %vm696_vm6, %v1496_v41, 0.0 }
0x10f9   :  { %v1472_v33 = vpop.permute.xlu1 %1471  ;;  %v1506_v38 = vadd.f32 %v1505_v13, %v1504_v29 }
0x10fa   :  { %v1497_v50 = vmul.f32 %v1472_v33, %v2308_v8 }
0x10fc   :  { %v1507_v2 = vsel %vm696_vm6, %v1497_v50, 0.0 }
0x10fd   :  { %v1477_v44 = vpop.permute.xlu1 %1476  ;;  %v1508_v32 = vadd.f32 %v1507_v2, %v1506_v38 }
0x10fe   :  { %v1498_v48 = vmul.f32 %v1477_v44, %v2326_v16 }
0x1100   :  { %v1509_v23 = vsel %vm696_vm6, %v1498_v48, 0.0 }
0x1101   :  { %v1482_v49 = vpop.permute.xlu1 %1481  ;;  %v1510_v8 = vadd.f32 %v1509_v23, %v1508_v32 }
0x1102   :  { %v1499_v20 = vmul.f32 %v1482_v49, %v2315_v14 }
0x1104   :  { %v1511_v35 = vsel %vm696_vm6, %v1499_v20, 0.0 }
0x1105   :  { %v1487_v51 = vpop.permute.xlu1 %1486  ;;  %v1512_v39 = vadd.f32 %v1511_v35, %v1510_v8 }
0x1106   :  { %v1500_v37 = vmul.f32 %v1487_v51, %v2330_v26  ;;  %v1674_v26 = vld [vmem:[%s2429_s8] ss:$0 sm:$0xff] }
0x1108   :  { %v1513_v40 = vsel %vm696_vm6, %v1500_v37, 0.0 }
0x1109   :  { %v1492_v16 = vpop.permute.xlu1 %1491  ;;  %v1514_v42 = vadd.f32 %v1513_v40, %v1512_v39 }
0x110a   :  { %v1501_v53 = vmul.f32 %v1492_v16, %v2344_v11  ;;  %v1676_v11 = vld [vmem:[%s2430_s9] ss:$0 sm:$0xff] }
0x110c   :  { %v1515_v43 = vsel %vm696_vm6, %v1501_v53, 0.0 }
0x110d   :  { %v1516_v14 = vadd.f32 %v1515_v43, %v1514_v42 }
0x110f   :  { %1704 = vmatmul.mubr.msk.f32.vlgmr.msra.gmra.mrb[16].mxu1 %vm168_vm0, %v1516_v14 }
0x11e2   :  { %v1601_v54 = vpop.f32.mrb[16].mxu1 }
0x11e3   :  { %v1602_v55 = vadd.f32 %v1674_v26, %v1601_v54  ;;  %v1705_v15 = vpop.f32.mrb[17].mxu1 }
0x11e5   :  { %v1605_v7 = vmax.f32 %v1602_v55, 0.0 }
0x11e7   :  { %v1613_v56 = vmul.f32 %v1676_v11, %v1605_v7 }
0x11e9   :  { %v1615_v57 = vsel %vm1614_vm10, %v1613_v56, 0.0 }
0x11ea   :  { %1616 = vadd.xlane.f32.xlu1 %v1615_v57 }
0x1277   :  { %v1617_v60 = vpop.xlane.xlu1 %1616 }
0x1278   :  { %v1625_v61 = vadd.f32 %v1677_v59, %v1617_v60 }
0x127a   :  { %1626 = vst.msk [vmem:[%s2431_s11] sm:$0x3] %vm1390_vm8, %v1625_v61 }

</bundles_post_ra>
